<compile_context>
chip_gen: v7x
topology: tpu7x:2x2x1
jax: 0.10.0
libtpu: 0.0.40
codegen_flags: <defaults>
</compile_context>

<pallas_src>
import math
import functools

import numpy as np
import jax
import jax.numpy as jnp
from jax.experimental import pallas as pl
from jax.experimental.pallas import tpu as pltpu

_EPS = 1e-12     # nn.LayerNorm(eps=1e-12)
_NEG = -1e30     # additive mask value (== masked_fill(-inf): exp underflows to 0)


# ------------------------------------------------------------------ helpers --
def _gelu(x):
    # tanh-form GELU: the transcendental lands on the EUP slot instead of a
    # ~10-op dependent VALU Horner chain.
    # TODO(synk): torch nn.GELU() default is exact erf; tanh form differs by
    # <= ~1e-3 (accuracy/perf tradeoff, well inside the test tolerance).
    c = 0.7978845608028654  # sqrt(2/pi)
    return 0.5 * x * (1.0 + jnp.tanh(c * (x + 0.044715 * (x * x * x))))


# ------------------------------------------------------- host-side constants --
def _chunk_coords(B, S, n_heads):
    """(batch, head, pseudo-seq) of every row of the column-block-major chunk
    layout: chunk row r = c*(B*S) + b*S + i holds x[b, i, c*dh:(c+1)*dh], which
    under torch's row-major reshape(B, n_heads, S, dh) is head h, pseudo-seq s
    with h*S + s == i*n_heads + c."""
    Rr = B * S
    idx = np.arange(Rr * n_heads)
    c, I = idx // Rr, idx % Rr
    b, i = I // S, I % S
    t = i * n_heads + c
    return b, t // S, t % S


def _attention_masks(B, Sq, Sk, n_heads):
    """Additive masks over chunk rows, self (causal) and cross, concatenated
    along the key axis into one (Pq, Pq+Pk) operand."""
    bq, hq, sq = _chunk_coords(B, Sq, n_heads)
    bks, hks, sks = _chunk_coords(B, Sq, n_heads)   # self-attention keys
    bkc, hkc, _ = _chunk_coords(B, Sk, n_heads)     # cross-attention keys
    m_self = ((bq[:, None] == bks[None, :]) & (hq[:, None] == hks[None, :])
              & (sks[None, :] <= sq[:, None]))
    m_cross = (bq[:, None] == bkc[None, :]) & (hq[:, None] == hkc[None, :])
    m = np.concatenate([np.where(m_self, 0.0, _NEG),
                        np.where(m_cross, 0.0, _NEG)], axis=1)
    return jnp.asarray(m.astype(np.float32))


# --------------------------------------------------------------- fused kernel --
def _decoder_kernel(x_ref, keyc_ref, masks_ref, wattn_ref, wo_ref, wffn_ref,
                    vecs_ref, o_ref, cs_ref, xs_ref, kv_ref,
                    *, n_heads, num_layers):
    f32 = jnp.float32
    R, H = x_ref.shape                 # R = B*Sq (batch folded into rows)
    dh = H // n_heads
    FF = wffn_ref.shape[2]
    Pq = R * n_heads                   # query rows in chunk layout
    Pk = keyc_ref.shape[0]             # key rows in chunk layout (B*Sk*nh)

    def vec(i, w):                     # (1, w) row of the packed vector blob
        return vecs_ref[i:i + 1, 0:w]

    # Hoist + pre-broadcast only the hot (R, .) vectors (LN params, row-level
    # biases).  Chunk-level biases stay (1, 3dh); weights / masks / cross K,V
    # stay refs re-read at point of use, keeping the live set small across the
    # unrolled loop (Python `for` does not bound live ranges).
    g1 = jnp.broadcast_to(vec(0, H), (R, H))
    b1 = jnp.broadcast_to(vec(1, H), (R, H))
    g2 = jnp.broadcast_to(vec(2, H), (R, H))
    b2 = jnp.broadcast_to(vec(3, H), (R, H))
    g3 = jnp.broadcast_to(vec(4, H), (R, H))
    b3 = jnp.broadcast_to(vec(5, H), (R, H))
    bqkv1 = vec(6, 3 * dh)             # [bq1*scale | bk1 | bv1]
    bq2kv = vec(7, 3 * dh)             # [bq2*scale | bk2 | bv2]
    bo1 = jnp.broadcast_to(vec(8, H), (R, H))
    bo2 = jnp.broadcast_to(vec(9, H), (R, H))
    bf1 = jnp.broadcast_to(vec(10, FF), (R, FF))
    bf2 = jnp.broadcast_to(vec(11, H), (R, H))

    def layernorm(x, g, b):
        mu = jnp.mean(x, axis=-1, keepdims=True)
        xc = x - mu
        var = jnp.mean(xc * xc, axis=-1, keepdims=True)
        return xc * jax.lax.rsqrt(var + _EPS) * g + b

    def to_chunks(x2):
        # (R, nh*dh) -> (Pq, dh) in column-block-major chunk order.  Pure layout
        # plumbing: contiguous 8-aligned sublane-block stores into VMEM scratch
        # (vst slots); the MXU is untouched.
        for c in range(n_heads):
            cs_ref[c * R:(c + 1) * R, :] = x2[:, c * dh:(c + 1) * dh]
        return cs_ref[...]

    def from_chunks(oc):
        # inverse regroup (Pq, dh) -> (R, nh*dh): column writes into scratch.
        for c in range(n_heads):
            xs_ref[:, c * dh:(c + 1) * dh] = oc[c * R:(c + 1) * R, :]
        return xs_ref[...]

    def attend(qc, kc, vc, add_mask):
        # All (batch, head) groups at once; the block-diagonal additive mask
        # keeps them separate.  Q.K^T via dot_general (no transpose materialised).
        s = jax.lax.dot_general(qc, kc, (((1,), (1,)), ((), ())),
                                preferred_element_type=f32)
        s = s + add_mask
        s = s - jnp.max(s, axis=-1, keepdims=True)
        p = jnp.exp(s)
        p = p * pl.reciprocal(jnp.sum(p, axis=-1, keepdims=True), approx=True)
        # TODO(synk): nn.Dropout(0.1) on attention weights is identity (eval).
        return jnp.dot(p, vc, preferred_element_type=f32)

    # Cross-attention K/V depend only on the layer-invariant `key`: project once
    # and park in VMEM scratch (re-read per layer instead of living in vregs).
    kv_ref[...] = (jnp.dot(keyc_ref[...], wattn_ref[1][:, dh:],
                           preferred_element_type=f32) + bq2kv[:, dh:])

    q2d = x_ref[...]                   # residual stream, (R, H), stays in VMEM

    for _ in range(num_layers):        # shared weights, small static unroll
        # ---- masked multi-head self-attention -------------------------------
        c1 = to_chunks(layernorm(q2d, g1, b1))
        qkv = jnp.dot(c1, wattn_ref[0], preferred_element_type=f32) + bqkv1
        oc = attend(qkv[:, 0:dh], qkv[:, dh:2 * dh], qkv[:, 2 * dh:],
                    masks_ref[:, 0:Pq])
        q2d = q2d + jnp.dot(from_chunks(oc), wo_ref[0],
                            preferred_element_type=f32) + bo1
        # ---- multi-head cross-attention over `key` ---------------------------
        c2 = to_chunks(layernorm(q2d, g2, b2))
        qc = (jnp.dot(c2, wattn_ref[1][:, 0:dh], preferred_element_type=f32)
              + bq2kv[:, 0:dh])
        oc = attend(qc, kv_ref[:, 0:dh], kv_ref[:, dh:],
                    masks_ref[:, Pq:Pq + Pk])
        q2d = q2d + jnp.dot(from_chunks(oc), wo_ref[1],
                            preferred_element_type=f32) + bo2
        # ---- position-wise feed-forward --------------------------------------
        n3 = layernorm(q2d, g3, b3)
        h = _gelu(jnp.dot(n3, wffn_ref[0], preferred_element_type=f32) + bf1)
        q2d = q2d + jax.lax.dot_general(h, wffn_ref[1],
                                        (((1,), (1,)), ((), ())),
                                        preferred_element_type=f32) + bf2
        # TODO(synk): residual/FFN dropouts are identity in eval mode.

    o_ref[...] = q2d.astype(o_ref.dtype)


# ------------------------------------------------------------------- wrapper --
def transformer_decoder(query, key, params, *, n_heads, num_layers):
    B, Sq, H = query.shape
    Bk, Sk, Hk = key.shape
    assert Bk == B and Hk == H and H % n_heads == 0
    dh = H // n_heads
    FF = params["w1"].shape[1]
    R = B * Sq
    Pq, Pk = R * n_heads, B * Sk * n_heads
    scale = 1.0 / math.sqrt(dh)
    p = params

    # --- trace-time packing (tiny, one-off): 7 operands instead of 26 --------
    w_attn = jnp.stack([
        jnp.concatenate([p["wq1"] * scale, p["wk1"], p["wv1"]], axis=1),
        jnp.concatenate([p["wq2"] * scale, p["wk2"], p["wv2"]], axis=1)])
    wo = jnp.stack([p["wo1"], p["wo2"]])
    w_ffn = jnp.stack([p["w1"], p["w2"].T])      # second used via dot_general

    W = max(H, FF, 3 * dh)

    def pad(v):
        return jnp.pad(v.astype(jnp.float32), ((0, 0), (0, W - v.shape[1])))

    vecs = jnp.concatenate([
        pad(p["g1"]), pad(p["b1"]), pad(p["g2"]), pad(p["b2"]),
        pad(p["g3"]), pad(p["b3"]),
        pad(jnp.concatenate([p["bq1"] * scale, p["bk1"], p["bv1"]], axis=1)),
        pad(jnp.concatenate([p["bq2"] * scale, p["bk2"], p["bv2"]], axis=1)),
        pad(p["bo1"]), pad(p["bo2"]), pad(p["bf1"]), pad(p["bf2"])], axis=0)

    # Column-block-major chunk layout of `key`: row c*(B*Sk)+I holds
    # key2d[I, c*dh:(c+1)*dh] (host-side, free).
    key2d = key.reshape(B * Sk, H)
    keyc = key2d.reshape(B * Sk, n_heads, dh).transpose(1, 0, 2).reshape(Pk, dh)

    x2d = query.reshape(R, H)                    # batch folded into rows
    masks = _attention_masks(B, Sq, Sk, n_heads)

    inputs = (x2d, keyc, masks, w_attn, wo, w_ffn, vecs)

    def full_spec(a):
        nd = a.ndim
        return pl.BlockSpec(a.shape, lambda i, _nd=nd: (0,) * _nd)

    kernel = functools.partial(_decoder_kernel, n_heads=n_heads,
                               num_layers=num_layers)
    out = pl.pallas_call(
        kernel,
        out_shape=jax.ShapeDtypeStruct((R, H), query.dtype),
        grid=(1,),                                   # whole problem, one step
        in_specs=[full_spec(a) for a in inputs],
        out_specs=pl.BlockSpec((R, H), lambda i: (0, 0)),
        scratch_shapes=[
            pltpu.VMEM((Pq, dh), jnp.float32),       # chunk-layout scratch
            pltpu.VMEM((R, H), jnp.float32),         # 2D-layout scratch
            pltpu.VMEM((Pk, 2 * dh), jnp.float32),   # cross-attn K/V (once)
        ],
        compiler_params=pltpu.CompilerParams(
            dimension_semantics=("arbitrary",),
            vmem_limit_bytes=32 * 1024 * 1024),
    )(*inputs)
    return out.reshape(B, Sq, H)


# ------------------------------------------------------- pure-JAX reference --
def _reference_decoder(query, key, params, *, n_heads, num_layers):
    B, Sq, H = query.shape
    _, Sk, _ = key.shape
    dh = H // n_heads
    p = params

    def ln(x, g, b):
        mu = jnp.mean(x, axis=-1, keepdims=True)
        var = jnp.mean((x - mu) ** 2, axis=-1, keepdims=True)
        return (x - mu) / jnp.sqrt(var + _EPS) * g + b

    def mha(q_in, k_in, v_in, wq, bq, wk, bk, wv, bv, wo, bo, masked):
        S1, S2 = q_in.shape[1], k_in.shape[1]
        q4 = q_in.reshape(B, n_heads, S1, dh)
        k4 = k_in.reshape(B, n_heads, S2, dh)
        v4 = v_in.reshape(B, n_heads, S2, dh)
        qp, kp, vp = q4 @ wq + bq, k4 @ wk + bk, v4 @ wv + bv
        score = jnp.einsum('bhqd,bhkd->bhqk', qp, kp) / math.sqrt(dh)
        if masked:
            tri = jnp.tril(jnp.ones((S2, S2)))
            score = jnp.where(tri == 0, -jnp.inf, score)
        attn = jax.nn.softmax(score, axis=-1)
        out = jnp.einsum('bhqk,bhkd->bhqd', attn, vp).reshape(B, S1, H)
        return out @ wo + bo

    def gelu(x):
        return 0.5 * x * (1.0 + jax.scipy.special.erf(x / jnp.sqrt(2.0)))

    q = query
    for _ in range(num_layers):
        n1 = ln(q, p["g1"], p["b1"])
        q = q + mha(n1, n1, n1, p["wq1"], p["bq1"], p["wk1"], p["bk1"],
                    p["wv1"], p["bv1"], p["wo1"], p["bo1"], True)
        n2 = ln(q, p["g2"], p["b2"])
        q = q + mha(n2, key, key, p["wq2"], p["bq2"], p["wk2"], p["bk2"],
                    p["wv2"], p["bv2"], p["wo2"], p["bo2"], False)
        n3 = ln(q, p["g3"], p["b3"])
        q = q + gelu(n3 @ p["w1"] + p["bf1"]) @ p["w2"] + p["bf2"]
    return q


# ------------------------------------------------------------------- params --
def _linear_init(key_, fan_in, fan_out):
    kw, kb = jax.random.split(key_)
    bound = 1.0 / math.sqrt(fan_in)
    w = jax.random.uniform(kw, (fan_in, fan_out), jnp.float32, -bound, bound)
    b = jax.random.uniform(kb, (1, fan_out), jnp.float32, -bound, bound)
    return w, b


def init_params(key_, h_dim, n_heads, dim_ff):
    dh = h_dim // n_heads
    ks = jax.random.split(key_, 10)
    wq1, bq1 = _linear_init(ks[0], dh, dh)
    wk1, bk1 = _linear_init(ks[1], dh, dh)
    wv1, bv1 = _linear_init(ks[2], dh, dh)
    wo1, bo1 = _linear_init(ks[3], h_dim, h_dim)
    wq2, bq2 = _linear_init(ks[4], dh, dh)
    wk2, bk2 = _linear_init(ks[5], dh, dh)
    wv2, bv2 = _linear_init(ks[6], dh, dh)
    wo2, bo2 = _linear_init(ks[7], h_dim, h_dim)
    w1, bf1 = _linear_init(ks[8], h_dim, dim_ff)
    w2, bf2 = _linear_init(ks[9], dim_ff, h_dim)
    ones = jnp.ones((1, h_dim), jnp.float32)
    zeros = jnp.zeros((1, h_dim), jnp.float32)
    return dict(wq1=wq1, bq1=bq1, wk1=wk1, bk1=bk1, wv1=wv1, bv1=bv1,
                wo1=wo1, bo1=bo1,
                wq2=wq2, bq2=bq2, wk2=wk2, bk2=bk2, wv2=wv2, bv2=bv2,
                wo2=wo2, bo2=bo2,
                g1=ones, b1=zeros, g2=ones, b2=zeros, g3=ones, b3=zeros,
                w1=w1, bf1=bf1, w2=w2, bf2=bf2)


# ---------------------------------------------------------------------- main --
if __name__ == "__main__":
    B, S_Q, S_K = 2, 8, 8
    H_DIM, N_HEADS, NUM_LAYERS, DIM_FF = 32, 4, 2, 64

    root = jax.random.PRNGKey(0)
    kq, kk, kp = jax.random.split(root, 3)
    params = init_params(kp, H_DIM, N_HEADS, DIM_FF)
    query = jax.random.normal(kq, (B, S_Q, H_DIM), jnp.float32)
    key = jax.random.normal(kk, (B, S_K, H_DIM), jnp.float32)

    fwd = jax.jit(functools.partial(transformer_decoder,
                                    n_heads=N_HEADS, num_layers=NUM_LAYERS))
    y = jax.block_until_ready(fwd(query, key, params))
    assert y.shape == (B, S_Q, H_DIM) and y.dtype == jnp.float32

    y_ref = _reference_decoder(query, key, params,
                               n_heads=N_HEADS, num_layers=NUM_LAYERS)
    np.testing.assert_allclose(np.asarray(y), np.asarray(y_ref),
                               rtol=5e-2, atol=5e-2)
    print("KERNEL_OK")
</pallas_src>

<mosaic_0001>
module attributes {stable_mosaic.version = 11 : i64} {
  func.func @_decoder_kernel(%arg0: i32, %arg1: memref<16x32xf32, #tpu.memory_space<vmem>>, %arg2: memref<64x8xf32, #tpu.memory_space<vmem>>, %arg3: memref<64x128xf32, #tpu.memory_space<vmem>>, %arg4: memref<2x8x24xf32, #tpu.memory_space<vmem>>, %arg5: memref<2x32x32xf32, #tpu.memory_space<vmem>>, %arg6: memref<2x32x64xf32, #tpu.memory_space<vmem>>, %arg7: memref<12x64xf32, #tpu.memory_space<vmem>>, %arg8: memref<16x32xf32, #tpu.memory_space<vmem>>, %arg9: memref<64x8xf32, #tpu.memory_space<vmem>>, %arg10: memref<16x32xf32, #tpu.memory_space<vmem>>, %arg11: memref<64x16xf32, #tpu.memory_space<vmem>>) attributes {dimension_semantics = [#tpu.dimension_semantics<arbitrary>], iteration_bounds = array<i64: 1>, scalar_prefetch = 0 : i64, scratch_operands = 3 : i64, tpu.core_type = #tpu.core_type<tc>, window_params = [{pipeline_mode = #tpu.pipeline_mode<synchronous>, transform_indices = @transform_0, window_bounds = array<i64: 16, 32>}, {pipeline_mode = #tpu.pipeline_mode<synchronous>, transform_indices = @transform_1, window_bounds = array<i64: 64, 8>}, {pipeline_mode = #tpu.pipeline_mode<synchronous>, transform_indices = @transform_2, window_bounds = array<i64: 64, 128>}, {pipeline_mode = #tpu.pipeline_mode<synchronous>, transform_indices = @transform_3, window_bounds = array<i64: 2, 8, 24>}, {pipeline_mode = #tpu.pipeline_mode<synchronous>, transform_indices = @transform_4, window_bounds = array<i64: 2, 32, 32>}, {pipeline_mode = #tpu.pipeline_mode<synchronous>, transform_indices = @transform_5, window_bounds = array<i64: 2, 32, 64>}, {pipeline_mode = #tpu.pipeline_mode<synchronous>, transform_indices = @transform_6, window_bounds = array<i64: 12, 64>}, {pipeline_mode = #tpu.pipeline_mode<synchronous>, transform_indices = @transform_7, window_bounds = array<i64: 16, 32>}]} {
    %c0 = arith.constant 0 : index
    %c0_0 = arith.constant 0 : index
    %0 = vector.load %arg7[%c0, %c0_0] : memref<12x64xf32, #tpu.memory_space<vmem>>, vector<1x32xf32>
    %1 = vector.shape_cast %0 : vector<1x32xf32> to vector<1x32xf32>
    %2 = vector.broadcast %1 : vector<1x32xf32> to vector<16x32xf32>
    %c1 = arith.constant 1 : index
    %c0_1 = arith.constant 0 : index
    %3 = vector.load %arg7[%c1, %c0_1] : memref<12x64xf32, #tpu.memory_space<vmem>>, vector<1x32xf32>
    %4 = vector.shape_cast %3 : vector<1x32xf32> to vector<1x32xf32>
    %5 = vector.broadcast %4 : vector<1x32xf32> to vector<16x32xf32>
    %c2 = arith.constant 2 : index
    %c0_2 = arith.constant 0 : index
    %6 = vector.load %arg7[%c2, %c0_2] : memref<12x64xf32, #tpu.memory_space<vmem>>, vector<1x32xf32>
    %7 = vector.shape_cast %6 : vector<1x32xf32> to vector<1x32xf32>
    %8 = vector.broadcast %7 : vector<1x32xf32> to vector<16x32xf32>
    %c3 = arith.constant 3 : index
    %c0_3 = arith.constant 0 : index
    %9 = vector.load %arg7[%c3, %c0_3] : memref<12x64xf32, #tpu.memory_space<vmem>>, vector<1x32xf32>
    %10 = vector.shape_cast %9 : vector<1x32xf32> to vector<1x32xf32>
    %11 = vector.broadcast %10 : vector<1x32xf32> to vector<16x32xf32>
    %c4 = arith.constant 4 : index
    %c0_4 = arith.constant 0 : index
    %12 = vector.load %arg7[%c4, %c0_4] : memref<12x64xf32, #tpu.memory_space<vmem>>, vector<1x32xf32>
    %13 = vector.shape_cast %12 : vector<1x32xf32> to vector<1x32xf32>
    %14 = vector.broadcast %13 : vector<1x32xf32> to vector<16x32xf32>
    %c5 = arith.constant 5 : index
    %c0_5 = arith.constant 0 : index
    %15 = vector.load %arg7[%c5, %c0_5] : memref<12x64xf32, #tpu.memory_space<vmem>>, vector<1x32xf32>
    %16 = vector.shape_cast %15 : vector<1x32xf32> to vector<1x32xf32>
    %17 = vector.broadcast %16 : vector<1x32xf32> to vector<16x32xf32>
    %c6 = arith.constant 6 : index
    %c0_6 = arith.constant 0 : index
    %18 = vector.load %arg7[%c6, %c0_6] : memref<12x64xf32, #tpu.memory_space<vmem>>, vector<1x24xf32>
    %c7 = arith.constant 7 : index
    %c0_7 = arith.constant 0 : index
    %19 = vector.load %arg7[%c7, %c0_7] : memref<12x64xf32, #tpu.memory_space<vmem>>, vector<1x24xf32>
    %c8 = arith.constant 8 : index
    %c0_8 = arith.constant 0 : index
    %20 = vector.load %arg7[%c8, %c0_8] : memref<12x64xf32, #tpu.memory_space<vmem>>, vector<1x32xf32>
    %21 = vector.shape_cast %20 : vector<1x32xf32> to vector<1x32xf32>
    %22 = vector.broadcast %21 : vector<1x32xf32> to vector<16x32xf32>
    %c9 = arith.constant 9 : index
    %c0_9 = arith.constant 0 : index
    %23 = vector.load %arg7[%c9, %c0_9] : memref<12x64xf32, #tpu.memory_space<vmem>>, vector<1x32xf32>
    %24 = vector.shape_cast %23 : vector<1x32xf32> to vector<1x32xf32>
    %25 = vector.broadcast %24 : vector<1x32xf32> to vector<16x32xf32>
    %c10 = arith.constant 10 : index
    %c0_10 = arith.constant 0 : index
    %26 = vector.load %arg7[%c10, %c0_10] : memref<12x64xf32, #tpu.memory_space<vmem>>, vector<1x64xf32>
    %27 = vector.shape_cast %26 : vector<1x64xf32> to vector<1x64xf32>
    %28 = vector.broadcast %27 : vector<1x64xf32> to vector<16x64xf32>
    %c11 = arith.constant 11 : index
    %c0_11 = arith.constant 0 : index
    %29 = vector.load %arg7[%c11, %c0_11] : memref<12x64xf32, #tpu.memory_space<vmem>>, vector<1x32xf32>
    %30 = vector.shape_cast %29 : vector<1x32xf32> to vector<1x32xf32>
    %31 = vector.broadcast %30 : vector<1x32xf32> to vector<16x32xf32>
    %c0_12 = arith.constant 0 : index
    %c0_13 = arith.constant 0 : index
    %32 = vector.load %arg2[%c0_12, %c0_13] : memref<64x8xf32, #tpu.memory_space<vmem>>, vector<64x8xf32>
    %c1_14 = arith.constant 1 : index
    %c0_15 = arith.constant 0 : index
    %c0_16 = arith.constant 0 : index
    %33 = vector.load %arg4[%c1_14, %c0_15, %c0_16] : memref<2x8x24xf32, #tpu.memory_space<vmem>>, vector<1x8x24xf32>
    %34 = vector.shape_cast %33 : vector<1x8x24xf32> to vector<8x24xf32>
    %35 = vector.extract_strided_slice %34 {offsets = [0, 8], sizes = [8, 16], strides = [1, 1]} : vector<8x24xf32> to vector<8x16xf32>
    %cst = arith.constant dense<0.000000e+00> : vector<64x16xf32>
    %36 = tpu.matmul %32, %35, %cst {dimension_numbers = #tpu.dot_dimension_numbers<[1], [0], [0], [1], [0, 0, 1, 1], [], []>} : vector<64x8xf32>, vector<8x16xf32>, vector<64x16xf32> -> vector<64x16xf32>
    %37 = vector.extract_strided_slice %19 {offsets = [0, 8], sizes = [1, 16], strides = [1, 1]} : vector<1x24xf32> to vector<1x16xf32>
    %38 = vector.broadcast %37 : vector<1x16xf32> to vector<64x16xf32>
    %39 = arith.addf %36, %38 : vector<64x16xf32>
    %c0_17 = arith.constant 0 : index
    %c0_18 = arith.constant 0 : index
    %40 = vector.load %arg11[%c0_17, %c0_18] : memref<64x16xf32, #tpu.memory_space<vmem>>, vector<64x16xf32>
    tpu.vector_store %arg11[%c0_17, %c0_18], %39 {strides = array<i32>} : memref<64x16xf32, #tpu.memory_space<vmem>>, vector<64x16xf32>,
    %c0_19 = arith.constant 0 : index
    %c0_20 = arith.constant 0 : index
    %41 = vector.load %arg1[%c0_19, %c0_20] : memref<16x32xf32, #tpu.memory_space<vmem>>, vector<16x32xf32>
    %cst_21 = arith.constant dense<0.000000e+00> : vector<16xf32>
    %42 = vector.multi_reduction <add>, %41, %cst_21 [1] : vector<16x32xf32> to vector<16xf32>
    %43 = vector.shape_cast %42 : vector<16xf32> to vector<16x1xf32>
    %cst_22 = arith.constant 3.200000e+01 : f32
    %44 = vector.broadcast %cst_22 : f32 to vector<16x1xf32>
    %45 = arith.divf %43, %44 : vector<16x1xf32>
    %46 = vector.broadcast %45 : vector<16x1xf32> to vector<16x32xf32>
    %47 = arith.subf %41, %46 : vector<16x32xf32>
    %48 = arith.mulf %47, %47 : vector<16x32xf32>
    %cst_23 = arith.constant dense<0.000000e+00> : vector<16xf32>
    %49 = vector.multi_reduction <add>, %48, %cst_23 [1] : vector<16x32xf32> to vector<16xf32>
    %50 = vector.shape_cast %49 : vector<16xf32> to vector<16x1xf32>
    %cst_24 = arith.constant 3.200000e+01 : f32
    %51 = vector.broadcast %cst_24 : f32 to vector<16x1xf32>
    %52 = arith.divf %50, %51 : vector<16x1xf32>
    %cst_25 = arith.constant 9.99999996E-13 : f32
    %53 = vector.broadcast %cst_25 : f32 to vector<16x1xf32>
    %54 = arith.addf %52, %53 : vector<16x1xf32>
    %55 = math.rsqrt %54 : vector<16x1xf32>
    %56 = vector.broadcast %55 : vector<16x1xf32> to vector<16x32xf32>
    %57 = arith.mulf %47, %56 : vector<16x32xf32>
    %58 = arith.mulf %57, %2 : vector<16x32xf32>
    %59 = arith.addf %58, %5 : vector<16x32xf32>
    %60 = vector.extract_strided_slice %59 {offsets = [0, 0], sizes = [16, 8], strides = [1, 1]} : vector<16x32xf32> to vector<16x8xf32>
    %c0_26 = arith.constant 0 : index
    %c0_27 = arith.constant 0 : index
    %61 = vector.load %arg9[%c0_26, %c0_27] : memref<64x8xf32, #tpu.memory_space<vmem>>, vector<16x8xf32>
    tpu.vector_store %arg9[%c0_26, %c0_27], %60 {strides = array<i32>} : memref<64x8xf32, #tpu.memory_space<vmem>>, vector<16x8xf32>,
    %62 = vector.extract_strided_slice %59 {offsets = [0, 8], sizes = [16, 8], strides = [1, 1]} : vector<16x32xf32> to vector<16x8xf32>
    %c16 = arith.constant 16 : index
    %c0_28 = arith.constant 0 : index
    %63 = vector.load %arg9[%c16, %c0_28] : memref<64x8xf32, #tpu.memory_space<vmem>>, vector<16x8xf32>
    tpu.vector_store %arg9[%c16, %c0_28], %62 {strides = array<i32>} : memref<64x8xf32, #tpu.memory_space<vmem>>, vector<16x8xf32>,
    %64 = vector.extract_strided_slice %59 {offsets = [0, 16], sizes = [16, 8], strides = [1, 1]} : vector<16x32xf32> to vector<16x8xf32>
    %c32 = arith.constant 32 : index
    %c0_29 = arith.constant 0 : index
    %65 = vector.load %arg9[%c32, %c0_29] : memref<64x8xf32, #tpu.memory_space<vmem>>, vector<16x8xf32>
    tpu.vector_store %arg9[%c32, %c0_29], %64 {strides = array<i32>} : memref<64x8xf32, #tpu.memory_space<vmem>>, vector<16x8xf32>,
    %66 = vector.extract_strided_slice %59 {offsets = [0, 24], sizes = [16, 8], strides = [1, 1]} : vector<16x32xf32> to vector<16x8xf32>
    %c48 = arith.constant 48 : index
    %c0_30 = arith.constant 0 : index
    %67 = vector.load %arg9[%c48, %c0_30] : memref<64x8xf32, #tpu.memory_space<vmem>>, vector<16x8xf32>
    tpu.vector_store %arg9[%c48, %c0_30], %66 {strides = array<i32>} : memref<64x8xf32, #tpu.memory_space<vmem>>, vector<16x8xf32>,
    %c0_31 = arith.constant 0 : index
    %c0_32 = arith.constant 0 : index
    %68 = vector.load %arg9[%c0_31, %c0_32] : memref<64x8xf32, #tpu.memory_space<vmem>>, vector<64x8xf32>
    %c0_33 = arith.constant 0 : index
    %c0_34 = arith.constant 0 : index
    %c0_35 = arith.constant 0 : index
    %69 = vector.load %arg4[%c0_33, %c0_34, %c0_35] : memref<2x8x24xf32, #tpu.memory_space<vmem>>, vector<1x8x24xf32>
    %70 = vector.shape_cast %69 : vector<1x8x24xf32> to vector<8x24xf32>
    %cst_36 = arith.constant dense<0.000000e+00> : vector<64x24xf32>
    %71 = tpu.matmul %68, %70, %cst_36 {dimension_numbers = #tpu.dot_dimension_numbers<[1], [0], [0], [1], [0, 0, 1, 1], [], []>} : vector<64x8xf32>, vector<8x24xf32>, vector<64x24xf32> -> vector<64x24xf32>
    %72 = vector.broadcast %18 : vector<1x24xf32> to vector<64x24xf32>
    %73 = arith.addf %71, %72 : vector<64x24xf32>
    %74 = vector.extract_strided_slice %73 {offsets = [0, 0], sizes = [64, 8], strides = [1, 1]} : vector<64x24xf32> to vector<64x8xf32>
    %75 = vector.extract_strided_slice %73 {offsets = [0, 8], sizes = [64, 8], strides = [1, 1]} : vector<64x24xf32> to vector<64x8xf32>
    %76 = vector.extract_strided_slice %73 {offsets = [0, 16], sizes = [64, 8], strides = [1, 1]} : vector<64x24xf32> to vector<64x8xf32>
    %c0_37 = arith.constant 0 : index
    %c0_38 = arith.constant 0 : index
    %77 = vector.load %arg3[%c0_37, %c0_38] : memref<64x128xf32, #tpu.memory_space<vmem>>, vector<64x64xf32>
    %cst_39 = arith.constant dense<0.000000e+00> : vector<64x64xf32>
    %78 = tpu.matmul %74, %75, %cst_39 {dimension_numbers = #tpu.dot_dimension_numbers<[1], [1], [0], [0], [0, 0, 1, 0], [], []>} : vector<64x8xf32>, vector<64x8xf32>, vector<64x64xf32> -> vector<64x64xf32>
    %79 = arith.addf %78, %77 : vector<64x64xf32>
    %cst_40 = arith.constant dense<0xFF800000> : vector<64xf32>
    %80 = vector.multi_reduction <maximumf>, %79, %cst_40 [1] : vector<64x64xf32> to vector<64xf32>
    %81 = vector.shape_cast %80 : vector<64xf32> to vector<64x1xf32>
    %82 = vector.broadcast %81 : vector<64x1xf32> to vector<64x64xf32>
    %83 = arith.subf %79, %82 : vector<64x64xf32>
    %84 = math.exp %83 : vector<64x64xf32>
    %cst_41 = arith.constant dense<0.000000e+00> : vector<64xf32>
    %85 = vector.multi_reduction <add>, %84, %cst_41 [1] : vector<64x64xf32> to vector<64xf32>
    %86 = vector.shape_cast %85 : vector<64xf32> to vector<64x1xf32>
    %87 = tpu.reciprocal %86 {approx = true} : vector<64x1xf32> -> vector<64x1xf32>
    %88 = vector.broadcast %87 : vector<64x1xf32> to vector<64x64xf32>
    %89 = arith.mulf %84, %88 : vector<64x64xf32>
    %cst_42 = arith.constant dense<0.000000e+00> : vector<64x8xf32>
    %90 = tpu.matmul %89, %76, %cst_42 {dimension_numbers = #tpu.dot_dimension_numbers<[1], [0], [0], [1], [0, 0, 1, 1], [], []>} : vector<64x64xf32>, vector<64x8xf32>, vector<64x8xf32> -> vector<64x8xf32>
    %91 = vector.extract_strided_slice %90 {offsets = [0, 0], sizes = [16, 8], strides = [1, 1]} : vector<64x8xf32> to vector<16x8xf32>
    %c0_43 = arith.constant 0 : index
    %c0_44 = arith.constant 0 : index
    %92 = vector.load %arg10[%c0_43, %c0_44] : memref<16x32xf32, #tpu.memory_space<vmem>>, vector<16x8xf32>
    tpu.vector_store %arg10[%c0_43, %c0_44], %91 {strides = array<i32>} : memref<16x32xf32, #tpu.memory_space<vmem>>, vector<16x8xf32>,
    %93 = vector.extract_strided_slice %90 {offsets = [16, 0], sizes = [16, 8], strides = [1, 1]} : vector<64x8xf32> to vector<16x8xf32>
    %c0_45 = arith.constant 0 : index
    %c8_46 = arith.constant 8 : index
    %94 = vector.load %arg10[%c0_45, %c8_46] : memref<16x32xf32, #tpu.memory_space<vmem>>, vector<16x8xf32>
    tpu.vector_store %arg10[%c0_45, %c8_46], %93 {strides = array<i32>} : memref<16x32xf32, #tpu.memory_space<vmem>>, vector<16x8xf32>,
    %95 = vector.extract_strided_slice %90 {offsets = [32, 0], sizes = [16, 8], strides = [1, 1]} : vector<64x8xf32> to vector<16x8xf32>
    %c0_47 = arith.constant 0 : index
    %c16_48 = arith.constant 16 : index
    %96 = vector.load %arg10[%c0_47, %c16_48] : memref<16x32xf32, #tpu.memory_space<vmem>>, vector<16x8xf32>
    tpu.vector_store %arg10[%c0_47, %c16_48], %95 {strides = array<i32>} : memref<16x32xf32, #tpu.memory_space<vmem>>, vector<16x8xf32>,
    %97 = vector.extract_strided_slice %90 {offsets = [48, 0], sizes = [16, 8], strides = [1, 1]} : vector<64x8xf32> to vector<16x8xf32>
    %c0_49 = arith.constant 0 : index
    %c24 = arith.constant 24 : index
    %98 = vector.load %arg10[%c0_49, %c24] : memref<16x32xf32, #tpu.memory_space<vmem>>, vector<16x8xf32>
    tpu.vector_store %arg10[%c0_49, %c24], %97 {strides = array<i32>} : memref<16x32xf32, #tpu.memory_space<vmem>>, vector<16x8xf32>,
    %c0_50 = arith.constant 0 : index
    %c0_51 = arith.constant 0 : index
    %99 = vector.load %arg10[%c0_50, %c0_51] : memref<16x32xf32, #tpu.memory_space<vmem>>, vector<16x32xf32>
    %c0_52 = arith.constant 0 : index
    %c0_53 = arith.constant 0 : index
    %c0_54 = arith.constant 0 : index
    %100 = vector.load %arg5[%c0_52, %c0_53, %c0_54] : memref<2x32x32xf32, #tpu.memory_space<vmem>>, vector<1x32x32xf32>
    %101 = vector.shape_cast %100 : vector<1x32x32xf32> to vector<32x32xf32>
    %cst_55 = arith.constant dense<0.000000e+00> : vector<16x32xf32>
    %102 = tpu.matmul %99, %101, %cst_55 {dimension_numbers = #tpu.dot_dimension_numbers<[1], [0], [0], [1], [0, 0, 1, 1], [], []>} : vector<16x32xf32>, vector<32x32xf32>, vector<16x32xf32> -> vector<16x32xf32>
    %103 = arith.addf %41, %102 : vector<16x32xf32>
    %104 = arith.addf %103, %22 : vector<16x32xf32>
    %cst_56 = arith.constant dense<0.000000e+00> : vector<16xf32>
    %105 = vector.multi_reduction <add>, %104, %cst_56 [1] : vector<16x32xf32> to vector<16xf32>
    %106 = vector.shape_cast %105 : vector<16xf32> to vector<16x1xf32>
    %cst_57 = arith.constant 3.200000e+01 : f32
    %107 = vector.broadcast %cst_57 : f32 to vector<16x1xf32>
    %108 = arith.divf %106, %107 : vector<16x1xf32>
    %109 = vector.broadcast %108 : vector<16x1xf32> to vector<16x32xf32>
    %110 = arith.subf %104, %109 : vector<16x32xf32>
    %111 = arith.mulf %110, %110 : vector<16x32xf32>
    %cst_58 = arith.constant dense<0.000000e+00> : vector<16xf32>
    %112 = vector.multi_reduction <add>, %111, %cst_58 [1] : vector<16x32xf32> to vector<16xf32>
    %113 = vector.shape_cast %112 : vector<16xf32> to vector<16x1xf32>
    %cst_59 = arith.constant 3.200000e+01 : f32
    %114 = vector.broadcast %cst_59 : f32 to vector<16x1xf32>
    %115 = arith.divf %113, %114 : vector<16x1xf32>
    %cst_60 = arith.constant 9.99999996E-13 : f32
    %116 = vector.broadcast %cst_60 : f32 to vector<16x1xf32>
    %117 = arith.addf %115, %116 : vector<16x1xf32>
    %118 = math.rsqrt %117 : vector<16x1xf32>
    %119 = vector.broadcast %118 : vector<16x1xf32> to vector<16x32xf32>
    %120 = arith.mulf %110, %119 : vector<16x32xf32>
    %121 = arith.mulf %120, %8 : vector<16x32xf32>
    %122 = arith.addf %121, %11 : vector<16x32xf32>
    %123 = vector.extract_strided_slice %122 {offsets = [0, 0], sizes = [16, 8], strides = [1, 1]} : vector<16x32xf32> to vector<16x8xf32>
    %c0_61 = arith.constant 0 : index
    %c0_62 = arith.constant 0 : index
    %124 = vector.load %arg9[%c0_61, %c0_62] : memref<64x8xf32, #tpu.memory_space<vmem>>, vector<16x8xf32>
    tpu.vector_store %arg9[%c0_61, %c0_62], %123 {strides = array<i32>} : memref<64x8xf32, #tpu.memory_space<vmem>>, vector<16x8xf32>,
    %125 = vector.extract_strided_slice %122 {offsets = [0, 8], sizes = [16, 8], strides = [1, 1]} : vector<16x32xf32> to vector<16x8xf32>
    %c16_63 = arith.constant 16 : index
    %c0_64 = arith.constant 0 : index
    %126 = vector.load %arg9[%c16_63, %c0_64] : memref<64x8xf32, #tpu.memory_space<vmem>>, vector<16x8xf32>
    tpu.vector_store %arg9[%c16_63, %c0_64], %125 {strides = array<i32>} : memref<64x8xf32, #tpu.memory_space<vmem>>, vector<16x8xf32>,
    %127 = vector.extract_strided_slice %122 {offsets = [0, 16], sizes = [16, 8], strides = [1, 1]} : vector<16x32xf32> to vector<16x8xf32>
    %c32_65 = arith.constant 32 : index
    %c0_66 = arith.constant 0 : index
    %128 = vector.load %arg9[%c32_65, %c0_66] : memref<64x8xf32, #tpu.memory_space<vmem>>, vector<16x8xf32>
    tpu.vector_store %arg9[%c32_65, %c0_66], %127 {strides = array<i32>} : memref<64x8xf32, #tpu.memory_space<vmem>>, vector<16x8xf32>,
    %129 = vector.extract_strided_slice %122 {offsets = [0, 24], sizes = [16, 8], strides = [1, 1]} : vector<16x32xf32> to vector<16x8xf32>
    %c48_67 = arith.constant 48 : index
    %c0_68 = arith.constant 0 : index
    %130 = vector.load %arg9[%c48_67, %c0_68] : memref<64x8xf32, #tpu.memory_space<vmem>>, vector<16x8xf32>
    tpu.vector_store %arg9[%c48_67, %c0_68], %129 {strides = array<i32>} : memref<64x8xf32, #tpu.memory_space<vmem>>, vector<16x8xf32>,
    %c0_69 = arith.constant 0 : index
    %c0_70 = arith.constant 0 : index
    %131 = vector.load %arg9[%c0_69, %c0_70] : memref<64x8xf32, #tpu.memory_space<vmem>>, vector<64x8xf32>
    %c1_71 = arith.constant 1 : index
    %c0_72 = arith.constant 0 : index
    %c0_73 = arith.constant 0 : index
    %132 = vector.load %arg4[%c1_71, %c0_72, %c0_73] : memref<2x8x24xf32, #tpu.memory_space<vmem>>, vector<1x8x24xf32>
    %133 = vector.shape_cast %132 : vector<1x8x24xf32> to vector<8x24xf32>
    %134 = vector.extract_strided_slice %133 {offsets = [0, 0], sizes = [8, 8], strides = [1, 1]} : vector<8x24xf32> to vector<8x8xf32>
    %cst_74 = arith.constant dense<0.000000e+00> : vector<64x8xf32>
    %135 = tpu.matmul %131, %134, %cst_74 {dimension_numbers = #tpu.dot_dimension_numbers<[1], [0], [0], [1], [0, 0, 1, 1], [], []>} : vector<64x8xf32>, vector<8x8xf32>, vector<64x8xf32> -> vector<64x8xf32>
    %136 = vector.extract_strided_slice %19 {offsets = [0, 0], sizes = [1, 8], strides = [1, 1]} : vector<1x24xf32> to vector<1x8xf32>
    %137 = vector.broadcast %136 : vector<1x8xf32> to vector<64x8xf32>
    %138 = arith.addf %135, %137 : vector<64x8xf32>
    %c0_75 = arith.constant 0 : index
    %c0_76 = arith.constant 0 : index
    %139 = vector.load %arg11[%c0_75, %c0_76] : memref<64x16xf32, #tpu.memory_space<vmem>>, vector<64x8xf32>
    %c0_77 = arith.constant 0 : index
    %c8_78 = arith.constant 8 : index
    %140 = vector.load %arg11[%c0_77, %c8_78] : memref<64x16xf32, #tpu.memory_space<vmem>>, vector<64x8xf32>
    %c0_79 = arith.constant 0 : index
    %c64 = arith.constant 64 : index
    %141 = vector.load %arg3[%c0_79, %c64] : memref<64x128xf32, #tpu.memory_space<vmem>>, vector<64x64xf32>
    %cst_80 = arith.constant dense<0.000000e+00> : vector<64x64xf32>
    %142 = tpu.matmul %138, %139, %cst_80 {dimension_numbers = #tpu.dot_dimension_numbers<[1], [1], [0], [0], [0, 0, 1, 0], [], []>} : vector<64x8xf32>, vector<64x8xf32>, vector<64x64xf32> -> vector<64x64xf32>
    %143 = arith.addf %142, %141 : vector<64x64xf32>
    %cst_81 = arith.constant dense<0xFF800000> : vector<64xf32>
    %144 = vector.multi_reduction <maximumf>, %143, %cst_81 [1] : vector<64x64xf32> to vector<64xf32>
    %145 = vector.shape_cast %144 : vector<64xf32> to vector<64x1xf32>
    %146 = vector.broadcast %145 : vector<64x1xf32> to vector<64x64xf32>
    %147 = arith.subf %143, %146 : vector<64x64xf32>
    %148 = math.exp %147 : vector<64x64xf32>
    %cst_82 = arith.constant dense<0.000000e+00> : vector<64xf32>
    %149 = vector.multi_reduction <add>, %148, %cst_82 [1] : vector<64x64xf32> to vector<64xf32>
    %150 = vector.shape_cast %149 : vector<64xf32> to vector<64x1xf32>
    %151 = tpu.reciprocal %150 {approx = true} : vector<64x1xf32> -> vector<64x1xf32>
    %152 = vector.broadcast %151 : vector<64x1xf32> to vector<64x64xf32>
    %153 = arith.mulf %148, %152 : vector<64x64xf32>
    %cst_83 = arith.constant dense<0.000000e+00> : vector<64x8xf32>
    %154 = tpu.matmul %153, %140, %cst_83 {dimension_numbers = #tpu.dot_dimension_numbers<[1], [0], [0], [1], [0, 0, 1, 1], [], []>} : vector<64x64xf32>, vector<64x8xf32>, vector<64x8xf32> -> vector<64x8xf32>
    %155 = vector.extract_strided_slice %154 {offsets = [0, 0], sizes = [16, 8], strides = [1, 1]} : vector<64x8xf32> to vector<16x8xf32>
    %c0_84 = arith.constant 0 : index
    %c0_85 = arith.constant 0 : index
    %156 = vector.load %arg10[%c0_84, %c0_85] : memref<16x32xf32, #tpu.memory_space<vmem>>, vector<16x8xf32>
    tpu.vector_store %arg10[%c0_84, %c0_85], %155 {strides = array<i32>} : memref<16x32xf32, #tpu.memory_space<vmem>>, vector<16x8xf32>,
    %157 = vector.extract_strided_slice %154 {offsets = [16, 0], sizes = [16, 8], strides = [1, 1]} : vector<64x8xf32> to vector<16x8xf32>
    %c0_86 = arith.constant 0 : index
    %c8_87 = arith.constant 8 : index
    %158 = vector.load %arg10[%c0_86, %c8_87] : memref<16x32xf32, #tpu.memory_space<vmem>>, vector<16x8xf32>
    tpu.vector_store %arg10[%c0_86, %c8_87], %157 {strides = array<i32>} : memref<16x32xf32, #tpu.memory_space<vmem>>, vector<16x8xf32>,
    %159 = vector.extract_strided_slice %154 {offsets = [32, 0], sizes = [16, 8], strides = [1, 1]} : vector<64x8xf32> to vector<16x8xf32>
    %c0_88 = arith.constant 0 : index
    %c16_89 = arith.constant 16 : index
    %160 = vector.load %arg10[%c0_88, %c16_89] : memref<16x32xf32, #tpu.memory_space<vmem>>, vector<16x8xf32>
    tpu.vector_store %arg10[%c0_88, %c16_89], %159 {strides = array<i32>} : memref<16x32xf32, #tpu.memory_space<vmem>>, vector<16x8xf32>,
    %161 = vector.extract_strided_slice %154 {offsets = [48, 0], sizes = [16, 8], strides = [1, 1]} : vector<64x8xf32> to vector<16x8xf32>
    %c0_90 = arith.constant 0 : index
    %c24_91 = arith.constant 24 : index
    %162 = vector.load %arg10[%c0_90, %c24_91] : memref<16x32xf32, #tpu.memory_space<vmem>>, vector<16x8xf32>
    tpu.vector_store %arg10[%c0_90, %c24_91], %161 {strides = array<i32>} : memref<16x32xf32, #tpu.memory_space<vmem>>, vector<16x8xf32>,
    %c0_92 = arith.constant 0 : index
    %c0_93 = arith.constant 0 : index
    %163 = vector.load %arg10[%c0_92, %c0_93] : memref<16x32xf32, #tpu.memory_space<vmem>>, vector<16x32xf32>
    %c1_94 = arith.constant 1 : index
    %c0_95 = arith.constant 0 : index
    %c0_96 = arith.constant 0 : index
    %164 = vector.load %arg5[%c1_94, %c0_95, %c0_96] : memref<2x32x32xf32, #tpu.memory_space<vmem>>, vector<1x32x32xf32>
    %165 = vector.shape_cast %164 : vector<1x32x32xf32> to vector<32x32xf32>
    %cst_97 = arith.constant dense<0.000000e+00> : vector<16x32xf32>
    %166 = tpu.matmul %163, %165, %cst_97 {dimension_numbers = #tpu.dot_dimension_numbers<[1], [0], [0], [1], [0, 0, 1, 1], [], []>} : vector<16x32xf32>, vector<32x32xf32>, vector<16x32xf32> -> vector<16x32xf32>
    %167 = arith.addf %104, %166 : vector<16x32xf32>
    %168 = arith.addf %167, %25 : vector<16x32xf32>
    %cst_98 = arith.constant dense<0.000000e+00> : vector<16xf32>
    %169 = vector.multi_reduction <add>, %168, %cst_98 [1] : vector<16x32xf32> to vector<16xf32>
    %170 = vector.shape_cast %169 : vector<16xf32> to vector<16x1xf32>
    %cst_99 = arith.constant 3.200000e+01 : f32
    %171 = vector.broadcast %cst_99 : f32 to vector<16x1xf32>
    %172 = arith.divf %170, %171 : vector<16x1xf32>
    %173 = vector.broadcast %172 : vector<16x1xf32> to vector<16x32xf32>
    %174 = arith.subf %168, %173 : vector<16x32xf32>
    %175 = arith.mulf %174, %174 : vector<16x32xf32>
    %cst_100 = arith.constant dense<0.000000e+00> : vector<16xf32>
    %176 = vector.multi_reduction <add>, %175, %cst_100 [1] : vector<16x32xf32> to vector<16xf32>
    %177 = vector.shape_cast %176 : vector<16xf32> to vector<16x1xf32>
    %cst_101 = arith.constant 3.200000e+01 : f32
    %178 = vector.broadcast %cst_101 : f32 to vector<16x1xf32>
    %179 = arith.divf %177, %178 : vector<16x1xf32>
    %cst_102 = arith.constant 9.99999996E-13 : f32
    %180 = vector.broadcast %cst_102 : f32 to vector<16x1xf32>
    %181 = arith.addf %179, %180 : vector<16x1xf32>
    %182 = math.rsqrt %181 : vector<16x1xf32>
    %183 = vector.broadcast %182 : vector<16x1xf32> to vector<16x32xf32>
    %184 = arith.mulf %174, %183 : vector<16x32xf32>
    %185 = arith.mulf %184, %14 : vector<16x32xf32>
    %186 = arith.addf %185, %17 : vector<16x32xf32>
    %c0_103 = arith.constant 0 : index
    %c0_104 = arith.constant 0 : index
    %c0_105 = arith.constant 0 : index
    %187 = vector.load %arg6[%c0_103, %c0_104, %c0_105] : memref<2x32x64xf32, #tpu.memory_space<vmem>>, vector<1x32x64xf32>
    %188 = vector.shape_cast %187 : vector<1x32x64xf32> to vector<32x64xf32>
    %cst_106 = arith.constant dense<0.000000e+00> : vector<16x64xf32>
    %189 = tpu.matmul %186, %188, %cst_106 {dimension_numbers = #tpu.dot_dimension_numbers<[1], [0], [0], [1], [0, 0, 1, 1], [], []>} : vector<16x32xf32>, vector<32x64xf32>, vector<16x64xf32> -> vector<16x64xf32>
    %190 = arith.addf %189, %28 : vector<16x64xf32>
    %cst_107 = arith.constant 5.000000e-01 : f32
    %191 = vector.broadcast %cst_107 : f32 to vector<16x64xf32>
    %192 = arith.mulf %191, %190 : vector<16x64xf32>
    %193 = arith.mulf %190, %190 : vector<16x64xf32>
    %194 = arith.mulf %193, %190 : vector<16x64xf32>
    %cst_108 = arith.constant 4.471500e-02 : f32
    %195 = vector.broadcast %cst_108 : f32 to vector<16x64xf32>
    %196 = arith.mulf %195, %194 : vector<16x64xf32>
    %197 = arith.addf %190, %196 : vector<16x64xf32>
    %cst_109 = arith.constant 0.797884583 : f32
    %198 = vector.broadcast %cst_109 : f32 to vector<16x64xf32>
    %199 = arith.mulf %198, %197 : vector<16x64xf32>
    %200 = math.tanh %199 : vector<16x64xf32>
    %cst_110 = arith.constant 1.000000e+00 : f32
    %201 = vector.broadcast %cst_110 : f32 to vector<16x64xf32>
    %202 = arith.addf %201, %200 : vector<16x64xf32>
    %203 = arith.mulf %192, %202 : vector<16x64xf32>
    %c1_111 = arith.constant 1 : index
    %c0_112 = arith.constant 0 : index
    %c0_113 = arith.constant 0 : index
    %204 = vector.load %arg6[%c1_111, %c0_112, %c0_113] : memref<2x32x64xf32, #tpu.memory_space<vmem>>, vector<1x32x64xf32>
    %205 = vector.shape_cast %204 : vector<1x32x64xf32> to vector<32x64xf32>
    %cst_114 = arith.constant dense<0.000000e+00> : vector<16x32xf32>
    %206 = tpu.matmul %203, %205, %cst_114 {dimension_numbers = #tpu.dot_dimension_numbers<[1], [1], [0], [0], [0, 0, 1, 0], [], []>} : vector<16x64xf32>, vector<32x64xf32>, vector<16x32xf32> -> vector<16x32xf32>
    %207 = arith.addf %168, %206 : vector<16x32xf32>
    %208 = arith.addf %207, %31 : vector<16x32xf32>
    %cst_115 = arith.constant dense<0.000000e+00> : vector<16xf32>
    %209 = vector.multi_reduction <add>, %208, %cst_115 [1] : vector<16x32xf32> to vector<16xf32>
    %210 = vector.shape_cast %209 : vector<16xf32> to vector<16x1xf32>
    %cst_116 = arith.constant 3.200000e+01 : f32
    %211 = vector.broadcast %cst_116 : f32 to vector<16x1xf32>
    %212 = arith.divf %210, %211 : vector<16x1xf32>
    %213 = vector.broadcast %212 : vector<16x1xf32> to vector<16x32xf32>
    %214 = arith.subf %208, %213 : vector<16x32xf32>
    %215 = arith.mulf %214, %214 : vector<16x32xf32>
    %cst_117 = arith.constant dense<0.000000e+00> : vector<16xf32>
    %216 = vector.multi_reduction <add>, %215, %cst_117 [1] : vector<16x32xf32> to vector<16xf32>
    %217 = vector.shape_cast %216 : vector<16xf32> to vector<16x1xf32>
    %cst_118 = arith.constant 3.200000e+01 : f32
    %218 = vector.broadcast %cst_118 : f32 to vector<16x1xf32>
    %219 = arith.divf %217, %218 : vector<16x1xf32>
    %cst_119 = arith.constant 9.99999996E-13 : f32
    %220 = vector.broadcast %cst_119 : f32 to vector<16x1xf32>
    %221 = arith.addf %219, %220 : vector<16x1xf32>
    %222 = math.rsqrt %221 : vector<16x1xf32>
    %223 = vector.broadcast %222 : vector<16x1xf32> to vector<16x32xf32>
    %224 = arith.mulf %214, %223 : vector<16x32xf32>
    %225 = arith.mulf %224, %2 : vector<16x32xf32>
    %226 = arith.addf %225, %5 : vector<16x32xf32>
    %227 = vector.extract_strided_slice %226 {offsets = [0, 0], sizes = [16, 8], strides = [1, 1]} : vector<16x32xf32> to vector<16x8xf32>
    %c0_120 = arith.constant 0 : index
    %c0_121 = arith.constant 0 : index
    %228 = vector.load %arg9[%c0_120, %c0_121] : memref<64x8xf32, #tpu.memory_space<vmem>>, vector<16x8xf32>
    tpu.vector_store %arg9[%c0_120, %c0_121], %227 {strides = array<i32>} : memref<64x8xf32, #tpu.memory_space<vmem>>, vector<16x8xf32>,
    %229 = vector.extract_strided_slice %226 {offsets = [0, 8], sizes = [16, 8], strides = [1, 1]} : vector<16x32xf32> to vector<16x8xf32>
    %c16_122 = arith.constant 16 : index
    %c0_123 = arith.constant 0 : index
    %230 = vector.load %arg9[%c16_122, %c0_123] : memref<64x8xf32, #tpu.memory_space<vmem>>, vector<16x8xf32>
    tpu.vector_store %arg9[%c16_122, %c0_123], %229 {strides = array<i32>} : memref<64x8xf32, #tpu.memory_space<vmem>>, vector<16x8xf32>,
    %231 = vector.extract_strided_slice %226 {offsets = [0, 16], sizes = [16, 8], strides = [1, 1]} : vector<16x32xf32> to vector<16x8xf32>
    %c32_124 = arith.constant 32 : index
    %c0_125 = arith.constant 0 : index
    %232 = vector.load %arg9[%c32_124, %c0_125] : memref<64x8xf32, #tpu.memory_space<vmem>>, vector<16x8xf32>
    tpu.vector_store %arg9[%c32_124, %c0_125], %231 {strides = array<i32>} : memref<64x8xf32, #tpu.memory_space<vmem>>, vector<16x8xf32>,
    %233 = vector.extract_strided_slice %226 {offsets = [0, 24], sizes = [16, 8], strides = [1, 1]} : vector<16x32xf32> to vector<16x8xf32>
    %c48_126 = arith.constant 48 : index
    %c0_127 = arith.constant 0 : index
    %234 = vector.load %arg9[%c48_126, %c0_127] : memref<64x8xf32, #tpu.memory_space<vmem>>, vector<16x8xf32>
    tpu.vector_store %arg9[%c48_126, %c0_127], %233 {strides = array<i32>} : memref<64x8xf32, #tpu.memory_space<vmem>>, vector<16x8xf32>,
    %c0_128 = arith.constant 0 : index
    %c0_129 = arith.constant 0 : index
    %235 = vector.load %arg9[%c0_128, %c0_129] : memref<64x8xf32, #tpu.memory_space<vmem>>, vector<64x8xf32>
    %c0_130 = arith.constant 0 : index
    %c0_131 = arith.constant 0 : index
    %c0_132 = arith.constant 0 : index
    %236 = vector.load %arg4[%c0_130, %c0_131, %c0_132] : memref<2x8x24xf32, #tpu.memory_space<vmem>>, vector<1x8x24xf32>
    %237 = vector.shape_cast %236 : vector<1x8x24xf32> to vector<8x24xf32>
    %cst_133 = arith.constant dense<0.000000e+00> : vector<64x24xf32>
    %238 = tpu.matmul %235, %237, %cst_133 {dimension_numbers = #tpu.dot_dimension_numbers<[1], [0], [0], [1], [0, 0, 1, 1], [], []>} : vector<64x8xf32>, vector<8x24xf32>, vector<64x24xf32> -> vector<64x24xf32>
    %239 = vector.broadcast %18 : vector<1x24xf32> to vector<64x24xf32>
    %240 = arith.addf %238, %239 : vector<64x24xf32>
    %241 = vector.extract_strided_slice %240 {offsets = [0, 0], sizes = [64, 8], strides = [1, 1]} : vector<64x24xf32> to vector<64x8xf32>
    %242 = vector.extract_strided_slice %240 {offsets = [0, 8], sizes = [64, 8], strides = [1, 1]} : vector<64x24xf32> to vector<64x8xf32>
    %243 = vector.extract_strided_slice %240 {offsets = [0, 16], sizes = [64, 8], strides = [1, 1]} : vector<64x24xf32> to vector<64x8xf32>
    %c0_134 = arith.constant 0 : index
    %c0_135 = arith.constant 0 : index
    %244 = vector.load %arg3[%c0_134, %c0_135] : memref<64x128xf32, #tpu.memory_space<vmem>>, vector<64x64xf32>
    %cst_136 = arith.constant dense<0.000000e+00> : vector<64x64xf32>
    %245 = tpu.matmul %241, %242, %cst_136 {dimension_numbers = #tpu.dot_dimension_numbers<[1], [1], [0], [0], [0, 0, 1, 0], [], []>} : vector<64x8xf32>, vector<64x8xf32>, vector<64x64xf32> -> vector<64x64xf32>
    %246 = arith.addf %245, %244 : vector<64x64xf32>
    %cst_137 = arith.constant dense<0xFF800000> : vector<64xf32>
    %247 = vector.multi_reduction <maximumf>, %246, %cst_137 [1] : vector<64x64xf32> to vector<64xf32>
    %248 = vector.shape_cast %247 : vector<64xf32> to vector<64x1xf32>
    %249 = vector.broadcast %248 : vector<64x1xf32> to vector<64x64xf32>
    %250 = arith.subf %246, %249 : vector<64x64xf32>
    %251 = math.exp %250 : vector<64x64xf32>
    %cst_138 = arith.constant dense<0.000000e+00> : vector<64xf32>
    %252 = vector.multi_reduction <add>, %251, %cst_138 [1] : vector<64x64xf32> to vector<64xf32>
    %253 = vector.shape_cast %252 : vector<64xf32> to vector<64x1xf32>
    %254 = tpu.reciprocal %253 {approx = true} : vector<64x1xf32> -> vector<64x1xf32>
    %255 = vector.broadcast %254 : vector<64x1xf32> to vector<64x64xf32>
    %256 = arith.mulf %251, %255 : vector<64x64xf32>
    %cst_139 = arith.constant dense<0.000000e+00> : vector<64x8xf32>
    %257 = tpu.matmul %256, %243, %cst_139 {dimension_numbers = #tpu.dot_dimension_numbers<[1], [0], [0], [1], [0, 0, 1, 1], [], []>} : vector<64x64xf32>, vector<64x8xf32>, vector<64x8xf32> -> vector<64x8xf32>
    %258 = vector.extract_strided_slice %257 {offsets = [0, 0], sizes = [16, 8], strides = [1, 1]} : vector<64x8xf32> to vector<16x8xf32>
    %c0_140 = arith.constant 0 : index
    %c0_141 = arith.constant 0 : index
    %259 = vector.load %arg10[%c0_140, %c0_141] : memref<16x32xf32, #tpu.memory_space<vmem>>, vector<16x8xf32>
    tpu.vector_store %arg10[%c0_140, %c0_141], %258 {strides = array<i32>} : memref<16x32xf32, #tpu.memory_space<vmem>>, vector<16x8xf32>,
    %260 = vector.extract_strided_slice %257 {offsets = [16, 0], sizes = [16, 8], strides = [1, 1]} : vector<64x8xf32> to vector<16x8xf32>
    %c0_142 = arith.constant 0 : index
    %c8_143 = arith.constant 8 : index
    %261 = vector.load %arg10[%c0_142, %c8_143] : memref<16x32xf32, #tpu.memory_space<vmem>>, vector<16x8xf32>
    tpu.vector_store %arg10[%c0_142, %c8_143], %260 {strides = array<i32>} : memref<16x32xf32, #tpu.memory_space<vmem>>, vector<16x8xf32>,
    %262 = vector.extract_strided_slice %257 {offsets = [32, 0], sizes = [16, 8], strides = [1, 1]} : vector<64x8xf32> to vector<16x8xf32>
    %c0_144 = arith.constant 0 : index
    %c16_145 = arith.constant 16 : index
    %263 = vector.load %arg10[%c0_144, %c16_145] : memref<16x32xf32, #tpu.memory_space<vmem>>, vector<16x8xf32>
    tpu.vector_store %arg10[%c0_144, %c16_145], %262 {strides = array<i32>} : memref<16x32xf32, #tpu.memory_space<vmem>>, vector<16x8xf32>,
    %264 = vector.extract_strided_slice %257 {offsets = [48, 0], sizes = [16, 8], strides = [1, 1]} : vector<64x8xf32> to vector<16x8xf32>
    %c0_146 = arith.constant 0 : index
    %c24_147 = arith.constant 24 : index
    %265 = vector.load %arg10[%c0_146, %c24_147] : memref<16x32xf32, #tpu.memory_space<vmem>>, vector<16x8xf32>
    tpu.vector_store %arg10[%c0_146, %c24_147], %264 {strides = array<i32>} : memref<16x32xf32, #tpu.memory_space<vmem>>, vector<16x8xf32>,
    %c0_148 = arith.constant 0 : index
    %c0_149 = arith.constant 0 : index
    %266 = vector.load %arg10[%c0_148, %c0_149] : memref<16x32xf32, #tpu.memory_space<vmem>>, vector<16x32xf32>
    %c0_150 = arith.constant 0 : index
    %c0_151 = arith.constant 0 : index
    %c0_152 = arith.constant 0 : index
    %267 = vector.load %arg5[%c0_150, %c0_151, %c0_152] : memref<2x32x32xf32, #tpu.memory_space<vmem>>, vector<1x32x32xf32>
    %268 = vector.shape_cast %267 : vector<1x32x32xf32> to vector<32x32xf32>
    %cst_153 = arith.constant dense<0.000000e+00> : vector<16x32xf32>
    %269 = tpu.matmul %266, %268, %cst_153 {dimension_numbers = #tpu.dot_dimension_numbers<[1], [0], [0], [1], [0, 0, 1, 1], [], []>} : vector<16x32xf32>, vector<32x32xf32>, vector<16x32xf32> -> vector<16x32xf32>
    %270 = arith.addf %208, %269 : vector<16x32xf32>
    %271 = arith.addf %270, %22 : vector<16x32xf32>
    %cst_154 = arith.constant dense<0.000000e+00> : vector<16xf32>
    %272 = vector.multi_reduction <add>, %271, %cst_154 [1] : vector<16x32xf32> to vector<16xf32>
    %273 = vector.shape_cast %272 : vector<16xf32> to vector<16x1xf32>
    %cst_155 = arith.constant 3.200000e+01 : f32
    %274 = vector.broadcast %cst_155 : f32 to vector<16x1xf32>
    %275 = arith.divf %273, %274 : vector<16x1xf32>
    %276 = vector.broadcast %275 : vector<16x1xf32> to vector<16x32xf32>
    %277 = arith.subf %271, %276 : vector<16x32xf32>
    %278 = arith.mulf %277, %277 : vector<16x32xf32>
    %cst_156 = arith.constant dense<0.000000e+00> : vector<16xf32>
    %279 = vector.multi_reduction <add>, %278, %cst_156 [1] : vector<16x32xf32> to vector<16xf32>
    %280 = vector.shape_cast %279 : vector<16xf32> to vector<16x1xf32>
    %cst_157 = arith.constant 3.200000e+01 : f32
    %281 = vector.broadcast %cst_157 : f32 to vector<16x1xf32>
    %282 = arith.divf %280, %281 : vector<16x1xf32>
    %cst_158 = arith.constant 9.99999996E-13 : f32
    %283 = vector.broadcast %cst_158 : f32 to vector<16x1xf32>
    %284 = arith.addf %282, %283 : vector<16x1xf32>
    %285 = math.rsqrt %284 : vector<16x1xf32>
    %286 = vector.broadcast %285 : vector<16x1xf32> to vector<16x32xf32>
    %287 = arith.mulf %277, %286 : vector<16x32xf32>
    %288 = arith.mulf %287, %8 : vector<16x32xf32>
    %289 = arith.addf %288, %11 : vector<16x32xf32>
    %290 = vector.extract_strided_slice %289 {offsets = [0, 0], sizes = [16, 8], strides = [1, 1]} : vector<16x32xf32> to vector<16x8xf32>
    %c0_159 = arith.constant 0 : index
    %c0_160 = arith.constant 0 : index
    %291 = vector.load %arg9[%c0_159, %c0_160] : memref<64x8xf32, #tpu.memory_space<vmem>>, vector<16x8xf32>
    tpu.vector_store %arg9[%c0_159, %c0_160], %290 {strides = array<i32>} : memref<64x8xf32, #tpu.memory_space<vmem>>, vector<16x8xf32>,
    %292 = vector.extract_strided_slice %289 {offsets = [0, 8], sizes = [16, 8], strides = [1, 1]} : vector<16x32xf32> to vector<16x8xf32>
    %c16_161 = arith.constant 16 : index
    %c0_162 = arith.constant 0 : index
    %293 = vector.load %arg9[%c16_161, %c0_162] : memref<64x8xf32, #tpu.memory_space<vmem>>, vector<16x8xf32>
    tpu.vector_store %arg9[%c16_161, %c0_162], %292 {strides = array<i32>} : memref<64x8xf32, #tpu.memory_space<vmem>>, vector<16x8xf32>,
    %294 = vector.extract_strided_slice %289 {offsets = [0, 16], sizes = [16, 8], strides = [1, 1]} : vector<16x32xf32> to vector<16x8xf32>
    %c32_163 = arith.constant 32 : index
    %c0_164 = arith.constant 0 : index
    %295 = vector.load %arg9[%c32_163, %c0_164] : memref<64x8xf32, #tpu.memory_space<vmem>>, vector<16x8xf32>
    tpu.vector_store %arg9[%c32_163, %c0_164], %294 {strides = array<i32>} : memref<64x8xf32, #tpu.memory_space<vmem>>, vector<16x8xf32>,
    %296 = vector.extract_strided_slice %289 {offsets = [0, 24], sizes = [16, 8], strides = [1, 1]} : vector<16x32xf32> to vector<16x8xf32>
    %c48_165 = arith.constant 48 : index
    %c0_166 = arith.constant 0 : index
    %297 = vector.load %arg9[%c48_165, %c0_166] : memref<64x8xf32, #tpu.memory_space<vmem>>, vector<16x8xf32>
    tpu.vector_store %arg9[%c48_165, %c0_166], %296 {strides = array<i32>} : memref<64x8xf32, #tpu.memory_space<vmem>>, vector<16x8xf32>,
    %c0_167 = arith.constant 0 : index
    %c0_168 = arith.constant 0 : index
    %298 = vector.load %arg9[%c0_167, %c0_168] : memref<64x8xf32, #tpu.memory_space<vmem>>, vector<64x8xf32>
    %c1_169 = arith.constant 1 : index
    %c0_170 = arith.constant 0 : index
    %c0_171 = arith.constant 0 : index
    %299 = vector.load %arg4[%c1_169, %c0_170, %c0_171] : memref<2x8x24xf32, #tpu.memory_space<vmem>>, vector<1x8x24xf32>
    %300 = vector.shape_cast %299 : vector<1x8x24xf32> to vector<8x24xf32>
    %301 = vector.extract_strided_slice %300 {offsets = [0, 0], sizes = [8, 8], strides = [1, 1]} : vector<8x24xf32> to vector<8x8xf32>
    %cst_172 = arith.constant dense<0.000000e+00> : vector<64x8xf32>
    %302 = tpu.matmul %298, %301, %cst_172 {dimension_numbers = #tpu.dot_dimension_numbers<[1], [0], [0], [1], [0, 0, 1, 1], [], []>} : vector<64x8xf32>, vector<8x8xf32>, vector<64x8xf32> -> vector<64x8xf32>
    %303 = vector.extract_strided_slice %19 {offsets = [0, 0], sizes = [1, 8], strides = [1, 1]} : vector<1x24xf32> to vector<1x8xf32>
    %304 = vector.broadcast %303 : vector<1x8xf32> to vector<64x8xf32>
    %305 = arith.addf %302, %304 : vector<64x8xf32>
    %c0_173 = arith.constant 0 : index
    %c0_174 = arith.constant 0 : index
    %306 = vector.load %arg11[%c0_173, %c0_174] : memref<64x16xf32, #tpu.memory_space<vmem>>, vector<64x8xf32>
    %c0_175 = arith.constant 0 : index
    %c8_176 = arith.constant 8 : index
    %307 = vector.load %arg11[%c0_175, %c8_176] : memref<64x16xf32, #tpu.memory_space<vmem>>, vector<64x8xf32>
    %c0_177 = arith.constant 0 : index
    %c64_178 = arith.constant 64 : index
    %308 = vector.load %arg3[%c0_177, %c64_178] : memref<64x128xf32, #tpu.memory_space<vmem>>, vector<64x64xf32>
    %cst_179 = arith.constant dense<0.000000e+00> : vector<64x64xf32>
    %309 = tpu.matmul %305, %306, %cst_179 {dimension_numbers = #tpu.dot_dimension_numbers<[1], [1], [0], [0], [0, 0, 1, 0], [], []>} : vector<64x8xf32>, vector<64x8xf32>, vector<64x64xf32> -> vector<64x64xf32>
    %310 = arith.addf %309, %308 : vector<64x64xf32>
    %cst_180 = arith.constant dense<0xFF800000> : vector<64xf32>
    %311 = vector.multi_reduction <maximumf>, %310, %cst_180 [1] : vector<64x64xf32> to vector<64xf32>
    %312 = vector.shape_cast %311 : vector<64xf32> to vector<64x1xf32>
    %313 = vector.broadcast %312 : vector<64x1xf32> to vector<64x64xf32>
    %314 = arith.subf %310, %313 : vector<64x64xf32>
    %315 = math.exp %314 : vector<64x64xf32>
    %cst_181 = arith.constant dense<0.000000e+00> : vector<64xf32>
    %316 = vector.multi_reduction <add>, %315, %cst_181 [1] : vector<64x64xf32> to vector<64xf32>
    %317 = vector.shape_cast %316 : vector<64xf32> to vector<64x1xf32>
    %318 = tpu.reciprocal %317 {approx = true} : vector<64x1xf32> -> vector<64x1xf32>
    %319 = vector.broadcast %318 : vector<64x1xf32> to vector<64x64xf32>
    %320 = arith.mulf %315, %319 : vector<64x64xf32>
    %cst_182 = arith.constant dense<0.000000e+00> : vector<64x8xf32>
    %321 = tpu.matmul %320, %307, %cst_182 {dimension_numbers = #tpu.dot_dimension_numbers<[1], [0], [0], [1], [0, 0, 1, 1], [], []>} : vector<64x64xf32>, vector<64x8xf32>, vector<64x8xf32> -> vector<64x8xf32>
    %322 = vector.extract_strided_slice %321 {offsets = [0, 0], sizes = [16, 8], strides = [1, 1]} : vector<64x8xf32> to vector<16x8xf32>
    %c0_183 = arith.constant 0 : index
    %c0_184 = arith.constant 0 : index
    %323 = vector.load %arg10[%c0_183, %c0_184] : memref<16x32xf32, #tpu.memory_space<vmem>>, vector<16x8xf32>
    tpu.vector_store %arg10[%c0_183, %c0_184], %322 {strides = array<i32>} : memref<16x32xf32, #tpu.memory_space<vmem>>, vector<16x8xf32>,
    %324 = vector.extract_strided_slice %321 {offsets = [16, 0], sizes = [16, 8], strides = [1, 1]} : vector<64x8xf32> to vector<16x8xf32>
    %c0_185 = arith.constant 0 : index
    %c8_186 = arith.constant 8 : index
    %325 = vector.load %arg10[%c0_185, %c8_186] : memref<16x32xf32, #tpu.memory_space<vmem>>, vector<16x8xf32>
    tpu.vector_store %arg10[%c0_185, %c8_186], %324 {strides = array<i32>} : memref<16x32xf32, #tpu.memory_space<vmem>>, vector<16x8xf32>,
    %326 = vector.extract_strided_slice %321 {offsets = [32, 0], sizes = [16, 8], strides = [1, 1]} : vector<64x8xf32> to vector<16x8xf32>
    %c0_187 = arith.constant 0 : index
    %c16_188 = arith.constant 16 : index
    %327 = vector.load %arg10[%c0_187, %c16_188] : memref<16x32xf32, #tpu.memory_space<vmem>>, vector<16x8xf32>
    tpu.vector_store %arg10[%c0_187, %c16_188], %326 {strides = array<i32>} : memref<16x32xf32, #tpu.memory_space<vmem>>, vector<16x8xf32>,
    %328 = vector.extract_strided_slice %321 {offsets = [48, 0], sizes = [16, 8], strides = [1, 1]} : vector<64x8xf32> to vector<16x8xf32>
    %c0_189 = arith.constant 0 : index
    %c24_190 = arith.constant 24 : index
    %329 = vector.load %arg10[%c0_189, %c24_190] : memref<16x32xf32, #tpu.memory_space<vmem>>, vector<16x8xf32>
    tpu.vector_store %arg10[%c0_189, %c24_190], %328 {strides = array<i32>} : memref<16x32xf32, #tpu.memory_space<vmem>>, vector<16x8xf32>,
    %c0_191 = arith.constant 0 : index
    %c0_192 = arith.constant 0 : index
    %330 = vector.load %arg10[%c0_191, %c0_192] : memref<16x32xf32, #tpu.memory_space<vmem>>, vector<16x32xf32>
    %c1_193 = arith.constant 1 : index
    %c0_194 = arith.constant 0 : index
    %c0_195 = arith.constant 0 : index
    %331 = vector.load %arg5[%c1_193, %c0_194, %c0_195] : memref<2x32x32xf32, #tpu.memory_space<vmem>>, vector<1x32x32xf32>
    %332 = vector.shape_cast %331 : vector<1x32x32xf32> to vector<32x32xf32>
    %cst_196 = arith.constant dense<0.000000e+00> : vector<16x32xf32>
    %333 = tpu.matmul %330, %332, %cst_196 {dimension_numbers = #tpu.dot_dimension_numbers<[1], [0], [0], [1], [0, 0, 1, 1], [], []>} : vector<16x32xf32>, vector<32x32xf32>, vector<16x32xf32> -> vector<16x32xf32>
    %334 = arith.addf %271, %333 : vector<16x32xf32>
    %335 = arith.addf %334, %25 : vector<16x32xf32>
    %cst_197 = arith.constant dense<0.000000e+00> : vector<16xf32>
    %336 = vector.multi_reduction <add>, %335, %cst_197 [1] : vector<16x32xf32> to vector<16xf32>
    %337 = vector.shape_cast %336 : vector<16xf32> to vector<16x1xf32>
    %cst_198 = arith.constant 3.200000e+01 : f32
    %338 = vector.broadcast %cst_198 : f32 to vector<16x1xf32>
    %339 = arith.divf %337, %338 : vector<16x1xf32>
    %340 = vector.broadcast %339 : vector<16x1xf32> to vector<16x32xf32>
    %341 = arith.subf %335, %340 : vector<16x32xf32>
    %342 = arith.mulf %341, %341 : vector<16x32xf32>
    %cst_199 = arith.constant dense<0.000000e+00> : vector<16xf32>
    %343 = vector.multi_reduction <add>, %342, %cst_199 [1] : vector<16x32xf32> to vector<16xf32>
    %344 = vector.shape_cast %343 : vector<16xf32> to vector<16x1xf32>
    %cst_200 = arith.constant 3.200000e+01 : f32
    %345 = vector.broadcast %cst_200 : f32 to vector<16x1xf32>
    %346 = arith.divf %344, %345 : vector<16x1xf32>
    %cst_201 = arith.constant 9.99999996E-13 : f32
    %347 = vector.broadcast %cst_201 : f32 to vector<16x1xf32>
    %348 = arith.addf %346, %347 : vector<16x1xf32>
    %349 = math.rsqrt %348 : vector<16x1xf32>
    %350 = vector.broadcast %349 : vector<16x1xf32> to vector<16x32xf32>
    %351 = arith.mulf %341, %350 : vector<16x32xf32>
    %352 = arith.mulf %351, %14 : vector<16x32xf32>
    %353 = arith.addf %352, %17 : vector<16x32xf32>
    %c0_202 = arith.constant 0 : index
    %c0_203 = arith.constant 0 : index
    %c0_204 = arith.constant 0 : index
    %354 = vector.load %arg6[%c0_202, %c0_203, %c0_204] : memref<2x32x64xf32, #tpu.memory_space<vmem>>, vector<1x32x64xf32>
    %355 = vector.shape_cast %354 : vector<1x32x64xf32> to vector<32x64xf32>
    %cst_205 = arith.constant dense<0.000000e+00> : vector<16x64xf32>
    %356 = tpu.matmul %353, %355, %cst_205 {dimension_numbers = #tpu.dot_dimension_numbers<[1], [0], [0], [1], [0, 0, 1, 1], [], []>} : vector<16x32xf32>, vector<32x64xf32>, vector<16x64xf32> -> vector<16x64xf32>
    %357 = arith.addf %356, %28 : vector<16x64xf32>
    %cst_206 = arith.constant 5.000000e-01 : f32
    %358 = vector.broadcast %cst_206 : f32 to vector<16x64xf32>
    %359 = arith.mulf %358, %357 : vector<16x64xf32>
    %360 = arith.mulf %357, %357 : vector<16x64xf32>
    %361 = arith.mulf %360, %357 : vector<16x64xf32>
    %cst_207 = arith.constant 4.471500e-02 : f32
    %362 = vector.broadcast %cst_207 : f32 to vector<16x64xf32>
    %363 = arith.mulf %362, %361 : vector<16x64xf32>
    %364 = arith.addf %357, %363 : vector<16x64xf32>
    %cst_208 = arith.constant 0.797884583 : f32
    %365 = vector.broadcast %cst_208 : f32 to vector<16x64xf32>
    %366 = arith.mulf %365, %364 : vector<16x64xf32>
    %367 = math.tanh %366 : vector<16x64xf32>
    %cst_209 = arith.constant 1.000000e+00 : f32
    %368 = vector.broadcast %cst_209 : f32 to vector<16x64xf32>
    %369 = arith.addf %368, %367 : vector<16x64xf32>
    %370 = arith.mulf %359, %369 : vector<16x64xf32>
    %c1_210 = arith.constant 1 : index
    %c0_211 = arith.constant 0 : index
    %c0_212 = arith.constant 0 : index
    %371 = vector.load %arg6[%c1_210, %c0_211, %c0_212] : memref<2x32x64xf32, #tpu.memory_space<vmem>>, vector<1x32x64xf32>
    %372 = vector.shape_cast %371 : vector<1x32x64xf32> to vector<32x64xf32>
    %cst_213 = arith.constant dense<0.000000e+00> : vector<16x32xf32>
    %373 = tpu.matmul %370, %372, %cst_213 {dimension_numbers = #tpu.dot_dimension_numbers<[1], [1], [0], [0], [0, 0, 1, 0], [], []>} : vector<16x64xf32>, vector<32x64xf32>, vector<16x32xf32> -> vector<16x32xf32>
    %374 = arith.addf %335, %373 : vector<16x32xf32>
    %375 = arith.addf %374, %31 : vector<16x32xf32>
    %c0_214 = arith.constant 0 : index
    %c0_215 = arith.constant 0 : index
    %376 = vector.load %arg8[%c0_214, %c0_215] : memref<16x32xf32, #tpu.memory_space<vmem>>, vector<16x32xf32>
    tpu.vector_store %arg8[%c0_214, %c0_215], %375 {strides = array<i32>} : memref<16x32xf32, #tpu.memory_space<vmem>>, vector<16x32xf32>,
    return
  }
  func.func @transform_0(%arg0: i32) -> (i32, i32) {
    %c0_i32 = arith.constant 0 : i32
    %c0_i32_0 = arith.constant 0 : i32
    %c0_i32_1 = arith.constant 0 : i32
    return %c0_i32, %c0_i32_0 : i32, i32
  }
  func.func @transform_1(%arg0: i32) -> (i32, i32) {
    %c0_i32 = arith.constant 0 : i32
    %c0_i32_0 = arith.constant 0 : i32
    %c0_i32_1 = arith.constant 0 : i32
    return %c0_i32, %c0_i32_0 : i32, i32
  }
  func.func @transform_2(%arg0: i32) -> (i32, i32) {
    %c0_i32 = arith.constant 0 : i32
    %c0_i32_0 = arith.constant 0 : i32
    %c0_i32_1 = arith.constant 0 : i32
    return %c0_i32, %c0_i32_0 : i32, i32
  }
  func.func @transform_3(%arg0: i32) -> (i32, i32, i32) {
    %c0_i32 = arith.constant 0 : i32
    %c0_i32_0 = arith.constant 0 : i32
    %c0_i32_1 = arith.constant 0 : i32
    %c0_i32_2 = arith.constant 0 : i32
    return %c0_i32, %c0_i32_0, %c0_i32_1 : i32, i32, i32
  }
  func.func @transform_4(%arg0: i32) -> (i32, i32, i32) {
    %c0_i32 = arith.constant 0 : i32
    %c0_i32_0 = arith.constant 0 : i32
    %c0_i32_1 = arith.constant 0 : i32
    %c0_i32_2 = arith.constant 0 : i32
    return %c0_i32, %c0_i32_0, %c0_i32_1 : i32, i32, i32
  }
  func.func @transform_5(%arg0: i32) -> (i32, i32, i32) {
    %c0_i32 = arith.constant 0 : i32
    %c0_i32_0 = arith.constant 0 : i32
    %c0_i32_1 = arith.constant 0 : i32
    %c0_i32_2 = arith.constant 0 : i32
    return %c0_i32, %c0_i32_0, %c0_i32_1 : i32, i32, i32
  }
  func.func @transform_6(%arg0: i32) -> (i32, i32) {
    %c0_i32 = arith.constant 0 : i32
    %c0_i32_0 = arith.constant 0 : i32
    %c0_i32_1 = arith.constant 0 : i32
    return %c0_i32, %c0_i32_0 : i32, i32
  }
  func.func @transform_7(%arg0: i32) -> (i32, i32) {
    %c0_i32 = arith.constant 0 : i32
    %c0_i32_0 = arith.constant 0 : i32
    %c0_i32_1 = arith.constant 0 : i32
    return %c0_i32, %c0_i32_0 : i32, i32
  }
}

</mosaic_0001>

<bundles_post_ra>
// kernel: transformer_decoder.1
= control target key start
LH: loop header
LB: loop body
LE: loop exit
PB: predicated region body
PF: predicated region fallthrough
CT: control target
= control target key end

     0   :  { %vm242_vm0 = vcmask 261120   ;;  %s6163_s0 = inlined_call_operand.vmem [shape: f32[16,32], index: 0, kind: input, shape index: {}]   ;;  %s6164_s1 = inlined_call_operand.vmem [shape: f32[64,8], index: 1, kind: input, shape index: {}]   ;;  %s6165_s2 = inlined_call_operand.vmem [shape: f32[64,128], index: 2, kind: input, shape index: {}]   ;;  %s6166_s3 = inlined_call_operand.vmem [shape: f32[2,8,24], index: 3, kind: input, shape index: {}]   ;;  %s6167_s4 = inlined_call_operand.vmem [shape: f32[2,32,32], index: 4, kind: input, shape index: {}]   ;;  %s6168_s5 = inlined_call_operand.vmem [shape: f32[2,32,64], index: 5, kind: input, shape index: {}]   ;;  %s6169_s6 = inlined_call_operand.vmem [shape: f32[12,64], index: 6, kind: input, shape index: {}]   ;;  %s6170_s7 = inlined_call_operand.hbm [shape: f32[16,32], index: 7, kind: output, shape index: {}]  }
   0x1   :  { %v5123_v0 = vld [vmem:[%s6163_s0] sm:$0xff]  ;;  %v5128_v1 = vld [vmem:[%s6163_s0 + $0x8] sm:$0xff] }
   0x2   :  { %12 = vsyncpa [#allocation6], 0  ;;  %v243_v2 = vsel %vm242_vm0, %v5123_v0, 0.0  ;;  %v246_v3 = vsel %vm242_vm0, %v5128_v1, 0.0  ;;  %v310_v14 = vld [vmem:[%s6166_s3] sm:$0xff]  ;;  %vm101_vm1 = vcmask 64512  }
   0x3   :  { %244 = vadd.xlane.f32.xlu0 %v243_v2  ;;  %4146 = vmatprep.subr.mxu1 %v310_v14  ;;  %v3720_v22 = vld [vmem:[%s6169_s6] ss:$0 sm:$0xff]  ;;  %v3721_v24 = vld [vmem:[%s6169_s6 + $0x1] ss:$0 sm:$0xff]  ;;  %s5071_s10 = smov 120   ;;  %s5072_s11 = smov 104   ;;  %vm5222_vm2 = vmpackc.low %vm101_vm1, %vm101_vm1 }
   0x4   :  { %4147 = vmatpush3.msra.mxu1 %v310_v14  ;;  %v5155_v31 = vld [vmem:[%s6166_s3 + $0x8] sm:$0xff]  ;;  %s5073_s14 = smov 112   ;;  %v79_v34 = vld [vmem:[%s6164_s1] sm:$0xff]  ;;  %v81_v42 = vld [vmem:[%s6164_s1 + $0x10] sm:$0xff]  ;;  %vm613_vm3 = vcmask 523264   ;;  %s5074_s12 = smov 8  }
   0x5   :  { %4134 = vmatprep.mubr.msk.f32.mxu0 %vm101_vm1, %v79_v34  ;;  %v80_v41 = vld [vmem:[%s6164_s1 + $0x8] sm:$0xff]  ;;  %v82_v45 = vld [vmem:[%s6164_s1 + $0x18] sm:$0xff]  ;;  %v83_v46 = vld [vmem:[%s6164_s1 + $0x20] sm:$0xff]  ;;  %s5075_s13 = smov 16   ;;  %s5076_s15 = smov 24   ;;  %vm865_vm4 = vcmask 130112  }
   0x6   :  { %v84_v49 = vld [vmem:[%s6164_s1 + $0x28] sm:$0xff]  ;;  %v85_v50 = vld [vmem:[%s6164_s1 + $0x30] sm:$0xff]  ;;  %v86_v53 = vld [vmem:[%s6164_s1 + $0x38] sm:$0xff]  ;;  %vm876_vm5 = vcmask 195712   ;;  %vm887_vm6 = vcmask 261312   ;;  %s5077_s24 = smov 64  }
   0x7   :  { %247 = vadd.xlane.f32.xlu0 %v246_v3  ;;  %v3740_v55 = vld [vmem:[%s6169_s6 + $0x6] ss:$0 sm:$0xff]  ;;  %vm231_vm7 = vcmask 130048   ;;  %vm5672_vm8 = vmpackc.low %vm613_vm3, %vm613_vm3 }
  0x90   :  { %v245_v4 = vpop.xlane.xlu0 %244 }
  0x91   :  { %v250_v5 = vmul.f32 0.03125, %v245_v4 }
  0x93   :  { %v252_v6 = vsub.f32 %v5123_v0, %v250_v5 }
  0x94   :  { %v248_v7 = vpop.xlane.xlu0 %247 }
  0x95   :  { %v251_v8 = vmul.f32 0.03125, %v248_v7  ;;  %v254_v9 = vmul.f32 %v252_v6, %v252_v6  ;;  %v5825_v7 = vld [vmem:[%s6165_s2 + $0x18] sm:$0xff] }
  0x97   :  { %v253_v10 = vsub.f32 %v5128_v1, %v251_v8  ;;  %v256_v11 = vsel %vm242_vm0, %v254_v9, 0.0 }
  0x98   :  { %257 = vadd.xlane.f32.xlu1 %v256_v11 }
  0x99   :  { %v255_v12 = vmul.f32 %v253_v10, %v253_v10 }
  0x9b   :  { %v259_v13 = vsel %vm242_vm0, %v255_v12, 0.0 }
  0x9c   :  { %260 = vadd.xlane.f32.xlu1 %v259_v13 }
 0x125   :  { %v258_v15 = vpop.xlane.xlu1 %257 }
 0x126   :  { %v262_v16 = vmul.f32 0.03125, %v258_v15 }
 0x128   :  { %v264_v17 = vadd.f32 1e-12, %v262_v16 }
 0x129   :  { %v261_v18 = vpop.xlane.xlu1 %260 }
 0x12a   :  { %4875 = vrsqrt.f32 %v264_v17  ;;  %v263_v19 = vmul.f32 0.03125, %v261_v18 }
 0x12c   :  { %v265_v20 = vadd.f32 1e-12, %v263_v19 }
 0x12e   :  { %4877 = vrsqrt.f32 %v265_v20 }
 0x134   :  { %v4876_v21 = vpop.eup %4875 }
 0x135   :  { %v268_v23 = vmul.f32 %v4876_v21, %v252_v6 }
 0x137   :  { %v270_v25 = vmul.f32 %v3720_v22, %v268_v23 }
 0x138   :  { %v4878_v26 = vpop.eup %4877 }
 0x139   :  { %v272_v27 = vadd.f32 %v3721_v24, %v270_v25  ;;  %v269_v28 = vmul.f32 %v4878_v26, %v253_v10 }
 0x13b   :  { %278 = vrot.lane.b32.xlu0 %v272_v27, %s5071_s10  ;;  %274 = vst.msk [vmem:[#allocation2] sm:$0xff] %vm101_vm1, %v272_v27  ;;  %v271_v29 = vmul.f32 %v3720_v22, %v269_v28 }
 0x13d   :  { %v273_v30 = vadd.f32 %v3721_v24, %v271_v29 }
 0x13f   :  { %280 = vrot.lane.b32.xlu1 %v273_v30, %s5071_s10  ;;  %275 = vst.msk [vmem:[#allocation2 + $0x8] sm:$0xff] %vm101_vm1, %v273_v30  ;;  %294 = vrot.lane.b32.xlu0 %v272_v27, %s5072_s11 }
 0x142   :  { %v302_v32 = vld [vmem:[#allocation2] sm:$0xff] }
 0x143   :  { %286 = vrot.lane.b32.xlu1 %v272_v27, %s5073_s14  ;;  %4148 = vmatprep.mubr.msk.f32.mxu1 %vm101_vm1, %v302_v32 }
 0x144   :  { %94 = vrot.lane.b32.xlu0 %v5155_v31, %s5071_s10 }
 0x146   :  { %v303_v33 = vld [vmem:[#allocation2 + $0x8] sm:$0xff] }
 0x147   :  { %288 = vrot.lane.b32.xlu1 %v273_v30, %s5073_s14  ;;  %4149 = vmatmul.mubr.msk.f32.vlgmr.msra.gmra.mrb[0].mxu1 %vm101_vm1, %v303_v33 }
 0x14b   :  { %296 = vrot.lane.b32.xlu1 %v273_v30, %s5072_s11 }
 0x1ad   :  { %v279_v35 = vpop.permute.xlu0 %278 }
 0x1ae   :  { %284 = vst.msk [vmem:[#allocation2 + $0x10] sm:$0xff] %vm101_vm1, %v279_v35 }
 0x1b1   :  { %v281_v36 = vpop.permute.xlu1 %280  ;;  %v295_v37 = vpop.permute.xlu0 %294 }
 0x1b2   :  { %285 = vst.msk [vmem:[#allocation2 + $0x18] sm:$0xff] %vm101_vm1, %v281_v36  ;;  %300 = vst.msk [vmem:[#allocation2 + $0x30] sm:$0xff] %vm101_vm1, %v295_v37 }
 0x1b5   :  { %v287_v38 = vpop.permute.xlu1 %286  ;;  %v304_v39 = vld [vmem:[#allocation2 + $0x10] sm:$0xff] }
 0x1b6   :  { %292 = vst.msk [vmem:[#allocation2 + $0x20] sm:$0xff] %vm101_vm1, %v287_v38  ;;  %4151 = vmatprep.mubr.msk.f32.mxu1 %vm101_vm1, %v304_v39  ;;  %v95_v40 = vpop.permute.xlu0 %94 }
 0x1b7   :  { %4132 = vmatprep.subr.mxu0 %v95_v40 }
 0x1b8   :  { %4133 = vmatpush3.msra.mxu0 %v95_v40  ;;  %v5276_v40 = vld [vmem:[%s6165_s2 + $0x8] sm:$0xff] }
 0x1b9   :  { %v289_v43 = vpop.permute.xlu1 %288  ;;  %v305_v44 = vld [vmem:[#allocation2 + $0x18] sm:$0xff]  ;;  %4135 = vmatmul.mubr.msk.f32.vlgmr.msra.gmra.mrb[0].mxu0 %vm101_vm1, %v80_v41  ;;  %v308_v52 = vld [vmem:[#allocation2 + $0x30] sm:$0xff]  ;;  %v5281_v41 = vld [vmem:[%s6165_s2] sm:$0xff] }
 0x1ba   :  { %293 = vst.msk [vmem:[#allocation2 + $0x28] sm:$0xff] %vm101_vm1, %v289_v43  ;;  %4152 = vmatmul.mubr.msk.f32.gmra.mrb[2].mxu1 %vm101_vm1, %v305_v44  ;;  %4137 = vmatprep.mubr.msk.f32.mxu0 %vm101_vm1, %v81_v42 }
 0x1bd   :  { %v297_v47 = vpop.permute.xlu1 %296  ;;  %v306_v48 = vld [vmem:[#allocation2 + $0x20] sm:$0xff]  ;;  %4138 = vmatmul.mubr.msk.f32.gmra.mrb[2].mxu0 %vm101_vm1, %v82_v45 }
 0x1be   :  { %301 = vst.msk [vmem:[#allocation2 + $0x38] sm:$0xff] %vm101_vm1, %v297_v47  ;;  %4154 = vmatprep.mubr.msk.f32.mxu1 %vm101_vm1, %v306_v48  ;;  %4140 = vmatprep.mubr.msk.f32.mxu0 %vm101_vm1, %v83_v46  ;;  %v5289_v47 = vld [vmem:[%s6165_s2 + $0x10] sm:$0xff] }
 0x1c1   :  { %v307_v51 = vld [vmem:[#allocation2 + $0x28] sm:$0xff]  ;;  %4141 = vmatmul.mubr.msk.f32.gmra.mrb[4].mxu0 %vm101_vm1, %v84_v49 }
 0x1c2   :  { %4155 = vmatmul.mubr.msk.f32.gmra.mrb[4].mxu1 %vm101_vm1, %v307_v51  ;;  %4143 = vmatprep.mubr.msk.f32.mxu0 %vm101_vm1, %v85_v50  ;;  %v5295_v50 = vld [vmem:[%s6165_s2 + $0x18] sm:$0xff] }
 0x1c3   :  { %4157 = vmatprep.mubr.msk.f32.mxu1 %vm101_vm1, %v308_v52 }
 0x1c5   :  { %v309_v54 = vld [vmem:[#allocation2 + $0x38] sm:$0xff]  ;;  %4144 = vmatmul.mubr.msk.f32.gmra.mrb[6].mxu0 %vm101_vm1, %v86_v53  ;;  %v5301_v53 = vld [vmem:[%s6165_s2 + $0x20] sm:$0xff] }
 0x1c6   :  { %4158 = vmatmul.mubr.msk.f32.gmra.mrb[6].mxu1 %vm101_vm1, %v309_v54 }
 0x21a   :  { %v4150_v56 = vpop.f32.mrb[0].mxu1 }
 0x21b   :  { %v411_v57 = vadd.f32 %v4150_v56, %v3740_v55  ;;  %v405_v58 = vpop.f32.mrb[1].mxu1 }
 0x21c   :  { %v406_v59 = vadd.f32 %v3740_v55, %v405_v58 }
 0x21e   :  { %4176 = vmatprep.mubr.msk.f32.mxu0 %vm101_vm1, %v406_v59  ;;  %v5212_v60 = vpack.i.bf16 %v411_v57, %v406_v59 }
 0x220   :  { %4756 = vrot.lane.b32.xlu1 %v5212_v60, %s5071_s10 }
 0x28c   :  { %v5238_v19 = vpop.f32.mrb[0].mxu0 }
 0x28d   :  { %v4153_v61 = vpop.f32.mrb[2].mxu1  ;;  %v5240_v20 = vpop.f32.mrb[1].mxu0 }
 0x28e   :  { %v421_v62 = vadd.f32 %v4153_v61, %v3740_v55  ;;  %v415_v63 = vpop.f32.mrb[3].mxu1  ;;  %v5314_v61 = vld [vmem:[%s6165_s2 + $0x30] sm:$0xff] }
 0x28f   :  { %v416_v2 = vadd.f32 %v3740_v55, %v415_v63 }
 0x290   :  { %v5242_v21 = vpop.f32.mrb[2].mxu0 }
 0x291   :  { %v5216_v3 = vpack.i.bf16 %v421_v62, %v416_v2  ;;  %v5244_v22 = vpop.f32.mrb[3].mxu0 }
 0x292   :  { %v4757_v4 = vpop.permute.xlu1 %4756 }
 0x293   :  { %v4759_v5 = vunpack.i.h.bf16 %v4757_v4  ;;  %v4758_v6 = vunpack.i.l.bf16 %v4757_v4  ;;  %4761 = vrot.lane.b32.xlu0 %v5216_v3, %s5071_s10 }
 0x294   :  { %v5246_v23 = vpop.f32.mrb[4].mxu0 }
 0x295   :  { %v4514_v8 = vpack.c.bf16 %v4759_v5, %v4758_v6  ;;  %v4156_v9 = vpop.f32.mrb[4].mxu1  ;;  %v5248_v24 = vpop.f32.mrb[5].mxu0  ;;  %v5322_v5 = vld [vmem:[%s6165_s2 + $0x38] sm:$0xff] }
 0x296   :  { %v431_v10 = vadd.f32 %v4156_v9, %v3740_v55  ;;  %v425_v11 = vpop.f32.mrb[5].mxu1 }
 0x297   :  { %v426_v12 = vadd.f32 %v3740_v55, %v425_v11  ;;  %4516 = vmatprep.subr.msk.bf16.mxu0 %vm5222_vm2, %v4514_v8 }
 0x298   :  { %4519 = vmatpush3.bf16.xpose.msk.msra.mxu0 %vm5222_vm2, %v4514_v8  ;;  %v5250_v25 = vpop.f32.mrb[6].mxu0 }
 0x299   :  { %v4159_v13 = vpop.f32.mrb[6].mxu1  ;;  %v5230_v14 = vpack.i.bf16 %v431_v10, %v426_v12  ;;  %v5252_v26 = vpop.f32.mrb[7].mxu0 }
 0x29a   :  { %v441_v15 = vadd.f32 %v4159_v13, %v3740_v55  ;;  %v435_v16 = vpop.f32.mrb[7].mxu1 }
 0x29b   :  { %v436_v17 = vadd.f32 %v3740_v55, %v435_v16  ;;  %4766 = vrot.lane.b32.xlu1 %v5230_v14, %s5071_s10 }
 0x29d   :  { %v5234_v18 = vpack.i.bf16 %v441_v15, %v436_v17 }
 0x29f   :  { %4771 = vrot.lane.b32.xlu0 %v5234_v18, %s5071_s10 }
 0x305   :  { %v4762_v27 = vpop.permute.xlu0 %4761 }
 0x306   :  { %v4764_v28 = vunpack.i.h.bf16 %v4762_v27  ;;  %v4763_v29 = vunpack.i.l.bf16 %v4762_v27 }
 0x308   :  { %v4520_v30 = vpack.c.bf16 %v4764_v28, %v4763_v29 }
 0x30a   :  { %4522 = vmatprep.subr.msk.bf16.mxu0 %vm5222_vm2, %v4520_v30 }
 0x30b   :  { %4525 = vmatpush3.bf16.xpose.msk.msra.mxu0 %vm5222_vm2, %v4520_v30 }
 0x30d   :  { %v4767_v32 = vpop.permute.xlu1 %4766 }
 0x30e   :  { %v4769_v33 = vunpack.i.h.bf16 %v4767_v32  ;;  %v4768_v34 = vunpack.i.l.bf16 %v4767_v32 }
 0x310   :  { %v4526_v35 = vpack.c.bf16 %v4769_v33, %v4768_v34 }
 0x311   :  { %v4772_v36 = vpop.permute.xlu0 %4771 }
 0x312   :  { %v4774_v37 = vunpack.i.h.bf16 %v4772_v36  ;;  %v4773_v38 = vunpack.i.l.bf16 %v4772_v36  ;;  %4528 = vmatprep.subr.msk.bf16.mxu0 %vm5222_vm2, %v4526_v35 }
 0x313   :  { %4531 = vmatpush3.bf16.xpose.msk.msra.mxu0 %vm5222_vm2, %v4526_v35 }
 0x314   :  { %v4532_v39 = vpack.c.bf16 %v4774_v37, %v4773_v38 }
 0x316   :  { %4534 = vmatprep.subr.msk.bf16.mxu0 %vm5222_vm2, %v4532_v39 }
 0x31b   :  { %4537 = vmatpush3.bf16.xpose.msk.msra.mxu0 %vm5222_vm2, %v4532_v39 }
 0x322   :  { %4177 = vmatmul.mubr.msk.f32.vlgmr.msra.gmra.mrb[8].mxu0 %vm101_vm1, %v411_v57  ;;  %v5308_v57 = vld [vmem:[%s6165_s2 + $0x28] sm:$0xff] }
 0x323   :  { %4179 = vmatprep.mubr.msk.f32.mxu0 %vm101_vm1, %v416_v2 }
 0x326   :  { %4180 = vmatmul.mubr.msk.f32.gmra.mrb[10].mxu0 %vm101_vm1, %v421_v62 }
 0x327   :  { %4182 = vmatprep.mubr.msk.f32.mxu0 %vm101_vm1, %v426_v12 }
 0x32a   :  { %4183 = vmatmul.mubr.msk.f32.gmra.mrb[12].mxu0 %vm101_vm1, %v431_v10 }
 0x32b   :  { %4185 = vmatprep.mubr.msk.f32.mxu0 %vm101_vm1, %v436_v17 }
 0x32e   :  { %4186 = vmatmul.mubr.msk.f32.gmra.mrb[14].mxu0 %vm101_vm1, %v441_v15 }
 0x3f5   :  { %v4178_v42 = vpop.f32.mrb[8].mxu0 }
 0x3f6   :  { %v580_v43 = vadd.f32 %v4178_v42, %v5276_v40  ;;  %v574_v44 = vpop.f32.mrb[9].mxu0 }
 0x3f7   :  { %v575_v45 = vadd.f32 %v574_v44, %v5281_v41 }
 0x3f8   :  { %v617_v46 = vsel %vm613_vm3, %v580_v43, -inf }
 0x3f9   :  { %618 = vmax.xlane.f32.xlu0 %v617_v46  ;;  %v4181_v48 = vpop.f32.mrb[10].mxu0  ;;  %v614_v49 = vsel %vm613_vm3, %v575_v45, -inf }
 0x3fa   :  { %v584_v51 = vpop.f32.mrb[11].mxu0  ;;  %615 = vmax.xlane.f32.xlu1 %v614_v49  ;;  %v590_v54 = vadd.f32 %v4181_v48, %v5295_v50 }
 0x3fb   :  { %v585_v52 = vadd.f32 %v584_v51, %v5289_v47 }
 0x3fc   :  { %v623_v2 = vsel %vm613_vm3, %v590_v54, -inf }
 0x3fd   :  { %v4184_v55 = vpop.f32.mrb[12].mxu0  ;;  %v620_v56 = vsel %vm613_vm3, %v585_v52, -inf }
 0x3fe   :  { %v594_v58 = vpop.f32.mrb[13].mxu0  ;;  %621 = vmax.xlane.f32.xlu0 %v620_v56  ;;  %v600_v62 = vadd.f32 %v4184_v55, %v5308_v57 }
 0x3ff   :  { %v595_v59 = vadd.f32 %v594_v58, %v5301_v53 }
 0x400   :  { %v629_v10 = vsel %vm613_vm3, %v600_v62, -inf }
 0x401   :  { %v4187_v63 = vpop.f32.mrb[14].mxu0  ;;  %v626_v4 = vsel %vm613_vm3, %v595_v59, -inf }
 0x402   :  { %v604_v6 = vpop.f32.mrb[15].mxu0  ;;  %624 = vmax.xlane.f32.xlu0 %v623_v2  ;;  %627 = vmax.xlane.f32.xlu1 %v626_v4  ;;  %v610_v9 = vadd.f32 %v4187_v63, %v5322_v5 }
 0x403   :  { %v605_v8 = vadd.f32 %v604_v6, %v5314_v61 }
 0x404   :  { %v635_v12 = vsel %vm613_vm3, %v610_v9, -inf }
 0x405   :  { %v632_v11 = vsel %vm613_vm3, %v605_v8, -inf }
 0x406   :  { %630 = vmax.xlane.f32.xlu0 %v629_v10  ;;  %633 = vmax.xlane.f32.xlu1 %v632_v11 }
 0x40a   :  { %636 = vmax.xlane.f32.xlu0 %v635_v12 }
 0x417   :  { %4776 = vrot.lane.b32.xlu1 %v5212_v60, %s5073_s14 }
 0x486   :  { %v619_v13 = vpop.xlane.xlu0 %618 }
 0x487   :  { %v639_v15 = vsub.f32 %v580_v43, %v619_v13  ;;  %v616_v16 = vpop.xlane.xlu1 %615 }
 0x488   :  { %v638_v17 = vsub.f32 %v575_v45, %v616_v16 }
 0x489   :  { %v648_v27 = vmul.f32 1.442695, %v639_v15 }
 0x48a   :  { %v646_v28 = vmul.f32 1.442695, %v638_v17 }
 0x48b   :  { %4879 = vpow2.f32 %v648_v27  ;;  %v622_v29 = vpop.xlane.xlu0 %621 }
 0x48c   :  { %4881 = vpow2.f32 %v646_v28  ;;  %v640_v30 = vsub.f32 %v585_v52, %v622_v29 }
 0x48e   :  { %v650_v32 = vmul.f32 1.442695, %v640_v30 }
 0x48f   :  { %v625_v33 = vpop.xlane.xlu0 %624  ;;  %v628_v34 = vpop.xlane.xlu1 %627 }
 0x490   :  { %4883 = vpow2.f32 %v650_v32  ;;  %v641_v35 = vsub.f32 %v590_v54, %v625_v33  ;;  %v642_v36 = vsub.f32 %v595_v59, %v628_v34 }
 0x492   :  { %v652_v37 = vmul.f32 1.442695, %v641_v35  ;;  %v654_v38 = vmul.f32 1.442695, %v642_v36 }
 0x493   :  { %v631_v39 = vpop.xlane.xlu0 %630  ;;  %v634_v60 = vpop.xlane.xlu1 %633 }
 0x494   :  { %4885 = vpow2.f32 %v652_v37  ;;  %v643_v42 = vsub.f32 %v600_v62, %v631_v39  ;;  %v644_v46 = vsub.f32 %v605_v8, %v634_v60 }
 0x495   :  { %v5331_v43 = vpop.eup %4879  ;;  %4887 = vpow2.f32 %v654_v38 }
 0x496   :  { %v4882_v44 = vpop.eup %4881  ;;  %v656_v45 = vmul.f32 1.442695, %v643_v42  ;;  %v665_v48 = vsel %vm613_vm3, %v5331_v43, 0.0  ;;  %v658_v59 = vmul.f32 1.442695, %v644_v46 }
 0x497   :  { %666 = vadd.xlane.f32.xlu0 %v665_v48  ;;  %v637_v49 = vpop.xlane.xlu0 %636  ;;  %v4777_v51 = vpop.permute.xlu1 %4776  ;;  %v662_v52 = vsel %vm613_vm3, %v4882_v44, 0.0 }
 0x498   :  { %4889 = vpow2.f32 %v656_v45  ;;  %v645_v54 = vsub.f32 %v610_v9, %v637_v49  ;;  %v4779_v55 = vunpack.i.h.bf16 %v4777_v51  ;;  %v4778_v56 = vunpack.i.l.bf16 %v4777_v51  ;;  %663 = vadd.xlane.f32.xlu1 %v662_v52 }
 0x49a   :  { %v5336_v58 = vpop.eup %4883  ;;  %v660_v62 = vmul.f32 1.442695, %v645_v54  ;;  %v4538_v63 = vpack.c.bf16 %v4779_v55, %v4778_v56 }
 0x49b   :  { %v668_v2 = vsel %vm613_vm3, %v5336_v58, 0.0 }
 0x49c   :  { %4891 = vpow2.f32 %v660_v62  ;;  %669 = vadd.xlane.f32.xlu1 %v668_v2  ;;  %4539 = vmatprep.subr.bf16.mxu1 %v4538_v63 }
 0x49d   :  { %4541 = vmatpush3.bf16.msra.mxu1 %v4538_v63  ;;  %4893 = vpow2.f32 %v658_v59 }
 0x49e   :  { %v5340_v4 = vpop.eup %4885 }
 0x49f   :  { %v5342_v6 = vpop.eup %4887  ;;  %v671_v8 = vsel %vm613_vm3, %v5340_v4, 0.0 }
 0x4a0   :  { %672 = vadd.xlane.f32.xlu0 %v671_v8  ;;  %v674_v9 = vsel %vm613_vm3, %v5342_v6, 0.0 }
 0x4a1   :  { %675 = vadd.xlane.f32.xlu1 %v674_v9 }
 0x4a2   :  { %v5348_v10 = vpop.eup %4889 }
 0x4a3   :  { %v677_v11 = vsel %vm613_vm3, %v5348_v10, 0.0 }
 0x4a4   :  { %678 = vadd.xlane.f32.xlu0 %v677_v11 }
 0x4a6   :  { %v5352_v12 = vpop.eup %4891 }
 0x4a7   :  { %v683_v13 = vsel %vm613_vm3, %v5352_v12, 0.0  ;;  %v4894_v15 = vpop.eup %4893 }
 0x4a8   :  { %684 = vadd.xlane.f32.xlu0 %v683_v13  ;;  %v680_v16 = vsel %vm613_vm3, %v4894_v15, 0.0 }
 0x4ac   :  { %681 = vadd.xlane.f32.xlu0 %v680_v16  ;;  %v895_v16 = vld [vmem:[%s6167_s4 + $0x18] sm:$0xff] }
 0x4b2   :  { %4786 = vrot.lane.b32.xlu1 %v5230_v14, %s5073_s14 }
 0x4b6   :  { %4791 = vrot.lane.b32.xlu1 %v5234_v18, %s5073_s14 }
 0x4c2   :  { %4781 = vrot.lane.b32.xlu0 %v5216_v3, %s5073_s14 }
 0x524   :  { %v667_v27 = vpop.xlane.xlu0 %666 }
 0x525   :  { %v664_v17 = vpop.xlane.xlu1 %663 }
 0x526   :  { %4895 = vrcp.f32 %v664_v17 }
 0x527   :  { %4897 = vrcp.f32 %v667_v27 }
 0x529   :  { %v670_v28 = vpop.xlane.xlu1 %669 }
 0x52a   :  { %4899 = vrcp.f32 %v670_v28 }
 0x52d   :  { %v673_v29 = vpop.xlane.xlu0 %672 }
 0x52e   :  { %v676_v34 = vpop.xlane.xlu1 %675  ;;  %4901 = vrcp.f32 %v673_v29 }
 0x52f   :  { %4903 = vrcp.f32 %v676_v34 }
 0x530   :  { %v4896_v30 = vpop.eup %4895 }
 0x531   :  { %v679_v32 = vpop.xlane.xlu0 %678  ;;  %v694_v33 = vmul.f32 %v4896_v30, %v4882_v44  ;;  %v4898_v49 = vpop.eup %4897 }
 0x532   :  { %v4787_v36 = vpop.permute.xlu1 %4786  ;;  %4905 = vrcp.f32 %v679_v32  ;;  %v695_v52 = vmul.f32 %v4898_v49, %v5331_v43 }
 0x533   :  { %4204 = vmatprep.mubr.msk.f32.mxu1 %vm613_vm3, %v694_v33  ;;  %v4789_v38 = vunpack.i.h.bf16 %v4787_v36  ;;  %v4788_v18 = vunpack.i.l.bf16 %v4787_v36 }
 0x534   :  { %v4900_v51 = vpop.eup %4899 }
 0x535   :  { %v685_v35 = vpop.xlane.xlu0 %684  ;;  %v4546_v48 = vpack.c.bf16 %v4789_v38, %v4788_v18  ;;  %v696_v55 = vmul.f32 %v4900_v51, %v5336_v58 }
 0x536   :  { %v4792_v3 = vpop.permute.xlu1 %4791 }
 0x537   :  { %v4794_v45 = vunpack.i.h.bf16 %v4792_v3  ;;  %v4793_v46 = vunpack.i.l.bf16 %v4792_v3 }
 0x538   :  { %v4902_v54 = vpop.eup %4901 }
 0x539   :  { %v682_v14 = vpop.xlane.xlu0 %681  ;;  %v4550_v44 = vpack.c.bf16 %v4794_v45, %v4793_v46  ;;  %v4904_v56 = vpop.eup %4903  ;;  %v697_v59 = vmul.f32 %v4902_v54, %v5340_v4  ;;  %v892_v4 = vld [vmem:[%s6167_s4] sm:$0xff] }
 0x53a   :  { %4907 = vrcp.f32 %v682_v14  ;;  %v698_v63 = vmul.f32 %v4904_v56, %v5342_v6  ;;  %v893_v6 = vld [vmem:[%s6167_s4 + $0x8] sm:$0xff] }
 0x53b   :  { %4909 = vrcp.f32 %v685_v35  ;;  %v4554_v11 = vpack.c.bf16 %v893_v6, %v892_v4  ;;  %v3722_v6 = vld [vmem:[%s6169_s6 + $0x2] ss:$0 sm:$0xff] }
 0x53c   :  { %v4906_v62 = vpop.eup %4905 }
 0x53d   :  { %v4782_v37 = vpop.permute.xlu0 %4781  ;;  %v699_v43 = vmul.f32 %v4906_v62, %v5348_v10 }
 0x53e   :  { %v4784_v39 = vunpack.i.h.bf16 %v4782_v37  ;;  %v4783_v60 = vunpack.i.l.bf16 %v4782_v37 }
 0x540   :  { %v4542_v42 = vpack.c.bf16 %v4784_v39, %v4783_v60  ;;  %v3726_v39 = vld [vmem:[%s6169_s6 + $0x8] ss:$0 sm:$0xff] }
 0x542   :  { %4543 = vmatprep.subr.bf16.mxu1 %v4542_v42 }
 0x543   :  { %4545 = vmatpush3.bf16.msra.mxu1 %v4542_v42 }
 0x544   :  { %4547 = vmatprep.subr.bf16.mxu1 %v4546_v48  ;;  %v4908_v2 = vpop.eup %4907 }
 0x545   :  { %v4910_v8 = vpop.eup %4909  ;;  %v700_v9 = vmul.f32 %v4908_v2, %v4894_v15  ;;  %v894_v15 = vld [vmem:[%s6167_s4 + $0x10] sm:$0xff] }
 0x546   :  { %v701_v58 = vmul.f32 %v4910_v8, %v5352_v12  ;;  %v4558_v27 = vpack.c.bf16 %v895_v16, %v894_v15 }
 0x547   :  { %4549 = vmatpush3.bf16.msra.mxu1 %v4546_v48 }
 0x548   :  { %4551 = vmatprep.subr.bf16.mxu1 %v4550_v44 }
 0x54b   :  { %4553 = vmatpush3.bf16.msra.mxu1 %v4550_v44 }
 0x54c   :  { %4555 = vmatprep.subr.bf16.mxu1 %v4554_v11 }
 0x54e   :  { %4205 = vmatmul.mubr.msk.f32.vlgmr.msra.gmra.mrb[8].mxu1 %vm613_vm3, %v695_v52 }
 0x54f   :  { %4207 = vmatprep.mubr.msk.f32.mxu1 %vm613_vm3, %v696_v55  ;;  %4557 = vmatpush3.bf16.msra.mxu1 %v4554_v11 }
 0x550   :  { %4559 = vmatprep.subr.bf16.mxu1 %v4558_v27 }
 0x552   :  { %4208 = vmatmul.mubr.msk.f32.gmra.mrb[10].mxu1 %vm613_vm3, %v697_v59 }
 0x553   :  { %4210 = vmatprep.mubr.msk.f32.mxu1 %vm613_vm3, %v698_v63  ;;  %4561 = vmatpush3.bf16.msra.mxu1 %v4558_v27 }
 0x554   :  { %4227 = vmatprep.subr.mxu1 %v5155_v31 }
 0x556   :  { %4211 = vmatmul.mubr.msk.f32.gmra.mrb[12].mxu1 %vm613_vm3, %v699_v43 }
 0x557   :  { %4213 = vmatprep.mubr.msk.f32.mxu1 %vm613_vm3, %v700_v9 }
 0x55a   :  { %4214 = vmatmul.mubr.msk.f32.gmra.mrb[14].mxu1 %vm613_vm3, %v701_v58 }
 0x621   :  { %v4206_v10 = vpop.f32.mrb[8].mxu1 }
 0x622   :  { %856 = vst.msk [vmem:[#allocation3 + $0x8] sm:$0xff] %vm101_vm1, %v4206_v10  ;;  %v816_v13 = vpop.f32.mrb[9].mxu1  ;;  %v3723_v10 = vld [vmem:[%s6169_s6 + $0x3] ss:$0 sm:$0xff] }
 0x623   :  { %855 = vst.msk [vmem:[#allocation3] sm:$0xff] %vm101_vm1, %v816_v13 }
 0x625   :  { %v4209_v12 = vpop.f32.mrb[10].mxu1 }
 0x626   :  { %861 = vrot.lane.b32.xlu1 %v4209_v12, %s5074_s12  ;;  %v826_v17 = vpop.f32.mrb[11].mxu1 }
 0x629   :  { %v4212_v28 = vpop.f32.mrb[12].mxu1 }
 0x62a   :  { %859 = vrot.lane.b32.xlu1 %v826_v17, %s5074_s12  ;;  %872 = vrot.lane.b32.xlu0 %v4212_v28, %s5075_s13  ;;  %v836_v29 = vpop.f32.mrb[13].mxu1 }
 0x62d   :  { %v4215_v30 = vpop.f32.mrb[14].mxu1 }
 0x62e   :  { %870 = vrot.lane.b32.xlu1 %v836_v29, %s5075_s13  ;;  %883 = vrot.lane.b32.xlu0 %v4215_v30, %s5076_s15  ;;  %v846_v32 = vpop.f32.mrb[15].mxu1  ;;  %v5443_v30 = vld [vmem:[%s6169_s6 + $0x7] ss:$0 sm:$0xff] }
 0x632   :  { %881 = vrot.lane.b32.xlu1 %v846_v32, %s5076_s15 }
 0x698   :  { %v862_v33 = vpop.permute.xlu1 %861 }
 0x699   :  { %867 = vst.msk [vmem:[#allocation3 + $0x8] sm:$0xff] %vm865_vm4, %v862_v33 }
 0x69c   :  { %v860_v34 = vpop.permute.xlu1 %859  ;;  %v873_v35 = vpop.permute.xlu0 %872 }
 0x69d   :  { %866 = vst.msk [vmem:[#allocation3] sm:$0xff] %vm865_vm4, %v860_v34 }
 0x69e   :  { %878 = vst.msk [vmem:[#allocation3 + $0x8] sm:$0xff] %vm876_vm5, %v873_v35 }
 0x6a0   :  { %v871_v36 = vpop.permute.xlu1 %870  ;;  %v884_v14 = vpop.permute.xlu0 %883 }
 0x6a1   :  { %877 = vst.msk [vmem:[#allocation3] sm:$0xff] %vm876_vm5, %v871_v36 }
 0x6a2   :  { %889 = vst.msk [vmem:[#allocation3 + $0x8] sm:$0xff] %vm887_vm6, %v884_v14 }
 0x6a4   :  { %v882_v37 = vpop.permute.xlu1 %881 }
 0x6a5   :  { %888 = vst.msk [vmem:[#allocation3] sm:$0xff] %vm887_vm6, %v882_v37 }
 0x6a9   :  { %v891_v18 = vld [vmem:[#allocation3 + $0x8] sm:$0xff] }
 0x6ac   :  { %v890_v38 = vld [vmem:[#allocation3] sm:$0xff] }
 0x6ad   :  { %4224 = vmatprep.mubr.msk.f32.mxu1 %vm242_vm0, %v890_v38 }
 0x6ae   :  { %4225 = vmatmul.mubr.msk.f32.vlgmr.msra.gmra.mrb[16].mxu1 %vm242_vm0, %v891_v18 }
 0x6af   :  { %4228 = vmatpush3.msra.mxu1 %v5155_v31 }
 0x781   :  { %v4226_v60 = vpop.f32.mrb[16].mxu1 }
 0x782   :  { %v978_v3 = vadd.f32 %v4226_v60, %v5128_v1  ;;  %v968_v42 = vpop.f32.mrb[17].mxu1 }
 0x783   :  { %v977_v45 = vadd.f32 %v968_v42, %v5123_v0 }
 0x784   :  { %v5412_v46 = vadd.f32 %v3726_v39, %v978_v3 }
 0x785   :  { %v5414_v48 = vadd.f32 %v3726_v39, %v977_v45 }
 0x786   :  { %v984_v44 = vsel %vm242_vm0, %v5412_v46, 0.0 }
 0x787   :  { %985 = vadd.xlane.f32.xlu0 %v984_v44  ;;  %v981_v31 = vsel %vm242_vm0, %v5414_v48, 0.0 }
 0x788   :  { %982 = vadd.xlane.f32.xlu1 %v981_v31 }
 0x814   :  { %v986_v49 = vpop.xlane.xlu0 %985 }
 0x815   :  { %v988_v51 = vmul.f32 0.03125, %v986_v49  ;;  %v983_v52 = vpop.xlane.xlu1 %982 }
 0x816   :  { %v987_v54 = vmul.f32 0.03125, %v983_v52 }
 0x817   :  { %v990_v1 = vsub.f32 %v5412_v46, %v988_v51 }
 0x818   :  { %v989_v0 = vsub.f32 %v5414_v48, %v987_v54 }
 0x819   :  { %v992_v59 = vmul.f32 %v990_v1, %v990_v1 }
 0x81a   :  { %v991_v55 = vmul.f32 %v989_v0, %v989_v0 }
 0x81b   :  { %v996_v62 = vsel %vm242_vm0, %v992_v59, 0.0 }
 0x81c   :  { %v993_v56 = vsel %vm242_vm0, %v991_v55, 0.0 }
 0x81d   :  { %994 = vadd.xlane.f32.xlu0 %v993_v56 }
 0x821   :  { %997 = vadd.xlane.f32.xlu0 %v996_v62 }
 0x8aa   :  { %v995_v63 = vpop.xlane.xlu0 %994 }
 0x8ab   :  { %v999_v2 = vmul.f32 0.03125, %v995_v63 }
 0x8ad   :  { %v1001_v43 = vadd.f32 1e-12, %v999_v2 }
 0x8ae   :  { %v998_v8 = vpop.xlane.xlu0 %997 }
 0x8af   :  { %4911 = vrsqrt.f32 %v1001_v43  ;;  %v1000_v9 = vmul.f32 0.03125, %v998_v8 }
 0x8b1   :  { %v1002_v58 = vadd.f32 1e-12, %v1000_v9 }
 0x8b3   :  { %4913 = vrsqrt.f32 %v1002_v58 }
 0x8b9   :  { %v4912_v4 = vpop.eup %4911 }
 0x8ba   :  { %v1005_v11 = vmul.f32 %v4912_v4, %v989_v0 }
 0x8bc   :  { %v1007_v13 = vmul.f32 %v3722_v6, %v1005_v11 }
 0x8bd   :  { %v4914_v12 = vpop.eup %4913 }
 0x8be   :  { %v1006_v15 = vmul.f32 %v4914_v12, %v990_v1  ;;  %v1009_v16 = vadd.f32 %v3723_v10, %v1007_v13 }
 0x8c0   :  { %v1008_v17 = vmul.f32 %v3722_v6, %v1006_v15  ;;  %1011 = vst.msk [vmem:[#allocation2] sm:$0xff] %vm101_vm1, %v1009_v16 }
 0x8c2   :  { %v1010_v27 = vadd.f32 %v3723_v10, %v1008_v17 }
 0x8c4   :  { %1025 = vrot.lane.b32.xlu1 %v1010_v27, %s5073_s14  ;;  %1012 = vst.msk [vmem:[#allocation2 + $0x8] sm:$0xff] %vm101_vm1, %v1010_v27  ;;  %1017 = vrot.lane.b32.xlu0 %v1010_v27, %s5071_s10 }
 0x8c7   :  { %v1039_v28 = vld [vmem:[#allocation2] sm:$0xff] }
 0x8c8   :  { %4229 = vmatprep.mubr.msk.f32.mxu1 %vm101_vm1, %v1039_v28  ;;  %1015 = vrot.lane.b32.xlu1 %v1009_v16, %s5071_s10 }
 0x8c9   :  { %1033 = vrot.lane.b32.xlu0 %v1010_v27, %s5072_s11 }
 0x8cb   :  { %v1040_v29 = vld [vmem:[#allocation2 + $0x8] sm:$0xff] }
 0x8cc   :  { %1023 = vrot.lane.b32.xlu1 %v1009_v16, %s5073_s14  ;;  %4230 = vmatmul.mubr.msk.f32.vlgmr.msra.gmra.mrb[18].mxu1 %vm101_vm1, %v1040_v29 }
 0x8cd   :  { %1201 = vrot.lane.b32.xlu0 %v5281_v41, %s5077_s24 }
 0x8d0   :  { %1031 = vrot.lane.b32.xlu1 %v1009_v16, %s5072_s11 }
 0x8d1   :  { %1205 = vrot.lane.b32.xlu0 %v5289_v47, %s5077_s24 }
 0x8d4   :  { %98 = vrot.lane.b32.xlu1 %v5443_v30, %s5071_s10 }
 0x8d5   :  { %1209 = vrot.lane.b32.xlu0 %v5301_v53, %s5077_s24 }
 0x8d8   :  { %1203 = vrot.lane.b32.xlu1 %v5276_v40, %s5077_s24 }
 0x8d9   :  { %1213 = vrot.lane.b32.xlu0 %v5314_v61, %s5077_s24 }
 0x8dc   :  { %1207 = vrot.lane.b32.xlu1 %v5295_v50, %s5077_s24 }
 0x8e0   :  { %1211 = vrot.lane.b32.xlu1 %v5308_v57, %s5077_s24 }
 0x8e4   :  { %1215 = vrot.lane.b32.xlu1 %v5322_v5, %s5077_s24 }
 0x936   :  { %v1026_v40 = vpop.permute.xlu1 %1025  ;;  %v1018_v41 = vpop.permute.xlu0 %1017 }
 0x937   :  { %1030 = vst.msk [vmem:[#allocation2 + $0x28] sm:$0xff] %vm101_vm1, %v1026_v40  ;;  %1022 = vst.msk [vmem:[#allocation2 + $0x18] sm:$0xff] %vm101_vm1, %v1018_v41 }
 0x93a   :  { %v1016_v50 = vpop.permute.xlu1 %1015 }
 0x93b   :  { %1021 = vst.msk [vmem:[#allocation2 + $0x10] sm:$0xff] %vm101_vm1, %v1016_v50  ;;  %v1034_v47 = vpop.permute.xlu0 %1033 }
 0x93c   :  { %1038 = vst.msk [vmem:[#allocation2 + $0x38] sm:$0xff] %vm101_vm1, %v1034_v47 }
 0x93e   :  { %v1024_v57 = vpop.permute.xlu1 %1023  ;;  %v1042_v61 = vld [vmem:[#allocation2 + $0x18] sm:$0xff]  ;;  %v1044_v37 = vld [vmem:[#allocation2 + $0x28] sm:$0xff] }
 0x93f   :  { %1029 = vst.msk [vmem:[#allocation2 + $0x20] sm:$0xff] %vm101_vm1, %v1024_v57  ;;  %v1202_v15 = vpop.permute.xlu0 %1201 }
 0x942   :  { %v1032_v53 = vpop.permute.xlu1 %1031  ;;  %v1041_v5 = vld [vmem:[#allocation2 + $0x10] sm:$0xff] }
 0x943   :  { %1037 = vst.msk [vmem:[#allocation2 + $0x30] sm:$0xff] %vm101_vm1, %v1032_v53  ;;  %4232 = vmatprep.mubr.msk.f32.mxu1 %vm101_vm1, %v1041_v5  ;;  %v1206_v50 = vpop.permute.xlu0 %1205 }
 0x944   :  { %4233 = vmatmul.mubr.msk.f32.gmra.mrb[20].mxu1 %vm101_vm1, %v1042_v61 }
 0x946   :  { %v99_v32 = vpop.permute.xlu1 %98  ;;  %v1043_v33 = vld [vmem:[#allocation2 + $0x20] sm:$0xff] }
 0x947   :  { %v193_v34 = vadd.f32 %v5240_v20, %v99_v32  ;;  %v198_v35 = vadd.f32 %v5238_v19, %v99_v32  ;;  %v203_v36 = vadd.f32 %v5244_v22, %v99_v32  ;;  %v208_v14 = vadd.f32 %v5242_v21, %v99_v32  ;;  %4235 = vmatprep.mubr.msk.f32.mxu1 %vm101_vm1, %v1043_v33  ;;  %v1046_v20 = vld [vmem:[#allocation2 + $0x38] sm:$0xff]  ;;  %v1210_v5 = vpop.permute.xlu0 %1209 }
 0x948   :  { %v213_v38 = vadd.f32 %v5248_v24, %v99_v32  ;;  %v218_v18 = vadd.f32 %v5246_v23, %v99_v32  ;;  %v223_v39 = vadd.f32 %v5252_v26, %v99_v32  ;;  %v228_v60 = vadd.f32 %v5250_v25, %v99_v32  ;;  %4236 = vmatmul.mubr.msk.f32.gmra.mrb[22].mxu1 %vm101_vm1, %v1044_v37 }
 0x949   :  { %232 = vst.msk [vmem:[#allocation4] sm:$0xff] %vm231_vm7, %v193_v34  ;;  %233 = vst.msk [vmem:[#allocation4 + $0x8] sm:$0xff] %vm231_vm7, %v198_v35 }
 0x94a   :  { %234 = vst.msk [vmem:[#allocation4 + $0x10] sm:$0xff] %vm231_vm7, %v203_v36  ;;  %235 = vst.msk [vmem:[#allocation4 + $0x18] sm:$0xff] %vm231_vm7, %v208_v14  ;;  %v1045_v19 = vld [vmem:[#allocation2 + $0x30] sm:$0xff]  ;;  %v1204_v12 = vpop.permute.xlu1 %1203 }
 0x94b   :  { %236 = vst.msk [vmem:[#allocation4 + $0x20] sm:$0xff] %vm231_vm7, %v213_v38  ;;  %237 = vst.msk [vmem:[#allocation4 + $0x28] sm:$0xff] %vm231_vm7, %v218_v18  ;;  %4238 = vmatprep.mubr.msk.f32.mxu1 %vm101_vm1, %v1045_v19 }
 0x94c   :  { %238 = vst.msk [vmem:[#allocation4 + $0x30] sm:$0xff] %vm231_vm7, %v223_v39  ;;  %239 = vst.msk [vmem:[#allocation4 + $0x38] sm:$0xff] %vm231_vm7, %v228_v60  ;;  %4239 = vmatmul.mubr.msk.f32.gmra.mrb[24].mxu1 %vm101_vm1, %v1046_v20  ;;  %v1214_v39 = vpop.permute.xlu0 %1213 }
 0x94e   :  { %v1208_v41 = vpop.permute.xlu1 %1207 }
 0x950   :  { %v1177_v21 = vld [vmem:[#allocation4] sm:$0xff]  ;;  %v1178_v22 = vld [vmem:[#allocation4 + $0x8] sm:$0xff] }
 0x951   :  { %v1179_v23 = vld [vmem:[#allocation4 + $0x10] sm:$0xff]  ;;  %v5491_v24 = vpack.c.bf16 %v1178_v22, %v1177_v21  ;;  %v1180_v25 = vld [vmem:[#allocation4 + $0x18] sm:$0xff]  ;;  %v5493_v42 = vpack.i.bf16 %v1178_v22, %v1177_v21 }
 0x952   :  { %v1181_v26 = vld [vmem:[#allocation4 + $0x20] sm:$0xff]  ;;  %v1182_v3 = vld [vmem:[#allocation4 + $0x28] sm:$0xff]  ;;  %v5495_v31 = vpack.i.bf16 %v1180_v25, %v1179_v23  ;;  %v5502_v51 = vpack.c.bf16 %v1180_v25, %v1179_v23 }
 0x953   :  { %v1183_v45 = vld [vmem:[#allocation4 + $0x30] sm:$0xff]  ;;  %v1184_v44 = vld [vmem:[#allocation4 + $0x38] sm:$0xff]  ;;  %v5497_v49 = vpack.i.bf16 %v1182_v3, %v1181_v26  ;;  %4564 = vmatprep.subr.msk.bf16.mxu0 %vm5222_vm2, %v5491_v24  ;;  %v5512_v54 = vpack.c.bf16 %v1182_v3, %v1181_v26 }
 0x954   :  { %v5504_v52 = vpack.i.bf16 %v1184_v44, %v1183_v45  ;;  %4567 = vmatpush3.bf16.xpose.msk.msra.mxu0 %vm5222_vm2, %v5491_v24  ;;  %v5520_v1 = vpack.c.bf16 %v1184_v44, %v1183_v45 }
 0x955   :  { %4570 = vmatprep.subr.msk.bf16.mxu0 %vm5222_vm2, %v5502_v51 }
 0x95c   :  { %4573 = vmatpush3.bf16.xpose.msk.msra.mxu0 %vm5222_vm2, %v5502_v51 }
 0x95d   :  { %4576 = vmatprep.subr.msk.bf16.mxu0 %vm5222_vm2, %v5512_v54 }
 0x964   :  { %4579 = vmatpush3.bf16.xpose.msk.msra.mxu0 %vm5222_vm2, %v5512_v54 }
 0x965   :  { %4582 = vmatprep.subr.msk.bf16.mxu0 %vm5222_vm2, %v5520_v1 }
 0x96c   :  { %4585 = vmatpush3.bf16.xpose.msk.msra.mxu0 %vm5222_vm2, %v5520_v1 }
 0x99f   :  { %v4231_v0 = vpop.f32.mrb[18].mxu1 }
 0x9a0   :  { %v1138_v55 = vpop.f32.mrb[19].mxu1  ;;  %v1144_v59 = vadd.f32 %v4231_v0, %v5443_v30 }
 0x9a1   :  { %v1139_v56 = vadd.f32 %v5443_v30, %v1138_v55 }
 0x9a3   :  { %4257 = vmatprep.mubr.msk.f32.mxu0 %vm101_vm1, %v1139_v56 }
 0x9a4   :  { %4258 = vmatmul.mubr.msk.f32.vlgmr.msra.gmra.mrb[16].mxu0 %vm101_vm1, %v1144_v59 }
 0xa17   :  { %v4234_v62 = vpop.f32.mrb[20].mxu1 }
 0xa18   :  { %v1148_v63 = vpop.f32.mrb[21].mxu1  ;;  %v1154_v43 = vadd.f32 %v4234_v62, %v5443_v30 }
 0xa19   :  { %v1149_v2 = vadd.f32 %v5443_v30, %v1148_v63 }
 0xa1b   :  { %v4237_v8 = vpop.f32.mrb[22].mxu1  ;;  %4260 = vmatprep.mubr.msk.f32.mxu0 %vm101_vm1, %v1149_v2 }
 0xa1c   :  { %v1158_v9 = vpop.f32.mrb[23].mxu1  ;;  %4261 = vmatmul.mubr.msk.f32.gmra.mrb[18].mxu0 %vm101_vm1, %v1154_v43  ;;  %v1164_v4 = vadd.f32 %v4237_v8, %v5443_v30 }
 0xa1d   :  { %v1159_v58 = vadd.f32 %v5443_v30, %v1158_v9 }
 0xa1f   :  { %v4240_v6 = vpop.f32.mrb[24].mxu1  ;;  %4263 = vmatprep.mubr.msk.f32.mxu0 %vm101_vm1, %v1159_v58 }
 0xa20   :  { %v1168_v11 = vpop.f32.mrb[25].mxu1  ;;  %4264 = vmatmul.mubr.msk.f32.gmra.mrb[20].mxu0 %vm101_vm1, %v1164_v4  ;;  %v1174_v13 = vadd.f32 %v4240_v6, %v5443_v30 }
 0xa21   :  { %v1169_v10 = vadd.f32 %v5443_v30, %v1168_v11  ;;  %v1212_v30 = vpop.permute.xlu1 %1211 }
 0xa23   :  { %4266 = vmatprep.mubr.msk.f32.mxu0 %vm101_vm1, %v1169_v10 }
 0xa24   :  { %4267 = vmatmul.mubr.msk.f32.gmra.mrb[22].mxu0 %vm101_vm1, %v1174_v13 }
 0xa25   :  { %v1216_v36 = vpop.permute.xlu1 %1215 }
 0xa77   :  { %v4259_v16 = vpop.f32.mrb[16].mxu0 }
 0xa78   :  { %v1345_v17 = vadd.f32 %v4259_v16, %v1204_v12  ;;  %v1339_v27 = vpop.f32.mrb[17].mxu0 }
 0xa79   :  { %v1340_v28 = vadd.f32 %v1339_v27, %v1202_v15 }
 0xa7a   :  { %v1381_v29 = vsel %vm613_vm3, %v1345_v17, -inf }
 0xa7b   :  { %1382 = vmax.xlane.f32.xlu1 %v1381_v29  ;;  %v1378_v40 = vsel %vm613_vm3, %v1340_v28, -inf }
 0xa7c   :  { %1379 = vmax.xlane.f32.xlu0 %v1378_v40 }
 0xaef   :  { %v4262_v47 = vpop.f32.mrb[18].mxu0 }
 0xaf0   :  { %v1355_v57 = vadd.f32 %v4262_v47, %v1208_v41  ;;  %v1349_v53 = vpop.f32.mrb[19].mxu0 }
 0xaf1   :  { %v1350_v61 = vadd.f32 %v1349_v53, %v1206_v50 }
 0xaf2   :  { %v1387_v32 = vsel %vm613_vm3, %v1355_v57, -inf }
 0xaf3   :  { %v4265_v33 = vpop.f32.mrb[20].mxu0  ;;  %1388 = vmax.xlane.f32.xlu0 %v1387_v32  ;;  %v1384_v38 = vsel %vm613_vm3, %v1350_v61, -inf }
 0xaf4   :  { %v1365_v34 = vadd.f32 %v4265_v33, %v1212_v30  ;;  %v1359_v35 = vpop.f32.mrb[21].mxu0 }
 0xaf5   :  { %v1360_v14 = vadd.f32 %v1359_v35, %v1210_v5 }
 0xaf6   :  { %v1393_v37 = vsel %vm613_vm3, %v1365_v34, -inf }
 0xaf7   :  { %1394 = vmax.xlane.f32.xlu1 %v1393_v37  ;;  %v4268_v18 = vpop.f32.mrb[22].mxu0  ;;  %1385 = vmax.xlane.f32.xlu0 %v1384_v38  ;;  %v1390_v22 = vsel %vm613_vm3, %v1360_v14, -inf }
 0xaf8   :  { %v1375_v60 = vadd.f32 %v4268_v18, %v1216_v36  ;;  %v1369_v19 = vpop.f32.mrb[23].mxu0 }
 0xaf9   :  { %v1370_v20 = vadd.f32 %v1369_v19, %v1214_v39 }
 0xafa   :  { %v1399_v21 = vsel %vm613_vm3, %v1375_v60, -inf }
 0xafb   :  { %1400 = vmax.xlane.f32.xlu1 %v1399_v21  ;;  %1391 = vmax.xlane.f32.xlu0 %v1390_v22  ;;  %v1396_v23 = vsel %vm613_vm3, %v1370_v20, -inf }
 0xaff   :  { %1397 = vmax.xlane.f32.xlu0 %v1396_v23 }
 0xb08   :  { %v1383_v25 = vpop.xlane.xlu1 %1382 }
 0xb09   :  { %v1403_v26 = vsub.f32 %v1345_v17, %v1383_v25  ;;  %v1380_v3 = vpop.xlane.xlu0 %1379 }
 0xb0a   :  { %v1402_v44 = vsub.f32 %v1340_v28, %v1380_v3 }
 0xb0b   :  { %v1412_v45 = vmul.f32 1.442695, %v1403_v26 }
 0xb0c   :  { %4801 = vrot.lane.b32.xlu1 %v5495_v31, %s5071_s10  ;;  %v1410_v0 = vmul.f32 1.442695, %v1402_v44 }
 0xb0d   :  { %4915 = vpow2.f32 %v1412_v45 }
 0xb0e   :  { %4917 = vpow2.f32 %v1410_v0 }
 0xb15   :  { %4796 = vrot.lane.b32.xlu0 %v5493_v42, %s5071_s10 }
 0xb17   :  { %v5559_v55 = vpop.eup %4915 }
 0xb18   :  { %v1429_v56 = vsel %vm613_vm3, %v5559_v55, 0.0  ;;  %v5563_v59 = vpop.eup %4917 }
 0xb19   :  { %v1426_v62 = vsel %vm613_vm3, %v5563_v59, 0.0 }
 0xb30   :  { %1430 = vadd.xlane.f32.xlu1 %v1429_v56 }
 0xb34   :  { %1427 = vadd.xlane.f32.xlu0 %v1426_v62 }
 0xb80   :  { %v1389_v63 = vpop.xlane.xlu0 %1388 }
 0xb81   :  { %v1405_v2 = vsub.f32 %v1355_v57, %v1389_v63 }
 0xb83   :  { %v1416_v43 = vmul.f32 1.442695, %v1405_v2 }
 0xb84   :  { %v1395_v8 = vpop.xlane.xlu1 %1394  ;;  %v1386_v9 = vpop.xlane.xlu0 %1385 }
 0xb85   :  { %4919 = vpow2.f32 %v1416_v43  ;;  %v1407_v58 = vsub.f32 %v1365_v34, %v1395_v8  ;;  %v1404_v4 = vsub.f32 %v1350_v61, %v1386_v9 }
 0xb87   :  { %v1420_v6 = vmul.f32 1.442695, %v1407_v58  ;;  %v1414_v11 = vmul.f32 1.442695, %v1404_v4 }
 0xb88   :  { %v1401_v10 = vpop.xlane.xlu1 %1400  ;;  %v1392_v13 = vpop.xlane.xlu0 %1391 }
 0xb89   :  { %4921 = vpow2.f32 %v1420_v6  ;;  %v1409_v12 = vsub.f32 %v1375_v60, %v1401_v10  ;;  %v1406_v15 = vsub.f32 %v1360_v14, %v1392_v13 }
 0xb8a   :  { %4923 = vpow2.f32 %v1414_v11 }
 0xb8b   :  { %v1424_v16 = vmul.f32 1.442695, %v1409_v12  ;;  %v1418_v17 = vmul.f32 1.442695, %v1406_v15 }
 0xb8c   :  { %v1398_v27 = vpop.xlane.xlu0 %1397  ;;  %v4802_v28 = vpop.permute.xlu1 %4801 }
 0xb8d   :  { %4925 = vpow2.f32 %v1424_v16  ;;  %v1408_v29 = vsub.f32 %v1370_v20, %v1398_v27  ;;  %v4804_v50 = vunpack.i.h.bf16 %v4802_v28  ;;  %v4803_v57 = vunpack.i.l.bf16 %v4802_v28 }
 0xb8e   :  { %4927 = vpow2.f32 %v1418_v17 }
 0xb8f   :  { %v5567_v40 = vpop.eup %4919  ;;  %v1422_v41 = vmul.f32 1.442695, %v1408_v29  ;;  %v4590_v36 = vpack.c.bf16 %v4804_v50, %v4803_v57  ;;  %v3808_v29 = vld [vmem:[%s6167_s4 + $0x20] sm:$0xff]  ;;  %v3811_v57 = vld [vmem:[%s6167_s4 + $0x38] sm:$0xff] }
 0xb90   :  { %v4797_v47 = vpop.permute.xlu0 %4796  ;;  %v1435_v30 = vsel %vm613_vm3, %v5567_v40, 0.0 }
 0xb91   :  { %4929 = vpow2.f32 %v1422_v41  ;;  %v4799_v53 = vunpack.i.h.bf16 %v4797_v47  ;;  %v4798_v5 = vunpack.i.l.bf16 %v4797_v47  ;;  %1436 = vadd.xlane.f32.xlu1 %v1435_v30  ;;  %v3810_v30 = vld [vmem:[%s6167_s4 + $0x30] sm:$0xff] }
 0xb93   :  { %v5571_v61 = vpop.eup %4921  ;;  %v4586_v32 = vpack.c.bf16 %v4799_v53, %v4798_v5  ;;  %v4606_v53 = vpack.c.bf16 %v3811_v57, %v3810_v30 }
 0xb94   :  { %v4924_v33 = vpop.eup %4923  ;;  %v1441_v34 = vsel %vm613_vm3, %v5571_v61, 0.0 }
 0xb95   :  { %1442 = vadd.xlane.f32.xlu1 %v1441_v34  ;;  %v1432_v35 = vsel %vm613_vm3, %v4924_v33, 0.0  ;;  %4587 = vmatprep.subr.bf16.mxu1 %v4586_v32 }
 0xb96   :  { %1433 = vadd.xlane.f32.xlu0 %v1432_v35  ;;  %4589 = vmatpush3.bf16.msra.mxu1 %v4586_v32 }
 0xb97   :  { %v5576_v14 = vpop.eup %4925  ;;  %4591 = vmatprep.subr.bf16.mxu1 %v4590_v36 }
 0xb98   :  { %v4928_v37 = vpop.eup %4927  ;;  %v1447_v38 = vsel %vm613_vm3, %v5576_v14, 0.0 }
 0xb99   :  { %1448 = vadd.xlane.f32.xlu1 %v1447_v38  ;;  %v1438_v18 = vsel %vm613_vm3, %v4928_v37, 0.0 }
 0xb9a   :  { %1439 = vadd.xlane.f32.xlu0 %v1438_v18  ;;  %4593 = vmatpush3.bf16.msra.mxu1 %v4590_v36 }
 0xb9b   :  { %v4930_v39 = vpop.eup %4929 }
 0xb9c   :  { %v1444_v60 = vsel %vm613_vm3, %v4930_v39, 0.0 }
 0xb9d   :  { %1445 = vadd.xlane.f32.xlu1 %v1444_v60 }
 0xbae   :  { %4811 = vrot.lane.b32.xlu1 %v5504_v52, %s5071_s10 }
 0xbb0   :  { %4806 = vrot.lane.b32.xlu0 %v5497_v49, %s5071_s10 }
 0xbbd   :  { %v1431_v22 = vpop.xlane.xlu1 %1430 }
 0xbc1   :  { %v1428_v19 = vpop.xlane.xlu0 %1427 }
 0xbc2   :  { %4931 = vrcp.f32 %v1428_v19 }
 0xbc3   :  { %4933 = vrcp.f32 %v1431_v22 }
 0xbcc   :  { %v4932_v20 = vpop.eup %4931 }
 0xbcd   :  { %v1458_v21 = vmul.f32 %v4932_v20, %v5563_v59  ;;  %v4934_v9 = vpop.eup %4933  ;;  %v3727_v20 = vld [vmem:[%s6169_s6 + $0x9] ss:$0 sm:$0xff] }
 0xbce   :  { %v1459_v4 = vmul.f32 %v4934_v9, %v5559_v55  ;;  %v1773_v9 = vld [vmem:[%s6168_s5] sm:$0xff] }
 0xbcf   :  { %4285 = vmatprep.mubr.msk.f32.mxu1 %vm613_vm3, %v1458_v21 }
 0xc1e   :  { %v1437_v23 = vpop.xlane.xlu1 %1436 }
 0xc22   :  { %v1443_v25 = vpop.xlane.xlu1 %1442 }
 0xc23   :  { %v1434_v26 = vpop.xlane.xlu0 %1433 }
 0xc24   :  { %4935 = vrcp.f32 %v1434_v26 }
 0xc25   :  { %4937 = vrcp.f32 %v1437_v23 }
 0xc26   :  { %v1449_v3 = vpop.xlane.xlu1 %1448 }
 0xc27   :  { %v1440_v45 = vpop.xlane.xlu0 %1439 }
 0xc28   :  { %4939 = vrcp.f32 %v1440_v45 }
 0xc29   :  { %4941 = vrcp.f32 %v1443_v25 }
 0xc2a   :  { %v1446_v44 = vpop.xlane.xlu1 %1445 }
 0xc2b   :  { %v4807_v0 = vpop.permute.xlu0 %4806  ;;  %4943 = vrcp.f32 %v1446_v44 }
 0xc2c   :  { %v4809_v56 = vunpack.i.h.bf16 %v4807_v0  ;;  %v4808_v62 = vunpack.i.l.bf16 %v4807_v0  ;;  %4945 = vrcp.f32 %v1449_v3 }
 0xc2e   :  { %v4812_v63 = vpop.permute.xlu1 %4811  ;;  %v4594_v2 = vpack.c.bf16 %v4809_v56, %v4808_v62  ;;  %v4936_v58 = vpop.eup %4935 }
 0xc2f   :  { %v4814_v43 = vunpack.i.h.bf16 %v4812_v63  ;;  %v4813_v59 = vunpack.i.l.bf16 %v4812_v63  ;;  %v4938_v6 = vpop.eup %4937  ;;  %v1460_v11 = vmul.f32 %v4936_v58, %v4924_v33  ;;  %v1774_v58 = vld [vmem:[%s6168_s5 + $0x8] sm:$0xff] }
 0xc30   :  { %4595 = vmatprep.subr.bf16.mxu1 %v4594_v2  ;;  %v1461_v13 = vmul.f32 %v4938_v6, %v5567_v40  ;;  %v3809_v40 = vld [vmem:[%s6167_s4 + $0x28] sm:$0xff]  ;;  %v1775_v6 = vld [vmem:[%s6168_s5 + $0x10] sm:$0xff] }
 0xc31   :  { %v4598_v8 = vpack.c.bf16 %v4814_v43, %v4813_v59  ;;  %4597 = vmatpush3.bf16.msra.mxu1 %v4594_v2  ;;  %v4602_v41 = vpack.c.bf16 %v3809_v40, %v3808_v29  ;;  %v3725_v40 = vld [vmem:[%s6169_s6 + $0x5] ss:$0 sm:$0xff] }
 0xc32   :  { %v4940_v10 = vpop.eup %4939 }
 0xc33   :  { %4599 = vmatprep.subr.bf16.mxu1 %v4598_v8  ;;  %v4942_v12 = vpop.eup %4941  ;;  %v1462_v15 = vmul.f32 %v4940_v10, %v4928_v37 }
 0xc34   :  { %v1463_v17 = vmul.f32 %v4942_v12, %v5571_v61 }
 0xc35   :  { %4601 = vmatpush3.bf16.msra.mxu1 %v4598_v8  ;;  %v4944_v16 = vpop.eup %4943 }
 0xc36   :  { %v4946_v27 = vpop.eup %4945  ;;  %v1464_v55 = vmul.f32 %v4944_v16, %v4930_v39  ;;  %4603 = vmatprep.subr.bf16.mxu1 %v4602_v41 }
 0xc37   :  { %v1465_v28 = vmul.f32 %v4946_v27, %v5576_v14 }
 0xc38   :  { %4286 = vmatmul.mubr.msk.f32.vlgmr.msra.gmra.mrb[26].mxu1 %vm613_vm3, %v1459_v4  ;;  %v4610_v4 = vpack.c.bf16 %v1774_v58, %v1773_v9 }
 0xc39   :  { %4288 = vmatprep.mubr.msk.f32.mxu1 %vm613_vm3, %v1460_v11  ;;  %4605 = vmatpush3.bf16.msra.mxu1 %v4602_v41  ;;  %v1776_v11 = vld [vmem:[%s6168_s5 + $0x18] sm:$0xff] }
 0xc3a   :  { %4607 = vmatprep.subr.bf16.mxu1 %v4606_v53  ;;  %v4614_v10 = vpack.c.bf16 %v1776_v11, %v1775_v6 }
 0xc3c   :  { %4289 = vmatmul.mubr.msk.f32.gmra.mrb[28].mxu1 %vm613_vm3, %v1461_v13 }
 0xc3d   :  { %4291 = vmatprep.mubr.msk.f32.mxu1 %vm613_vm3, %v1462_v15  ;;  %4609 = vmatpush3.bf16.msra.mxu1 %v4606_v53 }
 0xc3e   :  { %4611 = vmatprep.subr.bf16.mxu1 %v4610_v4 }
 0xc40   :  { %4292 = vmatmul.mubr.msk.f32.gmra.mrb[30].mxu1 %vm613_vm3, %v1463_v17 }
 0xc41   :  { %4294 = vmatprep.mubr.msk.f32.mxu1 %vm613_vm3, %v1464_v55 }
 0xc44   :  { %4295 = vmatmul.mubr.msk.f32.gmra.mrb[32].mxu1 %vm613_vm3, %v1465_v28  ;;  %v3724_v28 = vld [vmem:[%s6169_s6 + $0x4] ss:$0 sm:$0xff] }
 0xd0b   :  { %v4287_v50 = vpop.f32.mrb[26].mxu1 }
 0xd0c   :  { %1620 = vst.msk [vmem:[#allocation3 + $0x8] sm:$0xff] %vm101_vm1, %v4287_v50  ;;  %v1580_v47 = vpop.f32.mrb[27].mxu1 }
 0xd0d   :  { %1619 = vst.msk [vmem:[#allocation3] sm:$0xff] %vm101_vm1, %v1580_v47 }
 0xd0f   :  { %v4290_v5 = vpop.f32.mrb[28].mxu1 }
 0xd10   :  { %1625 = vrot.lane.b32.xlu1 %v4290_v5, %s5074_s12  ;;  %v1590_v61 = vpop.f32.mrb[29].mxu1  ;;  %v3816_v5 = vld [vmem:[%s6168_s5 + $0x20] sm:$0xff] }
 0xd11   :  { %1623 = vrot.lane.b32.xlu0 %v1590_v61, %s5074_s12  ;;  %v3817_v61 = vld [vmem:[%s6168_s5 + $0x28] sm:$0xff] }
 0xd13   :  { %v4293_v32 = vpop.f32.mrb[30].mxu1 }
 0xd14   :  { %1635 = vrot.lane.b32.xlu1 %v4293_v32, %s5075_s13  ;;  %v1600_v33 = vpop.f32.mrb[31].mxu1  ;;  %v4618_v32 = vpack.c.bf16 %v3817_v61, %v3816_v5 }
 0xd15   :  { %1633 = vrot.lane.b32.xlu0 %v1600_v33, %s5075_s13 }
 0xd16   :  { %4620 = vmatprep.subr.msk.bf16.mxu0 %vm5672_vm8, %v4618_v32 }
 0xd17   :  { %v4296_v34 = vpop.f32.mrb[32].mxu1  ;;  %4623 = vmatpush3.bf16.xpose.msk.msra.mxu0 %vm5672_vm8, %v4618_v32 }
 0xd18   :  { %1645 = vrot.lane.b32.xlu1 %v4296_v34, %s5076_s15  ;;  %v1610_v35 = vpop.f32.mrb[33].mxu1  ;;  %v3818_v34 = vld [vmem:[%s6168_s5 + $0x30] sm:$0xff] }
 0xd19   :  { %1643 = vrot.lane.b32.xlu0 %v1610_v35, %s5076_s15  ;;  %v3819_v35 = vld [vmem:[%s6168_s5 + $0x38] sm:$0xff] }
 0xd82   :  { %v1626_v36 = vpop.permute.xlu1 %1625 }
 0xd83   :  { %1630 = vst.msk [vmem:[#allocation3 + $0x8] sm:$0xff] %vm865_vm4, %v1626_v36  ;;  %v1624_v14 = vpop.permute.xlu0 %1623  ;;  %v4624_v36 = vpack.c.bf16 %v3819_v35, %v3818_v34 }
 0xd84   :  { %1629 = vst.msk [vmem:[#allocation3] sm:$0xff] %vm865_vm4, %v1624_v14  ;;  %v3728_v14 = vld [vmem:[%s6169_s6 + $0xa] ss:$0 sm:$0xff] }
 0xd85   :  { %4626 = vmatprep.subr.msk.bf16.mxu0 %vm5672_vm8, %v4624_v36 }
 0xd86   :  { %v1636_v37 = vpop.permute.xlu1 %1635  ;;  %4629 = vmatpush3.bf16.xpose.msk.msra.mxu0 %vm5672_vm8, %v4624_v36  ;;  %v5035_v36 = vld [vmem:[%s6169_s6] ss:$0 sm:$0xff] }
 0xd87   :  { %1640 = vst.msk [vmem:[#allocation3 + $0x8] sm:$0xff] %vm876_vm5, %v1636_v37  ;;  %v1634_v38 = vpop.permute.xlu0 %1633 }
 0xd88   :  { %1639 = vst.msk [vmem:[#allocation3] sm:$0xff] %vm876_vm5, %v1634_v38 }
 0xd8a   :  { %v1646_v18 = vpop.permute.xlu1 %1645 }
 0xd8b   :  { %1650 = vst.msk [vmem:[#allocation3 + $0x8] sm:$0xff] %vm887_vm6, %v1646_v18  ;;  %v1644_v39 = vpop.permute.xlu0 %1643 }
 0xd8c   :  { %1649 = vst.msk [vmem:[#allocation3] sm:$0xff] %vm887_vm6, %v1644_v39 }
 0xd92   :  { %v1652_v19 = vld [vmem:[#allocation3 + $0x8] sm:$0xff] }
 0xd93   :  { %v1651_v60 = vld [vmem:[#allocation3] sm:$0xff] }
 0xd94   :  { %4305 = vmatprep.mubr.msk.f32.mxu1 %vm242_vm0, %v1651_v60 }
 0xd95   :  { %4306 = vmatmul.mubr.msk.f32.vlgmr.msra.gmra.mrb[34].mxu1 %vm242_vm0, %v1652_v19 }
 0xd96   :  { %4613 = vmatpush3.bf16.msra.mxu1 %v4610_v4 }
 0xd97   :  { %4615 = vmatprep.subr.bf16.mxu1 %v4614_v10 }
 0xd9a   :  { %4617 = vmatpush3.bf16.msra.mxu1 %v4614_v10 }
 0xe68   :  { %v4307_v21 = vpop.f32.mrb[34].mxu1 }
 0xe69   :  { %v1740_v22 = vadd.f32 %v4307_v21, %v5412_v46  ;;  %v1730_v23 = vpop.f32.mrb[35].mxu1 }
 0xe6a   :  { %v1739_v25 = vadd.f32 %v1730_v23, %v5414_v48 }
 0xe6b   :  { %v5632_v26 = vadd.f32 %v3727_v20, %v1740_v22 }
 0xe6c   :  { %v5634_v3 = vadd.f32 %v3727_v20, %v1739_v25 }
 0xe6d   :  { %v1746_v45 = vsel %vm242_vm0, %v5632_v26, 0.0 }
 0xe6e   :  { %1747 = vadd.xlane.f32.xlu1 %v1746_v45  ;;  %v1743_v44 = vsel %vm242_vm0, %v5634_v3, 0.0 }
 0xe6f   :  { %1744 = vadd.xlane.f32.xlu0 %v1743_v44 }
 0xefb   :  { %v1748_v0 = vpop.xlane.xlu1 %1747 }
 0xefc   :  { %v1750_v56 = vmul.f32 0.03125, %v1748_v0  ;;  %v1745_v62 = vpop.xlane.xlu0 %1744 }
 0xefd   :  { %v1749_v63 = vmul.f32 0.03125, %v1745_v62 }
 0xefe   :  { %v1752_v46 = vsub.f32 %v5632_v26, %v1750_v56 }
 0xeff   :  { %v1751_v48 = vsub.f32 %v5634_v3, %v1749_v63 }
 0xf00   :  { %v1754_v59 = vmul.f32 %v1752_v46, %v1752_v46 }
 0xf01   :  { %v1753_v2 = vmul.f32 %v1751_v48, %v1751_v48 }
 0xf02   :  { %v1758_v8 = vsel %vm242_vm0, %v1754_v59, 0.0 }
 0xf03   :  { %v1755_v43 = vsel %vm242_vm0, %v1753_v2, 0.0 }
 0xf04   :  { %1756 = vadd.xlane.f32.xlu0 %v1755_v43 }
 0xf08   :  { %1759 = vadd.xlane.f32.xlu0 %v1758_v8  ;;  %v3729_v8 = vld [vmem:[%s6169_s6 + $0xb] ss:$0 sm:$0xff] }
 0xf91   :  { %v1757_v13 = vpop.xlane.xlu0 %1756 }
 0xf92   :  { %v1761_v12 = vmul.f32 0.03125, %v1757_v13 }
 0xf94   :  { %v1763_v15 = vadd.f32 1e-12, %v1761_v12 }
 0xf95   :  { %v1760_v16 = vpop.xlane.xlu0 %1759 }
 0xf96   :  { %4947 = vrsqrt.f32 %v1763_v15  ;;  %v1762_v17 = vmul.f32 0.03125, %v1760_v16 }
 0xf98   :  { %v1764_v27 = vadd.f32 1e-12, %v1762_v17 }
 0xf9a   :  { %4949 = vrsqrt.f32 %v1764_v27 }
 0xfa0   :  { %v4948_v55 = vpop.eup %4947 }
 0xfa1   :  { %v1767_v29 = vmul.f32 %v4948_v55, %v1751_v48 }
 0xfa3   :  { %v1769_v41 = vmul.f32 %v3724_v28, %v1767_v29 }
 0xfa4   :  { %v4950_v50 = vpop.eup %4949 }
 0xfa5   :  { %v1768_v47 = vmul.f32 %v4950_v50, %v1752_v46  ;;  %v1771_v30 = vadd.f32 %v3725_v40, %v1769_v41  ;;  %v2044_v41 = vld [vmem:[%s6166_s3] sm:$0xff] }
 0xfa6   :  { %4330 = vmatprep.subr.mxu1 %v2044_v41 }
 0xfa7   :  { %4316 = vmatprep.mubr.msk.f32.mxu1 %vm242_vm0, %v1771_v30  ;;  %v1770_v57 = vmul.f32 %v3724_v28, %v1768_v47 }
 0xfa9   :  { %v1772_v53 = vadd.f32 %v3725_v40, %v1770_v57 }
 0xfab   :  { %4317 = vmatmul.mubr.msk.f32.vlgmr.msra.gmra.mrb[36].mxu1 %vm242_vm0, %v1772_v53 }
 0xfac   :  { %4331 = vmatpush3.msra.mxu1 %v2044_v41 }
0x107e   :  { %v4318_v37 = vpop.f32.mrb[36].mxu1 }
0x107f   :  { %v1855_v38 = vadd.f32 %v4318_v37, %v3728_v14  ;;  %v1849_v18 = vpop.f32.mrb[37].mxu1 }
0x1080   :  { %v1850_v39 = vadd.f32 %v3728_v14, %v1849_v18 }
0x1081   :  { %v1861_v60 = vmul.f32 %v1855_v38, %v1855_v38  ;;  %v1859_v2 = vmul.f32 0.5, %v1855_v38 }
0x1082   :  { %v1860_v19 = vmul.f32 %v1850_v39, %v1850_v39  ;;  %v1858_v46 = vmul.f32 0.5, %v1850_v39 }
0x1083   :  { %v1863_v20 = vmul.f32 %v1861_v60, %v1855_v38 }
0x1084   :  { %v1862_v21 = vmul.f32 %v1860_v19, %v1850_v39 }
0x1085   :  { %v1865_v22 = vmul.f32 0.044715, %v1863_v20 }
0x1086   :  { %v1864_v23 = vmul.f32 0.044715, %v1862_v21 }
0x1087   :  { %v1867_v25 = vadd.f32 %v1865_v22, %v1855_v38  ;;  %v5036_v38 = vld [vmem:[%s6169_s6 + $0x1] ss:$0 sm:$0xff] }
0x1088   :  { %v1866_v45 = vadd.f32 %v1864_v23, %v1850_v39 }
0x1089   :  { %v1869_v44 = vmul.f32 0.7978846, %v1867_v25 }
0x108a   :  { %v1868_v0 = vmul.f32 0.7978846, %v1866_v45 }
0x108b   :  { %4951 = vtanh.f32 %v1869_v44 }
0x108c   :  { %4953 = vtanh.f32 %v1868_v0 }
0x1095   :  { %v4952_v56 = vpop.eup %4951 }
0x1096   :  { %v4954_v62 = vpop.eup %4953  ;;  %v1873_v63 = vadd.f32 1.0, %v4952_v56 }
0x1097   :  { %v1872_v48 = vadd.f32 1.0, %v4954_v62 }
0x1098   :  { %v1875_v59 = vmul.f32 %v1873_v63, %v1859_v2  ;;  %v5037_v2 = vld [vmem:[%s6169_s6 + $0x6] ss:$0 sm:$0xff] }
0x1099   :  { %v1874_v43 = vmul.f32 %v1872_v48, %v1858_v46 }
0x109b   :  { %4327 = vmatprep.mubr.msk.f32.mxu0 %vm613_vm3, %v1874_v43 }
0x109c   :  { %4328 = vmatmul.mubr.msk.f32.vlgmr.msra.gmra.mrb[24].mxu0 %vm613_vm3, %v1875_v59 }
0x116f   :  { %v4329_v9 = vpop.f32.mrb[24].mxu0 }
0x1170   :  { %v1975_v58 = vadd.f32 %v4329_v9, %v5632_v26  ;;  %v1965_v4 = vpop.f32.mrb[25].mxu0 }
0x1171   :  { %v1974_v6 = vadd.f32 %v1965_v4, %v5634_v3 }
0x1172   :  { %v5700_v11 = vadd.f32 %v3729_v8, %v1975_v58 }
0x1173   :  { %v5702_v10 = vadd.f32 %v3729_v8, %v1974_v6 }
0x1174   :  { %v1981_v13 = vsel %vm242_vm0, %v5700_v11, 0.0 }
0x1175   :  { %1982 = vadd.xlane.f32.xlu1 %v1981_v13  ;;  %v1978_v12 = vsel %vm242_vm0, %v5702_v10, 0.0 }
0x1176   :  { %1979 = vadd.xlane.f32.xlu0 %v1978_v12 }
0x1202   :  { %v1983_v15 = vpop.xlane.xlu1 %1982 }
0x1203   :  { %v1985_v16 = vmul.f32 0.03125, %v1983_v15  ;;  %v1980_v17 = vpop.xlane.xlu0 %1979 }
0x1204   :  { %v1984_v27 = vmul.f32 0.03125, %v1980_v17 }
0x1205   :  { %v1987_v26 = vsub.f32 %v5700_v11, %v1985_v16 }
0x1206   :  { %v1986_v3 = vsub.f32 %v5702_v10, %v1984_v27 }
0x1207   :  { %v1989_v55 = vmul.f32 %v1987_v26, %v1987_v26 }
0x1208   :  { %v1988_v28 = vmul.f32 %v1986_v3, %v1986_v3 }
0x1209   :  { %v1993_v29 = vsel %vm242_vm0, %v1989_v55, 0.0 }
0x120a   :  { %1994 = vadd.xlane.f32.xlu1 %v1993_v29  ;;  %v1990_v40 = vsel %vm242_vm0, %v1988_v28, 0.0 }
0x120b   :  { %1991 = vadd.xlane.f32.xlu0 %v1990_v40 }
0x1297   :  { %v1995_v50 = vpop.xlane.xlu1 %1994 }
0x1298   :  { %v1997_v47 = vmul.f32 0.03125, %v1995_v50  ;;  %v1992_v30 = vpop.xlane.xlu0 %1991 }
0x1299   :  { %v1996_v57 = vmul.f32 0.03125, %v1992_v30 }
0x129a   :  { %v1999_v53 = vadd.f32 1e-12, %v1997_v47 }
0x129b   :  { %v1998_v5 = vadd.f32 1e-12, %v1996_v57 }
0x129c   :  { %4955 = vrsqrt.f32 %v1999_v53 }
0x129d   :  { %4957 = vrsqrt.f32 %v1998_v5 }
0x12a6   :  { %v4956_v61 = vpop.eup %4955 }
0x12a7   :  { %v4958_v32 = vpop.eup %4957  ;;  %v2003_v34 = vmul.f32 %v4956_v61, %v1987_v26 }
0x12a8   :  { %v2002_v35 = vmul.f32 %v4958_v32, %v1986_v3 }
0x12a9   :  { %v2005_v14 = vmul.f32 %v5035_v36, %v2003_v34 }
0x12aa   :  { %v2004_v37 = vmul.f32 %v5035_v36, %v2002_v35 }
0x12ab   :  { %v2007_v18 = vadd.f32 %v5036_v38, %v2005_v14 }
0x12ac   :  { %v2006_v39 = vadd.f32 %v5036_v38, %v2004_v37 }
0x12ad   :  { %2014 = vrot.lane.b32.xlu1 %v2007_v18, %s5071_s10  ;;  %2009 = vst.msk [vmem:[#allocation2 + $0x8] sm:$0xff] %vm101_vm1, %v2007_v18 }
0x12ae   :  { %2012 = vrot.lane.b32.xlu0 %v2006_v39, %s5071_s10  ;;  %2008 = vst.msk [vmem:[#allocation2] sm:$0xff] %vm101_vm1, %v2006_v39 }
0x12b1   :  { %2020 = vrot.lane.b32.xlu1 %v2006_v39, %s5073_s14 }
0x12b2   :  { %2028 = vrot.lane.b32.xlu0 %v2006_v39, %s5072_s11 }
0x12b4   :  { %v2037_v19 = vld [vmem:[#allocation2 + $0x8] sm:$0xff] }
0x12b5   :  { %2022 = vrot.lane.b32.xlu1 %v2007_v18, %s5073_s14  ;;  %v2036_v60 = vld [vmem:[#allocation2] sm:$0xff] }
0x12b6   :  { %4332 = vmatprep.mubr.msk.f32.mxu1 %vm101_vm1, %v2036_v60 }
0x12b7   :  { %4333 = vmatmul.mubr.msk.f32.vlgmr.msra.gmra.mrb[38].mxu1 %vm101_vm1, %v2037_v19 }
0x12b9   :  { %2030 = vrot.lane.b32.xlu1 %v2007_v18, %s5072_s11 }
0x131f   :  { %v2015_v20 = vpop.permute.xlu1 %2014 }
0x1320   :  { %2019 = vst.msk [vmem:[#allocation2 + $0x18] sm:$0xff] %vm101_vm1, %v2015_v20  ;;  %v2013_v21 = vpop.permute.xlu0 %2012 }
0x1321   :  { %2018 = vst.msk [vmem:[#allocation2 + $0x10] sm:$0xff] %vm101_vm1, %v2013_v21 }
0x1323   :  { %v2021_v22 = vpop.permute.xlu1 %2020 }
0x1324   :  { %2026 = vst.msk [vmem:[#allocation2 + $0x20] sm:$0xff] %vm101_vm1, %v2021_v22  ;;  %v2029_v23 = vpop.permute.xlu0 %2028 }
0x1325   :  { %2034 = vst.msk [vmem:[#allocation2 + $0x30] sm:$0xff] %vm101_vm1, %v2029_v23 }
0x1327   :  { %v2023_v25 = vpop.permute.xlu1 %2022  ;;  %v2039_v44 = vld [vmem:[#allocation2 + $0x18] sm:$0xff] }
0x1328   :  { %2027 = vst.msk [vmem:[#allocation2 + $0x28] sm:$0xff] %vm101_vm1, %v2023_v25  ;;  %v2038_v45 = vld [vmem:[#allocation2 + $0x10] sm:$0xff] }
0x1329   :  { %4335 = vmatprep.mubr.msk.f32.mxu1 %vm101_vm1, %v2038_v45  ;;  %v5833_v25 = vld [vmem:[%s6165_s2 + $0x10] sm:$0xff]  ;;  %v5838_v45 = vld [vmem:[%s6165_s2 + $0x28] sm:$0xff] }
0x132a   :  { %4336 = vmatmul.mubr.msk.f32.gmra.mrb[40].mxu1 %vm101_vm1, %v2039_v44 }
0x132b   :  { %v2031_v0 = vpop.permute.xlu1 %2030  ;;  %v2040_v56 = vld [vmem:[#allocation2 + $0x20] sm:$0xff] }
0x132c   :  { %2035 = vst.msk [vmem:[#allocation2 + $0x38] sm:$0xff] %vm101_vm1, %v2031_v0  ;;  %4338 = vmatprep.mubr.msk.f32.mxu1 %vm101_vm1, %v2040_v56  ;;  %v2042_v63 = vld [vmem:[#allocation2 + $0x30] sm:$0xff] }
0x132f   :  { %v2041_v62 = vld [vmem:[#allocation2 + $0x28] sm:$0xff] }
0x1330   :  { %4339 = vmatmul.mubr.msk.f32.gmra.mrb[42].mxu1 %vm101_vm1, %v2041_v62 }
0x1331   :  { %4341 = vmatprep.mubr.msk.f32.mxu1 %vm101_vm1, %v2042_v63 }
0x1333   :  { %v2043_v46 = vld [vmem:[#allocation2 + $0x38] sm:$0xff] }
0x1334   :  { %4342 = vmatmul.mubr.msk.f32.gmra.mrb[44].mxu1 %vm101_vm1, %v2043_v46  ;;  %v5846_v46 = vld [vmem:[%s6165_s2 + $0x20] sm:$0xff] }
0x138a   :  { %v4334_v48 = vpop.f32.mrb[38].mxu1 }
0x138b   :  { %v2141_v43 = vadd.f32 %v5037_v2, %v4334_v48  ;;  %v2135_v59 = vpop.f32.mrb[39].mxu1  ;;  %v5851_v48 = vld [vmem:[%s6165_s2 + $0x38] sm:$0xff] }
0x138c   :  { %v2136_v8 = vadd.f32 %v5037_v2, %v2135_v59 }
0x138e   :  { %v5746_v9 = vpack.i.bf16 %v2141_v43, %v2136_v8  ;;  %4360 = vmatprep.mubr.msk.f32.mxu0 %vm101_vm1, %v2136_v8 }
0x1390   :  { %4816 = vrot.lane.b32.xlu0 %v5746_v9, %s5071_s10 }
0x13fd   :  { %v4337_v58 = vpop.f32.mrb[40].mxu1 }
0x13fe   :  { %v2151_v4 = vadd.f32 %v5037_v2, %v4337_v58  ;;  %v2145_v6 = vpop.f32.mrb[41].mxu1 }
0x13ff   :  { %v2146_v13 = vadd.f32 %v5037_v2, %v2145_v6  ;;  %v5860_v6 = vld [vmem:[%s6165_s2 + $0x30] sm:$0xff] }
0x1401   :  { %v5751_v12 = vpack.i.bf16 %v2151_v4, %v2146_v13 }
0x1402   :  { %v4817_v15 = vpop.permute.xlu0 %4816 }
0x1403   :  { %v4819_v16 = vunpack.i.h.bf16 %v4817_v15  ;;  %v4818_v17 = vunpack.i.l.bf16 %v4817_v15  ;;  %v4340_v27 = vpop.f32.mrb[42].mxu1  ;;  %4821 = vrot.lane.b32.xlu1 %v5751_v12, %s5071_s10 }
0x1404   :  { %v2161_v26 = vadd.f32 %v5037_v2, %v4340_v27  ;;  %v2155_v3 = vpop.f32.mrb[43].mxu1 }
0x1405   :  { %v4630_v55 = vpack.c.bf16 %v4819_v16, %v4818_v17  ;;  %v2156_v28 = vadd.f32 %v5037_v2, %v2155_v3 }
0x1407   :  { %v5755_v29 = vpack.i.bf16 %v2161_v26, %v2156_v28  ;;  %v4343_v40 = vpop.f32.mrb[44].mxu1  ;;  %4632 = vmatprep.subr.msk.bf16.mxu0 %vm5222_vm2, %v4630_v55 }
0x1408   :  { %v2171_v41 = vadd.f32 %v5037_v2, %v4343_v40  ;;  %v2165_v50 = vpop.f32.mrb[45].mxu1  ;;  %4635 = vmatpush3.bf16.xpose.msk.msra.mxu0 %vm5222_vm2, %v4630_v55 }
0x1409   :  { %v2166_v47 = vadd.f32 %v5037_v2, %v2165_v50  ;;  %4826 = vrot.lane.b32.xlu0 %v5755_v29, %s5071_s10 }
0x140b   :  { %v5763_v30 = vpack.i.bf16 %v2171_v41, %v2166_v47 }
0x140d   :  { %4831 = vrot.lane.b32.xlu1 %v5763_v30, %s5071_s10 }
0x1475   :  { %v4822_v57 = vpop.permute.xlu1 %4821 }
0x1476   :  { %v4824_v53 = vunpack.i.h.bf16 %v4822_v57  ;;  %v4823_v5 = vunpack.i.l.bf16 %v4822_v57 }
0x1478   :  { %v4636_v61 = vpack.c.bf16 %v4824_v53, %v4823_v5 }
0x147a   :  { %4638 = vmatprep.subr.msk.bf16.mxu0 %vm5222_vm2, %v4636_v61 }
0x147b   :  { %v4827_v32 = vpop.permute.xlu0 %4826  ;;  %4641 = vmatpush3.bf16.xpose.msk.msra.mxu0 %vm5222_vm2, %v4636_v61 }
0x147c   :  { %v4829_v34 = vunpack.i.h.bf16 %v4827_v32  ;;  %v4828_v35 = vunpack.i.l.bf16 %v4827_v32 }
0x147e   :  { %v4642_v36 = vpack.c.bf16 %v4829_v34, %v4828_v35 }
0x147f   :  { %v4832_v14 = vpop.permute.xlu1 %4831 }
0x1480   :  { %v4834_v37 = vunpack.i.h.bf16 %v4832_v14  ;;  %v4833_v38 = vunpack.i.l.bf16 %v4832_v14  ;;  %4644 = vmatprep.subr.msk.bf16.mxu0 %vm5222_vm2, %v4642_v36 }
0x1482   :  { %v4648_v18 = vpack.c.bf16 %v4834_v37, %v4833_v38 }
0x1483   :  { %4647 = vmatpush3.bf16.xpose.msk.msra.mxu0 %vm5222_vm2, %v4642_v36 }
0x1484   :  { %4650 = vmatprep.subr.msk.bf16.mxu0 %vm5222_vm2, %v4648_v18 }
0x148b   :  { %4653 = vmatpush3.bf16.xpose.msk.msra.mxu0 %vm5222_vm2, %v4648_v18 }
0x148c   :  { %4680 = vmatprep.subr.msk.bf16.mxu0 %vm5222_vm2, %v5491_v24 }
0x1492   :  { %4361 = vmatmul.mubr.msk.f32.vlgmr.msra.gmra.mrb[26].mxu0 %vm101_vm1, %v2141_v43 }
0x1493   :  { %4363 = vmatprep.mubr.msk.f32.mxu0 %vm101_vm1, %v2146_v13  ;;  %4683 = vmatpush3.bf16.xpose.msk.msra.mxu0 %vm5222_vm2, %v5491_v24  ;;  %v5813_v24 = vld [vmem:[%s6165_s2 + $0x8] sm:$0xff] }
0x1494   :  { %4686 = vmatprep.subr.msk.bf16.mxu0 %vm5222_vm2, %v5502_v51 }
0x1496   :  { %4364 = vmatmul.mubr.msk.f32.gmra.mrb[28].mxu0 %vm101_vm1, %v2151_v4 }
0x1497   :  { %4366 = vmatprep.mubr.msk.f32.mxu0 %vm101_vm1, %v2156_v28 }
0x149a   :  { %4367 = vmatmul.mubr.msk.f32.gmra.mrb[30].mxu0 %vm101_vm1, %v2161_v26 }
0x149b   :  { %4369 = vmatprep.mubr.msk.f32.mxu0 %vm101_vm1, %v2166_v47  ;;  %4689 = vmatpush3.bf16.xpose.msk.msra.mxu0 %vm5222_vm2, %v5502_v51  ;;  %v5818_v51 = vld [vmem:[%s6165_s2] sm:$0xff] }
0x149c   :  { %4692 = vmatprep.subr.msk.bf16.mxu0 %vm5222_vm2, %v5512_v54 }
0x149e   :  { %4370 = vmatmul.mubr.msk.f32.gmra.mrb[32].mxu0 %vm101_vm1, %v2171_v41 }
0x14a3   :  { %4695 = vmatpush3.bf16.xpose.msk.msra.mxu0 %vm5222_vm2, %v5512_v54 }
0x14a4   :  { %4698 = vmatprep.subr.msk.bf16.mxu0 %vm5222_vm2, %v5520_v1 }
0x14ab   :  { %4701 = vmatpush3.bf16.xpose.msk.msra.mxu0 %vm5222_vm2, %v5520_v1 }
0x1565   :  { %v4362_v39 = vpop.f32.mrb[26].mxu0 }
0x1566   :  { %v2310_v54 = vadd.f32 %v4362_v39, %v5813_v24  ;;  %v2304_v60 = vpop.f32.mrb[27].mxu0 }
0x1567   :  { %v2305_v19 = vadd.f32 %v2304_v60, %v5818_v51 }
0x1568   :  { %v2346_v1 = vsel %vm613_vm3, %v2310_v54, -inf }
0x1569   :  { %2347 = vmax.xlane.f32.xlu1 %v2346_v1  ;;  %v4365_v20 = vpop.f32.mrb[28].mxu0  ;;  %v2343_v21 = vsel %vm613_vm3, %v2305_v19, -inf }
0x156a   :  { %v2320_v22 = vadd.f32 %v4365_v20, %v5825_v7  ;;  %v2314_v23 = vpop.f32.mrb[29].mxu0  ;;  %2344 = vmax.xlane.f32.xlu0 %v2343_v21 }
0x156b   :  { %v2315_v0 = vadd.f32 %v2314_v23, %v5833_v25 }
0x156c   :  { %v2352_v44 = vsel %vm613_vm3, %v2320_v22, -inf }
0x156d   :  { %v4368_v56 = vpop.f32.mrb[30].mxu0  ;;  %v2349_v8 = vsel %vm613_vm3, %v2315_v0, -inf }
0x156e   :  { %v2330_v62 = vadd.f32 %v4368_v56, %v5838_v45  ;;  %v2324_v63 = vpop.f32.mrb[31].mxu0  ;;  %2353 = vmax.xlane.f32.xlu0 %v2352_v44 }
0x156f   :  { %v2325_v43 = vadd.f32 %v2324_v63, %v5846_v46 }
0x1570   :  { %v2358_v2 = vsel %vm613_vm3, %v2330_v62, -inf }
0x1571   :  { %2359 = vmax.xlane.f32.xlu1 %v2358_v2  ;;  %v4371_v59 = vpop.f32.mrb[32].mxu0  ;;  %v2355_v16 = vsel %vm613_vm3, %v2325_v43, -inf }
0x1572   :  { %v2340_v58 = vadd.f32 %v4371_v59, %v5851_v48  ;;  %v2334_v4 = vpop.f32.mrb[33].mxu0  ;;  %2350 = vmax.xlane.f32.xlu0 %v2349_v8 }
0x1573   :  { %v2335_v15 = vadd.f32 %v2334_v4, %v5860_v6 }
0x1574   :  { %v2364_v13 = vsel %vm613_vm3, %v2340_v58, -inf }
0x1575   :  { %2365 = vmax.xlane.f32.xlu1 %v2364_v13  ;;  %v2361_v17 = vsel %vm613_vm3, %v2335_v15, -inf }
0x1576   :  { %2356 = vmax.xlane.f32.xlu0 %v2355_v16 }
0x157a   :  { %2362 = vmax.xlane.f32.xlu0 %v2361_v17 }
0x1586   :  { %4841 = vrot.lane.b32.xlu1 %v5751_v12, %s5073_s14 }
0x1590   :  { %4836 = vrot.lane.b32.xlu0 %v5746_v9, %s5073_s14 }
0x15f6   :  { %v2348_v27 = vpop.xlane.xlu1 %2347 }
0x15f7   :  { %v2368_v26 = vsub.f32 %v2310_v54, %v2348_v27  ;;  %v2345_v3 = vpop.xlane.xlu0 %2344 }
0x15f8   :  { %v2367_v55 = vsub.f32 %v2305_v19, %v2345_v3 }
0x15f9   :  { %v2377_v28 = vmul.f32 1.442695, %v2368_v26 }
0x15fa   :  { %v2375_v40 = vmul.f32 1.442695, %v2367_v55 }
0x15fb   :  { %4959 = vpow2.f32 %v2377_v28  ;;  %v2354_v41 = vpop.xlane.xlu0 %2353 }
0x15fc   :  { %4961 = vpow2.f32 %v2375_v40  ;;  %v2370_v50 = vsub.f32 %v2320_v22, %v2354_v41 }
0x15fe   :  { %v2381_v47 = vmul.f32 1.442695, %v2370_v50  ;;  %v2360_v57 = vpop.xlane.xlu1 %2359 }
0x15ff   :  { %v2372_v53 = vsub.f32 %v2330_v62, %v2360_v57  ;;  %v2351_v5 = vpop.xlane.xlu0 %2350 }
0x1600   :  { %4963 = vpow2.f32 %v2381_v47  ;;  %v2369_v61 = vsub.f32 %v2315_v0, %v2351_v5 }
0x1601   :  { %v2385_v12 = vmul.f32 1.442695, %v2372_v53 }
0x1602   :  { %v2379_v32 = vmul.f32 1.442695, %v2369_v61  ;;  %v2366_v34 = vpop.xlane.xlu1 %2365 }
0x1603   :  { %4965 = vpow2.f32 %v2385_v12  ;;  %v2374_v9 = vsub.f32 %v2340_v58, %v2366_v34  ;;  %v2357_v35 = vpop.xlane.xlu0 %2356 }
0x1604   :  { %4967 = vpow2.f32 %v2379_v32  ;;  %v2371_v36 = vsub.f32 %v2325_v43, %v2357_v35 }
0x1605   :  { %v5870_v14 = vpop.eup %4959  ;;  %v2389_v37 = vmul.f32 1.442695, %v2374_v9 }
0x1606   :  { %v4962_v38 = vpop.eup %4961  ;;  %v2383_v18 = vmul.f32 1.442695, %v2371_v36  ;;  %v2394_v39 = vsel %vm613_vm3, %v5870_v14, 0.0  ;;  %v4842_v20 = vpop.permute.xlu1 %4841 }
0x1607   :  { %4969 = vpow2.f32 %v2389_v37  ;;  %2395 = vadd.xlane.f32.xlu1 %v2394_v39  ;;  %v2363_v54 = vpop.xlane.xlu0 %2362  ;;  %v2391_v60 = vsel %vm613_vm3, %v4962_v38, 0.0  ;;  %v4844_v62 = vunpack.i.h.bf16 %v4842_v20  ;;  %v4843_v63 = vunpack.i.l.bf16 %v4842_v20 }
0x1608   :  { %4971 = vpow2.f32 %v2383_v18  ;;  %v2373_v19 = vsub.f32 %v2335_v15, %v2363_v54  ;;  %2392 = vadd.xlane.f32.xlu0 %v2391_v60 }
0x1609   :  { %v4658_v4 = vpack.c.bf16 %v4844_v62, %v4843_v63  ;;  %v2620_v63 = vld [vmem:[%s6167_s4 + $0x10] sm:$0xff] }
0x160a   :  { %v5875_v1 = vpop.eup %4963  ;;  %v2387_v21 = vmul.f32 1.442695, %v2373_v19 }
0x160b   :  { %v4837_v22 = vpop.permute.xlu0 %4836  ;;  %v2400_v23 = vsel %vm613_vm3, %v5875_v1, 0.0 }
0x160c   :  { %4973 = vpow2.f32 %v2387_v21  ;;  %v4839_v44 = vunpack.i.h.bf16 %v4837_v22  ;;  %v4838_v0 = vunpack.i.l.bf16 %v4837_v22  ;;  %2401 = vadd.xlane.f32.xlu1 %v2400_v23 }
0x160d   :  { %v5879_v56 = vpop.eup %4965 }
0x160e   :  { %v4968_v2 = vpop.eup %4967  ;;  %v4654_v43 = vpack.c.bf16 %v4839_v44, %v4838_v0  ;;  %v2406_v59 = vsel %vm613_vm3, %v5879_v56, 0.0  ;;  %v2619_v44 = vld [vmem:[%s6167_s4 + $0x8] sm:$0xff] }
0x160f   :  { %v2397_v8 = vsel %vm613_vm3, %v4968_v2, 0.0 }
0x1610   :  { %2407 = vadd.xlane.f32.xlu1 %v2406_v59  ;;  %2398 = vadd.xlane.f32.xlu0 %v2397_v8 }
0x1611   :  { %v5884_v58 = vpop.eup %4969  ;;  %4655 = vmatprep.subr.bf16.mxu1 %v4654_v43 }
0x1612   :  { %v4972_v13 = vpop.eup %4971  ;;  %4657 = vmatpush3.bf16.msra.mxu1 %v4654_v43  ;;  %v2412_v15 = vsel %vm613_vm3, %v5884_v58, 0.0 }
0x1613   :  { %4659 = vmatprep.subr.bf16.mxu1 %v4658_v4  ;;  %v2403_v16 = vsel %vm613_vm3, %v4972_v13, 0.0 }
0x1614   :  { %2413 = vadd.xlane.f32.xlu1 %v2412_v15  ;;  %2404 = vadd.xlane.f32.xlu0 %v2403_v16 }
0x1616   :  { %v4974_v17 = vpop.eup %4973  ;;  %4661 = vmatpush3.bf16.msra.mxu1 %v4658_v4 }
0x1617   :  { %v2409_v27 = vsel %vm613_vm3, %v4974_v17, 0.0 }
0x1618   :  { %2410 = vadd.xlane.f32.xlu1 %v2409_v27 }
0x1629   :  { %4851 = vrot.lane.b32.xlu1 %v5763_v30, %s5073_s14 }
0x162a   :  { %4846 = vrot.lane.b32.xlu0 %v5755_v29, %s5073_s14 }
0x1694   :  { %v2396_v26 = vpop.xlane.xlu1 %2395 }
0x1695   :  { %v2393_v3 = vpop.xlane.xlu0 %2392 }
0x1696   :  { %4975 = vrcp.f32 %v2393_v3 }
0x1697   :  { %4977 = vrcp.f32 %v2396_v26 }
0x1699   :  { %v2402_v55 = vpop.xlane.xlu1 %2401 }
0x169d   :  { %v2408_v28 = vpop.xlane.xlu1 %2407  ;;  %v2399_v40 = vpop.xlane.xlu0 %2398 }
0x169e   :  { %4979 = vrcp.f32 %v2399_v40 }
0x169f   :  { %4981 = vrcp.f32 %v2402_v55 }
0x16a0   :  { %v4976_v41 = vpop.eup %4975 }
0x16a1   :  { %v2414_v50 = vpop.xlane.xlu1 %2413  ;;  %v2405_v47 = vpop.xlane.xlu0 %2404  ;;  %v2423_v57 = vmul.f32 %v4976_v41, %v4962_v38 }
0x16a2   :  { %4983 = vrcp.f32 %v2405_v47  ;;  %v4978_v35 = vpop.eup %4977 }
0x16a3   :  { %4388 = vmatprep.mubr.msk.f32.mxu1 %vm613_vm3, %v2423_v57  ;;  %4985 = vrcp.f32 %v2408_v28  ;;  %v2424_v37 = vmul.f32 %v4978_v35, %v5870_v14 }
0x16a5   :  { %v2411_v53 = vpop.xlane.xlu1 %2410  ;;  %v4847_v5 = vpop.permute.xlu0 %4846 }
0x16a6   :  { %v4849_v30 = vunpack.i.h.bf16 %v4847_v5  ;;  %v4848_v61 = vunpack.i.l.bf16 %v4847_v5  ;;  %4987 = vrcp.f32 %v2411_v53  ;;  %v5038_v53 = vld [vmem:[%s6169_s6 + $0x8] ss:$0 sm:$0xff] }
0x16a7   :  { %4989 = vrcp.f32 %v2414_v50 }
0x16a8   :  { %v4662_v29 = vpack.c.bf16 %v4849_v30, %v4848_v61  ;;  %v4980_v36 = vpop.eup %4979 }
0x16a9   :  { %v4852_v12 = vpop.permute.xlu1 %4851  ;;  %v4982_v38 = vpop.eup %4981  ;;  %v2425_v18 = vmul.f32 %v4980_v36, %v4968_v2  ;;  %v2621_v2 = vld [vmem:[%s6167_s4 + $0x18] sm:$0xff] }
0x16aa   :  { %v4854_v32 = vunpack.i.h.bf16 %v4852_v12  ;;  %v4853_v34 = vunpack.i.l.bf16 %v4852_v12  ;;  %4663 = vmatprep.subr.bf16.mxu1 %v4662_v29  ;;  %v2426_v54 = vmul.f32 %v4982_v38, %v5875_v1  ;;  %v2618_v1 = vld [vmem:[%s6167_s4] sm:$0xff]  ;;  %v4674_v43 = vpack.c.bf16 %v2621_v2, %v2620_v63 }
0x16ab   :  { %4665 = vmatpush3.bf16.msra.mxu1 %v4662_v29  ;;  %v4670_v0 = vpack.c.bf16 %v2619_v44, %v2618_v1 }
0x16ac   :  { %v4666_v9 = vpack.c.bf16 %v4854_v32, %v4853_v34  ;;  %v4984_v39 = vpop.eup %4983 }
0x16ad   :  { %v4986_v60 = vpop.eup %4985  ;;  %v2427_v19 = vmul.f32 %v4984_v39, %v4972_v13 }
0x16ae   :  { %4667 = vmatprep.subr.bf16.mxu1 %v4666_v9  ;;  %v2428_v21 = vmul.f32 %v4986_v60, %v5879_v56 }
0x16af   :  { %4669 = vmatpush3.bf16.msra.mxu1 %v4666_v9 }
0x16b0   :  { %v4988_v20 = vpop.eup %4987  ;;  %4671 = vmatprep.subr.bf16.mxu1 %v4670_v0 }
0x16b1   :  { %v4990_v22 = vpop.eup %4989  ;;  %v2429_v14 = vmul.f32 %v4988_v20, %v4974_v17 }
0x16b2   :  { %4389 = vmatmul.mubr.msk.f32.vlgmr.msra.gmra.mrb[46].mxu1 %vm613_vm3, %v2424_v37  ;;  %v2430_v23 = vmul.f32 %v4990_v22, %v5884_v58 }
0x16b3   :  { %4391 = vmatprep.mubr.msk.f32.mxu1 %vm613_vm3, %v2425_v18  ;;  %4673 = vmatpush3.bf16.msra.mxu1 %v4670_v0  ;;  %v3860_v18 = vld [vmem:[%s6166_s3 + $0x8] sm:$0xff]  ;;  %v5040_v0 = vld [vmem:[%s6169_s6 + $0x3] ss:$0 sm:$0xff] }
0x16b4   :  { %4675 = vmatprep.subr.bf16.mxu1 %v4674_v43 }
0x16b6   :  { %4392 = vmatmul.mubr.msk.f32.gmra.mrb[48].mxu1 %vm613_vm3, %v2426_v54 }
0x16b7   :  { %4394 = vmatprep.mubr.msk.f32.mxu1 %vm613_vm3, %v2427_v19  ;;  %4677 = vmatpush3.bf16.msra.mxu1 %v4674_v43 }
0x16b8   :  { %4411 = vmatprep.subr.mxu1 %v3860_v18 }
0x16ba   :  { %4395 = vmatmul.mubr.msk.f32.gmra.mrb[50].mxu1 %vm613_vm3, %v2428_v21 }
0x16bb   :  { %4397 = vmatprep.mubr.msk.f32.mxu1 %vm613_vm3, %v2429_v14 }
0x16be   :  { %4398 = vmatmul.mubr.msk.f32.gmra.mrb[52].mxu1 %vm613_vm3, %v2430_v23  ;;  %v5039_v23 = vld [vmem:[%s6169_s6 + $0x2] ss:$0 sm:$0xff] }
0x1785   :  { %v4390_v56 = vpop.f32.mrb[46].mxu1 }
0x1786   :  { %2585 = vst.msk [vmem:[#allocation3 + $0x8] sm:$0xff] %vm101_vm1, %v4390_v56  ;;  %v2545_v62 = vpop.f32.mrb[47].mxu1 }
0x1787   :  { %2584 = vst.msk [vmem:[#allocation3] sm:$0xff] %vm101_vm1, %v2545_v62 }
0x1789   :  { %v4393_v59 = vpop.f32.mrb[48].mxu1 }
0x178a   :  { %2590 = vrot.lane.b32.xlu1 %v4393_v59, %s5074_s12  ;;  %v2555_v8 = vpop.f32.mrb[49].mxu1 }
0x178b   :  { %2588 = vrot.lane.b32.xlu0 %v2555_v8, %s5074_s12 }
0x178d   :  { %v4396_v58 = vpop.f32.mrb[50].mxu1 }
0x178e   :  { %2600 = vrot.lane.b32.xlu1 %v4396_v58, %s5075_s13  ;;  %v2565_v4 = vpop.f32.mrb[51].mxu1 }
0x178f   :  { %2598 = vrot.lane.b32.xlu0 %v2565_v4, %s5075_s13 }
0x1791   :  { %v4399_v13 = vpop.f32.mrb[52].mxu1 }
0x1792   :  { %2610 = vrot.lane.b32.xlu1 %v4399_v13, %s5076_s15  ;;  %v2575_v15 = vpop.f32.mrb[53].mxu1 }
0x1793   :  { %2608 = vrot.lane.b32.xlu0 %v2575_v15, %s5076_s15 }
0x17fc   :  { %v2591_v16 = vpop.permute.xlu1 %2590 }
0x17fd   :  { %2595 = vst.msk [vmem:[#allocation3 + $0x8] sm:$0xff] %vm865_vm4, %v2591_v16  ;;  %v2589_v17 = vpop.permute.xlu0 %2588 }
0x17fe   :  { %2594 = vst.msk [vmem:[#allocation3] sm:$0xff] %vm865_vm4, %v2589_v17  ;;  %v5041_v17 = vld [vmem:[%s6169_s6 + $0x7] ss:$0 sm:$0xff] }
0x1800   :  { %v2601_v27 = vpop.permute.xlu1 %2600 }
0x1801   :  { %2605 = vst.msk [vmem:[#allocation3 + $0x8] sm:$0xff] %vm876_vm5, %v2601_v27  ;;  %v2599_v26 = vpop.permute.xlu0 %2598 }
0x1802   :  { %2604 = vst.msk [vmem:[#allocation3] sm:$0xff] %vm876_vm5, %v2599_v26 }
0x1804   :  { %v2611_v3 = vpop.permute.xlu1 %2610 }
0x1805   :  { %2615 = vst.msk [vmem:[#allocation3 + $0x8] sm:$0xff] %vm887_vm6, %v2611_v3  ;;  %v2609_v55 = vpop.permute.xlu0 %2608 }
0x1806   :  { %2614 = vst.msk [vmem:[#allocation3] sm:$0xff] %vm887_vm6, %v2609_v55 }
0x180c   :  { %v2617_v40 = vld [vmem:[#allocation3 + $0x8] sm:$0xff] }
0x180d   :  { %v2616_v28 = vld [vmem:[#allocation3] sm:$0xff] }
0x180e   :  { %4408 = vmatprep.mubr.msk.f32.mxu1 %vm242_vm0, %v2616_v28 }
0x180f   :  { %4409 = vmatmul.mubr.msk.f32.vlgmr.msra.gmra.mrb[54].mxu1 %vm242_vm0, %v2617_v40 }
0x1810   :  { %4412 = vmatpush3.msra.mxu1 %v3860_v18 }
0x18e2   :  { %v4410_v41 = vpop.f32.mrb[54].mxu1 }
0x18e3   :  { %v2704_v50 = vadd.f32 %v4410_v41, %v5700_v11  ;;  %v2694_v47 = vpop.f32.mrb[55].mxu1 }
0x18e4   :  { %v2703_v57 = vadd.f32 %v2694_v47, %v5702_v10 }
0x18e5   :  { %v5939_v5 = vadd.f32 %v5038_v53, %v2704_v50 }
0x18e6   :  { %v5941_v30 = vadd.f32 %v5038_v53, %v2703_v57 }
0x18e7   :  { %v2710_v61 = vsel %vm242_vm0, %v5939_v5, 0.0 }
0x18e8   :  { %2711 = vadd.xlane.f32.xlu1 %v2710_v61  ;;  %v2707_v29 = vsel %vm242_vm0, %v5941_v30, 0.0 }
0x18e9   :  { %2708 = vadd.xlane.f32.xlu0 %v2707_v29 }
0x1975   :  { %v2712_v11 = vpop.xlane.xlu1 %2711 }
0x1976   :  { %v2714_v12 = vmul.f32 0.03125, %v2712_v11  ;;  %v2709_v32 = vpop.xlane.xlu0 %2708 }
0x1977   :  { %v2713_v10 = vmul.f32 0.03125, %v2709_v32 }
0x1978   :  { %v2716_v34 = vsub.f32 %v5939_v5, %v2714_v12 }
0x1979   :  { %v2715_v9 = vsub.f32 %v5941_v30, %v2713_v10 }
0x197a   :  { %v2718_v37 = vmul.f32 %v2716_v34, %v2716_v34 }
0x197b   :  { %v2717_v35 = vmul.f32 %v2715_v9, %v2715_v9 }
0x197c   :  { %v2722_v38 = vsel %vm242_vm0, %v2718_v37, 0.0 }
0x197d   :  { %v2719_v36 = vsel %vm242_vm0, %v2717_v35, 0.0 }
0x197e   :  { %2720 = vadd.xlane.f32.xlu0 %v2719_v36 }
0x1982   :  { %2723 = vadd.xlane.f32.xlu0 %v2722_v38 }
0x1a0b   :  { %v2721_v39 = vpop.xlane.xlu0 %2720 }
0x1a0c   :  { %v2725_v54 = vmul.f32 0.03125, %v2721_v39 }
0x1a0e   :  { %v2727_v60 = vadd.f32 1e-12, %v2725_v54 }
0x1a0f   :  { %v2724_v19 = vpop.xlane.xlu0 %2723 }
0x1a10   :  { %4991 = vrsqrt.f32 %v2727_v60  ;;  %v2726_v20 = vmul.f32 0.03125, %v2724_v19 }
0x1a12   :  { %v2728_v21 = vadd.f32 1e-12, %v2726_v20 }
0x1a14   :  { %4993 = vrsqrt.f32 %v2728_v21 }
0x1a1a   :  { %v4992_v22 = vpop.eup %4991 }
0x1a1b   :  { %v2731_v14 = vmul.f32 %v4992_v22, %v2715_v9 }
0x1a1d   :  { %v2733_v1 = vmul.f32 %v5039_v23, %v2731_v14 }
0x1a1e   :  { %v4994_v44 = vpop.eup %4993 }
0x1a1f   :  { %v2735_v56 = vadd.f32 %v5040_v0, %v2733_v1  ;;  %v2732_v62 = vmul.f32 %v4994_v44, %v2716_v34 }
0x1a21   :  { %2741 = vrot.lane.b32.xlu0 %v2735_v56, %s5071_s10  ;;  %2737 = vst.msk [vmem:[#allocation2] sm:$0xff] %vm101_vm1, %v2735_v56  ;;  %v2734_v63 = vmul.f32 %v5039_v23, %v2732_v62 }
0x1a23   :  { %v2736_v2 = vadd.f32 %v5040_v0, %v2734_v63 }
0x1a25   :  { %2757 = vrot.lane.b32.xlu0 %v2735_v56, %s5072_s11  ;;  %2743 = vrot.lane.b32.xlu1 %v2736_v2, %s5071_s10  ;;  %2738 = vst.msk [vmem:[#allocation2 + $0x8] sm:$0xff] %vm101_vm1, %v2736_v2 }
0x1a28   :  { %v2765_v43 = vld [vmem:[#allocation2] sm:$0xff] }
0x1a29   :  { %4413 = vmatprep.mubr.msk.f32.mxu1 %vm101_vm1, %v2765_v43  ;;  %2749 = vrot.lane.b32.xlu1 %v2735_v56, %s5073_s14 }
0x1a2a   :  { %2927 = vrot.lane.b32.xlu0 %v5818_v51, %s5077_s24 }
0x1a2c   :  { %v2766_v59 = vld [vmem:[#allocation2 + $0x8] sm:$0xff] }
0x1a2d   :  { %2751 = vrot.lane.b32.xlu1 %v2736_v2, %s5073_s14  ;;  %4414 = vmatmul.mubr.msk.f32.vlgmr.msra.gmra.mrb[56].mxu1 %vm101_vm1, %v2766_v59 }
0x1a2e   :  { %2931 = vrot.lane.b32.xlu0 %v5833_v25, %s5077_s24 }
0x1a31   :  { %2759 = vrot.lane.b32.xlu1 %v2736_v2, %s5072_s11 }
0x1a32   :  { %2935 = vrot.lane.b32.xlu0 %v5846_v46, %s5077_s24 }
0x1a35   :  { %2929 = vrot.lane.b32.xlu1 %v5813_v24, %s5077_s24 }
0x1a36   :  { %2939 = vrot.lane.b32.xlu0 %v5860_v6, %s5077_s24 }
0x1a39   :  { %2933 = vrot.lane.b32.xlu1 %v5825_v7, %s5077_s24 }
0x1a3d   :  { %2937 = vrot.lane.b32.xlu1 %v5838_v45, %s5077_s24 }
0x1a41   :  { %2941 = vrot.lane.b32.xlu1 %v5851_v48, %s5077_s24 }
0x1a93   :  { %v2742_v51 = vpop.permute.xlu0 %2741 }
0x1a94   :  { %2747 = vst.msk [vmem:[#allocation2 + $0x10] sm:$0xff] %vm101_vm1, %v2742_v51 }
0x1a97   :  { %v2744_v25 = vpop.permute.xlu1 %2743  ;;  %v2758_v46 = vpop.permute.xlu0 %2757 }
0x1a98   :  { %2748 = vst.msk [vmem:[#allocation2 + $0x18] sm:$0xff] %vm101_vm1, %v2744_v25  ;;  %2763 = vst.msk [vmem:[#allocation2 + $0x30] sm:$0xff] %vm101_vm1, %v2758_v46 }
0x1a9b   :  { %v2750_v24 = vpop.permute.xlu1 %2749  ;;  %v2767_v6 = vld [vmem:[#allocation2 + $0x10] sm:$0xff] }
0x1a9c   :  { %2755 = vst.msk [vmem:[#allocation2 + $0x20] sm:$0xff] %vm101_vm1, %v2750_v24  ;;  %4416 = vmatprep.mubr.msk.f32.mxu1 %vm101_vm1, %v2767_v6  ;;  %v2928_v32 = vpop.permute.xlu0 %2927 }
0x1a9f   :  { %v2752_v7 = vpop.permute.xlu1 %2751  ;;  %v2768_v45 = vld [vmem:[#allocation2 + $0x18] sm:$0xff]  ;;  %v2771_v4 = vld [vmem:[#allocation2 + $0x30] sm:$0xff] }
0x1aa0   :  { %2756 = vst.msk [vmem:[#allocation2 + $0x28] sm:$0xff] %vm101_vm1, %v2752_v7  ;;  %4417 = vmatmul.mubr.msk.f32.gmra.mrb[58].mxu1 %vm101_vm1, %v2768_v45  ;;  %v2932_v39 = vpop.permute.xlu0 %2931 }
0x1aa3   :  { %v2760_v48 = vpop.permute.xlu1 %2759  ;;  %v2769_v8 = vld [vmem:[#allocation2 + $0x20] sm:$0xff] }
0x1aa4   :  { %2764 = vst.msk [vmem:[#allocation2 + $0x38] sm:$0xff] %vm101_vm1, %v2760_v48  ;;  %4419 = vmatprep.mubr.msk.f32.mxu1 %vm101_vm1, %v2769_v8  ;;  %v2936_v22 = vpop.permute.xlu0 %2935 }
0x1aa7   :  { %v2770_v58 = vld [vmem:[#allocation2 + $0x28] sm:$0xff]  ;;  %v2930_v12 = vpop.permute.xlu1 %2929 }
0x1aa8   :  { %4420 = vmatmul.mubr.msk.f32.gmra.mrb[60].mxu1 %vm101_vm1, %v2770_v58  ;;  %v2940_v63 = vpop.permute.xlu0 %2939 }
0x1aa9   :  { %4422 = vmatprep.mubr.msk.f32.mxu1 %vm101_vm1, %v2771_v4 }
0x1aab   :  { %v2772_v13 = vld [vmem:[#allocation2 + $0x38] sm:$0xff]  ;;  %v2934_v38 = vpop.permute.xlu1 %2933 }
0x1aac   :  { %4423 = vmatmul.mubr.msk.f32.gmra.mrb[62].mxu1 %vm101_vm1, %v2772_v13 }
0x1aaf   :  { %v2938_v21 = vpop.permute.xlu1 %2937 }
0x1ab3   :  { %v2942_v56 = vpop.permute.xlu1 %2941 }
0x1b00   :  { %v4415_v15 = vpop.f32.mrb[56].mxu1 }
0x1b01   :  { %v2864_v16 = vpop.f32.mrb[57].mxu1  ;;  %v2870_v26 = vadd.f32 %v5041_v17, %v4415_v15 }
0x1b02   :  { %v2865_v27 = vadd.f32 %v5041_v17, %v2864_v16 }
0x1b04   :  { %4441 = vmatprep.mubr.msk.f32.mxu0 %vm101_vm1, %v2865_v27 }
0x1b05   :  { %4442 = vmatmul.mubr.msk.f32.vlgmr.msra.gmra.mrb[34].mxu0 %vm101_vm1, %v2870_v26 }
0x1b73   :  { %v4418_v3 = vpop.f32.mrb[58].mxu1 }
0x1b74   :  { %v2874_v55 = vpop.f32.mrb[59].mxu1  ;;  %v2880_v40 = vadd.f32 %v5041_v17, %v4418_v3 }
0x1b75   :  { %v2875_v28 = vadd.f32 %v5041_v17, %v2874_v55 }
0x1b77   :  { %4444 = vmatprep.mubr.msk.f32.mxu0 %vm101_vm1, %v2875_v28 }
0x1b78   :  { %4445 = vmatmul.mubr.msk.f32.gmra.mrb[36].mxu0 %vm101_vm1, %v2880_v40 }
0x1b7b   :  { %v4421_v41 = vpop.f32.mrb[60].mxu1 }
0x1b7c   :  { %v2884_v50 = vpop.f32.mrb[61].mxu1  ;;  %v2890_v57 = vadd.f32 %v5041_v17, %v4421_v41 }
0x1b7d   :  { %v2885_v47 = vadd.f32 %v5041_v17, %v2884_v50 }
0x1b7f   :  { %v4424_v53 = vpop.f32.mrb[62].mxu1  ;;  %4447 = vmatprep.mubr.msk.f32.mxu0 %vm101_vm1, %v2885_v47 }
0x1b80   :  { %v2894_v61 = vpop.f32.mrb[63].mxu1  ;;  %4448 = vmatmul.mubr.msk.f32.gmra.mrb[38].mxu0 %vm101_vm1, %v2890_v57  ;;  %v2900_v11 = vadd.f32 %v5041_v17, %v4424_v53 }
0x1b81   :  { %v2895_v29 = vadd.f32 %v5041_v17, %v2894_v61 }
0x1b83   :  { %4450 = vmatprep.mubr.msk.f32.mxu0 %vm101_vm1, %v2895_v29 }
0x1b84   :  { %4451 = vmatmul.mubr.msk.f32.gmra.mrb[40].mxu0 %vm101_vm1, %v2900_v11 }
0x1bd8   :  { %v4443_v10 = vpop.f32.mrb[34].mxu0 }
0x1bd9   :  { %v3071_v34 = vadd.f32 %v4443_v10, %v2930_v12  ;;  %v3065_v9 = vpop.f32.mrb[35].mxu0 }
0x1bda   :  { %v3066_v35 = vadd.f32 %v3065_v9, %v2928_v32 }
0x1bdb   :  { %v3107_v36 = vsel %vm613_vm3, %v3071_v34, -inf }
0x1bdc   :  { %3108 = vmax.xlane.f32.xlu1 %v3107_v36  ;;  %v3104_v37 = vsel %vm613_vm3, %v3066_v35, -inf }
0x1bdd   :  { %3105 = vmax.xlane.f32.xlu0 %v3104_v37 }
0x1c4b   :  { %v4446_v18 = vpop.f32.mrb[36].mxu0 }
0x1c4c   :  { %v3081_v54 = vadd.f32 %v4446_v18, %v2934_v38  ;;  %v3075_v60 = vpop.f32.mrb[37].mxu0 }
0x1c4d   :  { %v3076_v19 = vadd.f32 %v3075_v60, %v2932_v39 }
0x1c4e   :  { %v3113_v20 = vsel %vm613_vm3, %v3081_v54, -inf }
0x1c4f   :  { %3114 = vmax.xlane.f32.xlu0 %v3113_v20  ;;  %v3110_v14 = vsel %vm613_vm3, %v3076_v19, -inf }
0x1c53   :  { %v4449_v23 = vpop.f32.mrb[38].mxu0  ;;  %3111 = vmax.xlane.f32.xlu0 %v3110_v14 }
0x1c54   :  { %v3091_v1 = vadd.f32 %v4449_v23, %v2938_v21  ;;  %v3085_v44 = vpop.f32.mrb[39].mxu0 }
0x1c55   :  { %v3086_v0 = vadd.f32 %v3085_v44, %v2936_v22 }
0x1c56   :  { %v3119_v62 = vsel %vm613_vm3, %v3091_v1, -inf }
0x1c57   :  { %3120 = vmax.xlane.f32.xlu1 %v3119_v62  ;;  %v4452_v2 = vpop.f32.mrb[40].mxu0  ;;  %v3116_v43 = vsel %vm613_vm3, %v3086_v0, -inf }
0x1c58   :  { %v3101_v59 = vadd.f32 %v4452_v2, %v2942_v56  ;;  %v3095_v51 = vpop.f32.mrb[41].mxu0  ;;  %3117 = vmax.xlane.f32.xlu0 %v3116_v43 }
0x1c59   :  { %v3096_v25 = vadd.f32 %v3095_v51, %v2940_v63 }
0x1c5a   :  { %v3125_v46 = vsel %vm613_vm3, %v3101_v59, -inf }
0x1c5b   :  { %3126 = vmax.xlane.f32.xlu1 %v3125_v46  ;;  %v3122_v24 = vsel %vm613_vm3, %v3096_v25, -inf }
0x1c5c   :  { %3123 = vmax.xlane.f32.xlu0 %v3122_v24 }
0x1c69   :  { %v3109_v6 = vpop.xlane.xlu1 %3108 }
0x1c6a   :  { %v3106_v7 = vpop.xlane.xlu0 %3105  ;;  %v3129_v45 = vsub.f32 %v3071_v34, %v3109_v6 }
0x1c6b   :  { %v3128_v48 = vsub.f32 %v3066_v35, %v3106_v7 }
0x1c6c   :  { %4861 = vrot.lane.b32.xlu1 %v5495_v31, %s5071_s10  ;;  %v3138_v8 = vmul.f32 1.442695, %v3129_v45 }
0x1c6d   :  { %v3136_v58 = vmul.f32 1.442695, %v3128_v48 }
0x1c6e   :  { %4995 = vpow2.f32 %v3138_v8 }
0x1c6f   :  { %4997 = vpow2.f32 %v3136_v58 }
0x1c72   :  { %4856 = vrot.lane.b32.xlu0 %v5493_v42, %s5071_s10 }
0x1c78   :  { %v6021_v4 = vpop.eup %4995 }
0x1c79   :  { %v6023_v13 = vpop.eup %4997  ;;  %v3155_v15 = vsel %vm613_vm3, %v6021_v4, 0.0 }
0x1c7a   :  { %v3152_v31 = vsel %vm613_vm3, %v6023_v13, 0.0 }
0x1c90   :  { %3156 = vadd.xlane.f32.xlu1 %v3155_v15 }
0x1c91   :  { %3153 = vadd.xlane.f32.xlu0 %v3152_v31 }
0x1cdc   :  { %v3115_v42 = vpop.xlane.xlu0 %3114 }
0x1cdd   :  { %v3131_v16 = vsub.f32 %v3081_v54, %v3115_v42 }
0x1cdf   :  { %v3142_v17 = vmul.f32 1.442695, %v3131_v16 }
0x1ce0   :  { %v3112_v27 = vpop.xlane.xlu0 %3111 }
0x1ce1   :  { %4999 = vpow2.f32 %v3142_v17  ;;  %v3130_v26 = vsub.f32 %v3076_v19, %v3112_v27 }
0x1ce3   :  { %v3140_v3 = vmul.f32 1.442695, %v3130_v26 }
0x1ce4   :  { %v3121_v55 = vpop.xlane.xlu1 %3120 }
0x1ce5   :  { %5001 = vpow2.f32 %v3140_v3  ;;  %v3133_v28 = vsub.f32 %v3091_v1, %v3121_v55  ;;  %v3118_v40 = vpop.xlane.xlu0 %3117 }
0x1ce6   :  { %v3132_v41 = vsub.f32 %v3086_v0, %v3118_v40 }
0x1ce7   :  { %v3146_v50 = vmul.f32 1.442695, %v3133_v28 }
0x1ce8   :  { %v3144_v47 = vmul.f32 1.442695, %v3132_v41  ;;  %v3127_v57 = vpop.xlane.xlu1 %3126  ;;  %v3893_v41 = vld [vmem:[%s6167_s4 + $0x20] sm:$0xff] }
0x1ce9   :  { %5003 = vpow2.f32 %v3146_v50  ;;  %v3135_v53 = vsub.f32 %v3101_v59, %v3127_v57  ;;  %v3124_v61 = vpop.xlane.xlu0 %3123  ;;  %v3894_v50 = vld [vmem:[%s6167_s4 + $0x28] sm:$0xff] }
0x1cea   :  { %5005 = vpow2.f32 %v3144_v47  ;;  %v3134_v29 = vsub.f32 %v3096_v25, %v3124_v61  ;;  %v4718_v47 = vpack.c.bf16 %v3894_v50, %v3893_v41  ;;  %v3895_v61 = vld [vmem:[%s6167_s4 + $0x30] sm:$0xff]  ;;  %v3901_v41 = vld [vmem:[%s6168_s5 + $0x20] sm:$0xff]  ;;  %v3902_v50 = vld [vmem:[%s6168_s5 + $0x28] sm:$0xff] }
0x1ceb   :  { %v6029_v11 = vpop.eup %4999  ;;  %v3150_v12 = vmul.f32 1.442695, %v3135_v53 }
0x1cec   :  { %v3148_v32 = vmul.f32 1.442695, %v3134_v29  ;;  %v4862_v10 = vpop.permute.xlu1 %4861  ;;  %v3161_v34 = vsel %vm613_vm3, %v6029_v11, 0.0  ;;  %v3896_v29 = vld [vmem:[%s6167_s4 + $0x38] sm:$0xff] }
0x1ced   :  { %5007 = vpow2.f32 %v3150_v12  ;;  %3162 = vadd.xlane.f32.xlu1 %v3161_v34  ;;  %v4857_v9 = vpop.permute.xlu0 %4856  ;;  %v4864_v35 = vunpack.i.h.bf16 %v4862_v10  ;;  %v4863_v36 = vunpack.i.l.bf16 %v4862_v10 }
0x1cee   :  { %v4859_v37 = vunpack.i.h.bf16 %v4857_v9  ;;  %v4858_v38 = vunpack.i.l.bf16 %v4857_v9  ;;  %5009 = vpow2.f32 %v3148_v32 }
0x1cef   :  { %v5002_v18 = vpop.eup %5001  ;;  %v4706_v60 = vpack.c.bf16 %v4864_v35, %v4863_v36 }
0x1cf0   :  { %v4702_v39 = vpack.c.bf16 %v4859_v37, %v4858_v38  ;;  %v3158_v54 = vsel %vm613_vm3, %v5002_v18, 0.0 }
0x1cf1   :  { %3159 = vadd.xlane.f32.xlu0 %v3158_v54 }
0x1cf2   :  { %4703 = vmatprep.subr.bf16.mxu1 %v4702_v39 }
0x1cf3   :  { %v5004_v19 = vpop.eup %5003  ;;  %4705 = vmatpush3.bf16.msra.mxu1 %v4702_v39 }
0x1cf4   :  { %v5006_v20 = vpop.eup %5005  ;;  %4707 = vmatprep.subr.bf16.mxu1 %v4706_v60  ;;  %v3167_v21 = vsel %vm613_vm3, %v5004_v19, 0.0 }
0x1cf5   :  { %3168 = vadd.xlane.f32.xlu1 %v3167_v21  ;;  %v3164_v22 = vsel %vm613_vm3, %v5006_v20, 0.0 }
0x1cf6   :  { %3165 = vadd.xlane.f32.xlu0 %v3164_v22 }
0x1cf7   :  { %v5008_v14 = vpop.eup %5007  ;;  %4709 = vmatpush3.bf16.msra.mxu1 %v4706_v60 }
0x1cf8   :  { %v3173_v23 = vsel %vm613_vm3, %v5008_v14, 0.0  ;;  %v5010_v1 = vpop.eup %5009 }
0x1cf9   :  { %3174 = vadd.xlane.f32.xlu1 %v3173_v23  ;;  %v3170_v44 = vsel %vm613_vm3, %v5010_v1, 0.0  ;;  %v5042_v23 = vld [vmem:[%s6169_s6 + $0x9] ss:$0 sm:$0xff] }
0x1cfd   :  { %3171 = vadd.xlane.f32.xlu1 %v3170_v44 }
0x1d0c   :  { %4866 = vrot.lane.b32.xlu0 %v5497_v49, %s5071_s10 }
0x1d0e   :  { %4871 = vrot.lane.b32.xlu1 %v5504_v52, %s5071_s10 }
0x1d1d   :  { %v3157_v63 = vpop.xlane.xlu1 %3156 }
0x1d1e   :  { %v3154_v0 = vpop.xlane.xlu0 %3153 }
0x1d1f   :  { %5011 = vrcp.f32 %v3154_v0 }
0x1d20   :  { %5013 = vrcp.f32 %v3157_v63 }
0x1d29   :  { %v5012_v56 = vpop.eup %5011 }
0x1d2a   :  { %v3184_v62 = vmul.f32 %v5012_v56, %v6023_v13  ;;  %v5014_v58 = vpop.eup %5013 }
0x1d2b   :  { %v3185_v15 = vmul.f32 %v5014_v58, %v6021_v4 }
0x1d2c   :  { %4469 = vmatprep.mubr.msk.f32.mxu1 %vm613_vm3, %v3184_v62 }
0x1d7a   :  { %v3163_v2 = vpop.xlane.xlu1 %3162 }
0x1d7e   :  { %v3160_v43 = vpop.xlane.xlu0 %3159 }
0x1d7f   :  { %5015 = vrcp.f32 %v3160_v43 }
0x1d80   :  { %5017 = vrcp.f32 %v3163_v2 }
0x1d82   :  { %v3169_v59 = vpop.xlane.xlu1 %3168 }
0x1d83   :  { %v3166_v51 = vpop.xlane.xlu0 %3165 }
0x1d84   :  { %5019 = vrcp.f32 %v3166_v51 }
0x1d85   :  { %5021 = vrcp.f32 %v3169_v59 }
0x1d86   :  { %v3175_v25 = vpop.xlane.xlu1 %3174 }
0x1d87   :  { %v4867_v46 = vpop.permute.xlu0 %4866 }
0x1d88   :  { %v4869_v24 = vunpack.i.h.bf16 %v4867_v46  ;;  %v4868_v49 = vunpack.i.l.bf16 %v4867_v46 }
0x1d89   :  { %v5016_v13 = vpop.eup %5015 }
0x1d8a   :  { %v4710_v6 = vpack.c.bf16 %v4869_v24, %v4868_v49  ;;  %v3172_v52 = vpop.xlane.xlu1 %3171  ;;  %v5018_v31 = vpop.eup %5017  ;;  %v3186_v42 = vmul.f32 %v5016_v13, %v5002_v18  ;;  %v3498_v24 = vld [vmem:[%s6168_s5] sm:$0xff]  ;;  %v3499_v49 = vld [vmem:[%s6168_s5 + $0x8] sm:$0xff] }
0x1d8b   :  { %5023 = vrcp.f32 %v3172_v52  ;;  %v3187_v17 = vmul.f32 %v5018_v31, %v6029_v11  ;;  %v4722_v11 = vpack.c.bf16 %v3896_v29, %v3895_v61  ;;  %v3500_v52 = vld [vmem:[%s6168_s5 + $0x10] sm:$0xff] }
0x1d8c   :  { %4711 = vmatprep.subr.bf16.mxu1 %v4710_v6  ;;  %5025 = vrcp.f32 %v3175_v25 }
0x1d8d   :  { %4713 = vmatpush3.bf16.msra.mxu1 %v4710_v6  ;;  %v4726_v6 = vpack.c.bf16 %v3499_v49, %v3498_v24 }
0x1d8e   :  { %v4872_v7 = vpop.permute.xlu1 %4871  ;;  %v5020_v16 = vpop.eup %5019 }
0x1d8f   :  { %v4874_v45 = vunpack.i.h.bf16 %v4872_v7  ;;  %v4873_v48 = vunpack.i.l.bf16 %v4872_v7  ;;  %v5022_v27 = vpop.eup %5021  ;;  %v3188_v26 = vmul.f32 %v5020_v16, %v5006_v20  ;;  %v3501_v7 = vld [vmem:[%s6168_s5 + $0x18] sm:$0xff] }
0x1d90   :  { %v3189_v55 = vmul.f32 %v5022_v27, %v5004_v19 }
0x1d91   :  { %v4714_v8 = vpack.c.bf16 %v4874_v45, %v4873_v48  ;;  %v4730_v45 = vpack.c.bf16 %v3501_v7, %v3500_v52 }
0x1d93   :  { %4715 = vmatprep.subr.bf16.mxu1 %v4714_v8 }
0x1d94   :  { %4717 = vmatpush3.bf16.msra.mxu1 %v4714_v8 }
0x1d95   :  { %v5024_v3 = vpop.eup %5023  ;;  %4719 = vmatprep.subr.bf16.mxu1 %v4718_v47 }
0x1d96   :  { %v5026_v28 = vpop.eup %5025  ;;  %v3190_v40 = vmul.f32 %v5024_v3, %v5010_v1 }
0x1d97   :  { %4470 = vmatmul.mubr.msk.f32.vlgmr.msra.gmra.mrb[64].mxu1 %vm613_vm3, %v3185_v15  ;;  %v3191_v4 = vmul.f32 %v5026_v28, %v5008_v14 }
0x1d98   :  { %4472 = vmatprep.mubr.msk.f32.mxu1 %vm613_vm3, %v3186_v42  ;;  %4721 = vmatpush3.bf16.msra.mxu1 %v4718_v47  ;;  %v4734_v47 = vpack.c.bf16 %v3902_v50, %v3901_v41 }
0x1d99   :  { %4723 = vmatprep.subr.bf16.mxu1 %v4722_v11 }
0x1d9a   :  { %4736 = vmatprep.subr.msk.bf16.mxu0 %vm5672_vm8, %v4734_v47 }
0x1d9b   :  { %4473 = vmatmul.mubr.msk.f32.gmra.mrb[66].mxu1 %vm613_vm3, %v3187_v17  ;;  %v5043_v17 = vld [vmem:[%s6169_s6 + $0x4] ss:$0 sm:$0xff]  ;;  %4739 = vmatpush3.bf16.xpose.msk.msra.mxu0 %vm5672_vm8, %v4734_v47 }
0x1d9c   :  { %4475 = vmatprep.mubr.msk.f32.mxu1 %vm613_vm3, %v3188_v26  ;;  %4725 = vmatpush3.bf16.msra.mxu1 %v4722_v11  ;;  %v5045_v11 = vld [vmem:[%s6169_s6 + $0xa] ss:$0 sm:$0xff] }
0x1d9d   :  { %4727 = vmatprep.subr.bf16.mxu1 %v4726_v6 }
0x1d9f   :  { %4476 = vmatmul.mubr.msk.f32.gmra.mrb[68].mxu1 %vm613_vm3, %v3189_v55  ;;  %v5044_v55 = vld [vmem:[%s6169_s6 + $0x5] ss:$0 sm:$0xff] }
0x1da0   :  { %4478 = vmatprep.mubr.msk.f32.mxu1 %vm613_vm3, %v3190_v40 }
0x1da3   :  { %4479 = vmatmul.mubr.msk.f32.gmra.mrb[70].mxu1 %vm613_vm3, %v3191_v4 }
0x1e6a   :  { %v4471_v57 = vpop.f32.mrb[64].mxu1 }
0x1e6b   :  { %3346 = vst.msk [vmem:[#allocation3 + $0x8] sm:$0xff] %vm101_vm1, %v4471_v57  ;;  %v3306_v53 = vpop.f32.mrb[65].mxu1  ;;  %v3903_v57 = vld [vmem:[%s6168_s5 + $0x30] sm:$0xff] }
0x1e6c   :  { %3345 = vst.msk [vmem:[#allocation3] sm:$0xff] %vm101_vm1, %v3306_v53  ;;  %v3904_v53 = vld [vmem:[%s6168_s5 + $0x38] sm:$0xff]  ;;  %s5078_s5 = smov [#allocation5]  }
0x1e6d   :  { %v4740_v61 = vpack.c.bf16 %v3904_v53, %v3903_v57  ;;  %s3709_s0 = sshll.u32 %s5078_s5, 4  ;;  %s3710_s0 = int_to_ptr.vmem [resolvable:$true] %s3709_s0 }
0x1e6e   :  { %v4474_v12 = vpop.f32.mrb[66].mxu1  ;;  %s5047_s4 = scalar_lea.vmem %s3710_s0, 256  ;;  %p5052_p1 = scmp.lt.s32.totalorder %s3710_s0, %s3710_s0 }
0x1e6f   :  { %3351 = vrot.lane.b32.xlu1 %v4474_v12, %s5074_s12  ;;  %v3316_v32 = vpop.f32.mrb[67].mxu1  ;;  %4742 = vmatprep.subr.msk.bf16.mxu0 %vm5672_vm8, %v4740_v61  ;;  %p5048_p0 = scmp.ne.s32.totalorder %s3710_s0, %s5047_s4  ;;  %p5053_p2 = scmp.lt.s32.totalorder %s5047_s4, %s5047_s4 }
0x1e70   :  { %3349 = vrot.lane.b32.xlu0 %v3316_v32, %s5074_s12  ;;  %4745 = vmatpush3.bf16.xpose.msk.msra.mxu0 %vm5672_vm8, %v4740_v61 }
0x1e71   :  { %p5054_p3 = por %p5053_p2, %p5052_p1 }
0x1e72   :  { %v4477_v10 = vpop.f32.mrb[68].mxu1 }
0x1e73   :  { %3361 = vrot.lane.b32.xlu1 %v4477_v10, %s5075_s13  ;;  %v3326_v34 = vpop.f32.mrb[69].mxu1  ;;  %p5055_p4 = pnand %p5054_p3, %p5048_p0 }
0x1e74   :  { %3359 = vrot.lane.b32.xlu0 %v3326_v34, %s5075_s13 }
0x1e76   :  { %v4480_v9 = vpop.f32.mrb[70].mxu1 }
0x1e77   :  { %3371 = vrot.lane.b32.xlu1 %v4480_v9, %s5076_s15  ;;  %v3336_v35 = vpop.f32.mrb[71].mxu1 }
0x1e78   :  { %3369 = vrot.lane.b32.xlu0 %v3336_v35, %s5076_s15 }
0x1ee1   :  { %v3352_v36 = vpop.permute.xlu1 %3351 }
0x1ee2   :  { %3356 = vst.msk [vmem:[#allocation3 + $0x8] sm:$0xff] %vm865_vm4, %v3352_v36  ;;  %v3350_v37 = vpop.permute.xlu0 %3349 }
0x1ee3   :  { %3355 = vst.msk [vmem:[#allocation3] sm:$0xff] %vm865_vm4, %v3350_v37 }
0x1ee5   :  { %v3362_v38 = vpop.permute.xlu1 %3361 }
0x1ee6   :  { %3366 = vst.msk [vmem:[#allocation3 + $0x8] sm:$0xff] %vm876_vm5, %v3362_v38  ;;  %v3360_v18 = vpop.permute.xlu0 %3359 }
0x1ee7   :  { %3365 = vst.msk [vmem:[#allocation3] sm:$0xff] %vm876_vm5, %v3360_v18 }
0x1ee9   :  { %v3372_v39 = vpop.permute.xlu1 %3371 }
0x1eea   :  { %3376 = vst.msk [vmem:[#allocation3 + $0x8] sm:$0xff] %vm887_vm6, %v3372_v39  ;;  %v3370_v54 = vpop.permute.xlu0 %3369 }
0x1eeb   :  { %3375 = vst.msk [vmem:[#allocation3] sm:$0xff] %vm887_vm6, %v3370_v54 }
0x1ef1   :  { %v3378_v19 = vld [vmem:[#allocation3 + $0x8] sm:$0xff] }
0x1ef2   :  { %v3377_v60 = vld [vmem:[#allocation3] sm:$0xff] }
0x1ef3   :  { %4489 = vmatprep.mubr.msk.f32.mxu1 %vm242_vm0, %v3377_v60 }
0x1ef4   :  { %4490 = vmatmul.mubr.msk.f32.vlgmr.msra.gmra.mrb[72].mxu1 %vm242_vm0, %v3378_v19 }
0x1ef5   :  { %4729 = vmatpush3.bf16.msra.mxu1 %v4726_v6 }
0x1ef6   :  { %4731 = vmatprep.subr.bf16.mxu1 %v4730_v45 }
0x1ef9   :  { %4733 = vmatpush3.bf16.msra.mxu1 %v4730_v45 }
0x1fc7   :  { %v4491_v20 = vpop.f32.mrb[72].mxu1 }
0x1fc8   :  { %v3465_v21 = vadd.f32 %v4491_v20, %v5939_v5  ;;  %v3455_v22 = vpop.f32.mrb[73].mxu1 }
0x1fc9   :  { %v3464_v14 = vadd.f32 %v3455_v22, %v5941_v30 }
0x1fca   :  { %v6086_v1 = vadd.f32 %v5042_v23, %v3465_v21 }
0x1fcb   :  { %v6088_v44 = vadd.f32 %v5042_v23, %v3464_v14 }
0x1fcc   :  { %v3471_v0 = vsel %vm242_vm0, %v6086_v1, 0.0 }
0x1fcd   :  { %3472 = vadd.xlane.f32.xlu1 %v3471_v0  ;;  %v3468_v56 = vsel %vm242_vm0, %v6088_v44, 0.0 }
0x1fce   :  { %3469 = vadd.xlane.f32.xlu0 %v3468_v56 }
0x205a   :  { %v3473_v5 = vpop.xlane.xlu1 %3472 }
0x205b   :  { %v3475_v62 = vmul.f32 0.03125, %v3473_v5  ;;  %v3470_v63 = vpop.xlane.xlu0 %3469 }
0x205c   :  { %v3474_v30 = vmul.f32 0.03125, %v3470_v63 }
0x205d   :  { %v3477_v2 = vsub.f32 %v6086_v1, %v3475_v62 }
0x205e   :  { %v3476_v43 = vsub.f32 %v6088_v44, %v3474_v30  ;;  %v5046_v30 = vld [vmem:[%s6169_s6 + $0xb] ss:$0 sm:$0xff] }
0x205f   :  { %v3479_v25 = vmul.f32 %v3477_v2, %v3477_v2 }
0x2060   :  { %v3478_v59 = vmul.f32 %v3476_v43, %v3476_v43 }
0x2061   :  { %v3483_v46 = vsel %vm242_vm0, %v3479_v25, 0.0 }
0x2062   :  { %v3480_v51 = vsel %vm242_vm0, %v3478_v59, 0.0 }
0x2063   :  { %3481 = vadd.xlane.f32.xlu0 %v3480_v51 }
0x2067   :  { %3484 = vadd.xlane.f32.xlu0 %v3483_v46 }
0x20f0   :  { %v3482_v48 = vpop.xlane.xlu0 %3481 }
0x20f1   :  { %v3486_v8 = vmul.f32 0.03125, %v3482_v48 }
0x20f3   :  { %v3488_v58 = vadd.f32 1e-12, %v3486_v8 }
0x20f4   :  { %v3485_v13 = vpop.xlane.xlu0 %3484 }
0x20f5   :  { %5027 = vrsqrt.f32 %v3488_v58  ;;  %v3487_v15 = vmul.f32 0.03125, %v3485_v13 }
0x20f7   :  { %v3489_v31 = vadd.f32 1e-12, %v3487_v15 }
0x20f9   :  { %5029 = vrsqrt.f32 %v3489_v31 }
0x20ff   :  { %v5028_v42 = vpop.eup %5027 }
0x2100   :  { %v3492_v16 = vmul.f32 %v5028_v42, %v3476_v43 }
0x2102   :  { %v3494_v27 = vmul.f32 %v5043_v17, %v3492_v16 }
0x2103   :  { %v5030_v26 = vpop.eup %5029 }
0x2104   :  { %v3493_v3 = vmul.f32 %v5030_v26, %v3477_v2  ;;  %v3496_v28 = vadd.f32 %v5044_v55, %v3494_v27 }
0x2106   :  { %v3495_v40 = vmul.f32 %v5043_v17, %v3493_v3  ;;  %4500 = vmatprep.mubr.msk.f32.mxu1 %vm242_vm0, %v3496_v28 }
0x2108   :  { %v3497_v4 = vadd.f32 %v5044_v55, %v3495_v40 }
0x210a   :  { %4501 = vmatmul.mubr.msk.f32.vlgmr.msra.gmra.mrb[74].mxu1 %vm242_vm0, %v3497_v4 }
0x21dd   :  { %v4502_v29 = vpop.f32.mrb[74].mxu1 }
0x21de   :  { %v3580_v12 = vadd.f32 %v5045_v11, %v4502_v29  ;;  %v3574_v32 = vpop.f32.mrb[75].mxu1 }
0x21df   :  { %v3575_v10 = vadd.f32 %v5045_v11, %v3574_v32 }
0x21e0   :  { %v3586_v34 = vmul.f32 %v3580_v12, %v3580_v12  ;;  %v3584_v14 = vmul.f32 0.5, %v3580_v12 }
0x21e1   :  { %v3585_v9 = vmul.f32 %v3575_v10, %v3575_v10  ;;  %v3583_v21 = vmul.f32 0.5, %v3575_v10 }
0x21e2   :  { %v3588_v35 = vmul.f32 %v3586_v34, %v3580_v12 }
0x21e3   :  { %v3587_v36 = vmul.f32 %v3585_v9, %v3575_v10 }
0x21e4   :  { %v3590_v37 = vmul.f32 0.044715, %v3588_v35 }
0x21e5   :  { %v3589_v38 = vmul.f32 0.044715, %v3587_v36 }
0x21e6   :  { %v3592_v18 = vadd.f32 %v3590_v37, %v3580_v12 }
0x21e7   :  { %v3591_v39 = vadd.f32 %v3589_v38, %v3575_v10 }
0x21e8   :  { %v3594_v54 = vmul.f32 0.7978846, %v3592_v18 }
0x21e9   :  { %v3593_v60 = vmul.f32 0.7978846, %v3591_v39 }
0x21ea   :  { %5031 = vtanh.f32 %v3594_v54 }
0x21eb   :  { %5033 = vtanh.f32 %v3593_v60 }
0x21f4   :  { %v5032_v33 = vpop.eup %5031 }
0x21f5   :  { %v5034_v19 = vpop.eup %5033  ;;  %v3598_v20 = vadd.f32 1.0, %v5032_v33 }
0x21f6   :  { %v3597_v22 = vadd.f32 1.0, %v5034_v19 }
0x21f7   :  { %v3600_v0 = vmul.f32 %v3598_v20, %v3584_v14 }
0x21f8   :  { %v3599_v23 = vmul.f32 %v3597_v22, %v3583_v21 }
0x21fa   :  { %4511 = vmatprep.mubr.msk.f32.mxu0 %vm613_vm3, %v3599_v23 }
0x21fb   :  { %4512 = vmatmul.mubr.msk.f32.vlgmr.msra.gmra.mrb[42].mxu0 %vm613_vm3, %v3600_v0 }
0x22ce   :  { %v4513_v56 = vpop.f32.mrb[42].mxu0 }
0x22cf   :  { %v3699_v5 = vadd.f32 %v4513_v56, %v6086_v1  ;;  %v3689_v62 = vpop.f32.mrb[43].mxu0 }
0x22d0   :  { %v3698_v63 = vadd.f32 %v3689_v62, %v6088_v44 }
0x22d1   :  { %v3701_v2 = vadd.f32 %v5046_v30, %v3699_v5 }
0x22d2   :  { %v3700_v43 = vadd.f32 %v5046_v30, %v3698_v63 }
0x22d3   :  { %3703 = vst.msk [vmem:[#allocation5 + $0x8] sm:$0xff] %vm242_vm0, %v3701_v2 }
0x22d4   :  { %3702 = vst.msk [vmem:[#allocation5] sm:$0xff] %vm242_vm0, %v3700_v43 }
0x22d5   :  { %5058 = shalt.err (!%p5055_p4)
}
0x22d6   :  { %s5059_s29 = scalar_lea.hbm %s6170_s7, 256 }
0x22d7   :  { %p5060_p5 = scmp.ne.s32.totalorder %s6170_s7, %s5059_s29  ;;  %p5063_p6 = scmp.lt.u32.totalorder %s5059_s29, %s6170_s7 }
0x22d9   :  { %p5065_p7 = pnand %p5063_p6, %p5060_p5 }
0x22db   :  { %5068 = shalt.err (!%p5065_p7)
}
0x22dc   :  { %s5079_s9 = smov 128  }
0x22dd   :  { %3715 = dma.vmem_to_hbm [thread:$0]  %s3710_s0, 256, %s6170_s7, [#allocation6], %s5079_s9, %s5079_s9, %s5074_s12  }
0x22de   :  { %5069 = dma.done.wait [#allocation6], 256  }
0x22df   :  { %5070 = vsyncadd [#allocation6], 4294967040 }
0x22e0   :  { %3719 = vsyncpa [#allocation6], 1 }

</bundles_post_ra>
